<compile_context>
chip_gen: v5e
topology: v5e:2x2
jax: 0.10.0
libtpu: 0.0.40
codegen_flags: <defaults>
</compile_context>

<pallas_src>
import math

import jax
import jax.numpy as jnp
from jax import lax
from jax.experimental import pallas as pl
from jax.experimental.pallas import tpu as pltpu

# ----------------------------- configuration --------------------------------
B = 2            # batch
E = 32           # encoder_dim
A = 16           # attr_num
H = 4            # n_head
HD = E // H      # head_dim
G = 64           # glove_vector_length (module default 300; configurable arg)
R = 196          # region_num (hard-coded Resnet(196, dim) in ETN.__init__)
E2, E4 = E // 2, E // 4

LN_EPS = 1e-5            # nn.LayerNorm default
NORM_EPS = 1e-12         # F.normalize default
SCALE = 1.0 / math.sqrt(HD)
IMG_C, IMG_HW = 3, 16


# ------------------------- in-kernel helper math -----------------------------
def _l2norm(x):
    # torch.nn.functional.normalize(dim=-1): x / max(||x||_2, 1e-12)
    n = jnp.sqrt(jnp.sum(x * x, axis=-1, keepdims=True))
    return x / jnp.maximum(n, NORM_EPS)


def _layernorm(x, g, b):
    mu = jnp.mean(x, axis=-1, keepdims=True)
    var = jnp.mean((x - mu) ** 2, axis=-1, keepdims=True)
    return (x - mu) * lax.rsqrt(var + LN_EPS) * g + b


def _erf(x):
    # Abramowitz & Stegun 7.1.26 rational approximation, |err| < 1.5e-7
    # (~f32 precision) — avoids relying on an erf lowering inside Mosaic.
    ax = jnp.abs(x)
    t = 1.0 / (1.0 + 0.3275911 * ax)
    poly = ((((1.061405429 * t - 1.453152027) * t + 1.421413741) * t
             - 0.284496736) * t + 0.254829592) * t
    y = 1.0 - poly * jnp.exp(-ax * ax)
    return jnp.where(x >= 0.0, y, -y)


def _gelu_exact(x):
    # matches torch F.gelu default (erf-based, not tanh approximation)
    return 0.5 * x * (1.0 + _erf(x * (1.0 / math.sqrt(2.0))))


# --------------------------- the fused ETN kernel -----------------------------
def etn_fused_kernel(lf_ref, amask_ref, gf_ref,
                     wc_ref, w2vp_ref,
                     qw_ref, qb_ref, kvw_ref, kvb_ref,
                     pw_ref, pb_ref, lng_ref, lnb_ref,
                     wl_ref, wg_ref,
                     f1w_ref, f1b_ref, f2w_ref, f2b_ref, f3w_ref, f3b_ref,
                     fcoar_ref, res_ref):
    # lf_ref   : (1, R, E)  local features, one batch element
    # amask_ref: (1, A, E)  attr mask (VBL output; ones here)
    # gf_ref   : (1, 1, E)  global feature
    # wc_ref   : (A, E)     coarse_extractor.weight
    # w2vp_ref : (A, E)     W1(w2v) precomputed (batch independent)
    # qw/qb    : (E, E)/(1, E)     proj_q.weight^T / bias
    # kvw/kvb  : (E, 2E)/(1, 2E)   fused [LN_k->proj_k | LN_v->proj_v]
    # pw/pb    : (E, E)/(1, E)     APP proj
    # lng/lnb  : (1, E)            ETN LayerNorm
    # wl_ref   : (A, E)     W_l.weight   wg_ref: (E, A)  W_g.weight^T
    # f1..f3   : CPP weights (transposed) and biases
    # outputs  : fcoar_ref (1, A, E);  res_ref (1, 4, A) rows =
    #            [local_result, local_bias, global_result, global_bias]

    # ---------------- region attention -> F_coar ----------------
    lf = _l2norm(lf_ref[0])                                            # (R, E)
    wc = wc_ref[...]                                                   # (A, E)
    # region_weight^T: (A, R); contraction over E, no transpose materialized.
    rwt = lax.dot_general(wc, lf, (((1,), (1,)), ((), ())),
                          preferred_element_type=jnp.float32)          # (A, R)
    # softmax over the region axis (torch dim=1 of (B, R, A)) -> lanes here
    rwt = rwt - jnp.max(rwt, axis=-1, keepdims=True)
    ex = jnp.exp(rwt)
    rwt = ex / jnp.sum(ex, axis=-1, keepdims=True)
    attr = jnp.dot(rwt, lf, preferred_element_type=jnp.float32)        # (A, E)
    fcoar = _l2norm(attr)
    fcoar_ref[0] = fcoar

    # ---------------- APP attention ----------------
    w2v_corr = w2vp_ref[...] * amask_ref[0]                            # (A, E)
    # NOTE: reference APP.get_qkv computes norm_q(q) into an unused variable and
    # projects the *un-normalized* q — reproduced faithfully (no LN on q).
    q = (jnp.dot(w2v_corr, qw_ref[...], preferred_element_type=jnp.float32)
         + qb_ref[...])                                                # (A, E)
    # K/V: one un-affine LayerNorm of F_coar; gamma/beta folded into kvw/kvb.
    mu = jnp.mean(fcoar, axis=-1, keepdims=True)
    var = jnp.mean((fcoar - mu) ** 2, axis=-1, keepdims=True)
    xhat = (fcoar - mu) * lax.rsqrt(var + LN_EPS)
    kv = (jnp.dot(xhat, kvw_ref[...], preferred_element_type=jnp.float32)
          + kvb_ref[...])                                              # (A, 2E)
    k = kv[:, :E]
    v = kv[:, E:]

    heads = []
    for h in range(H):                       # static unroll over heads
        qh = q[:, h * HD:(h + 1) * HD]       # (A, HD)
        kh = k[:, h * HD:(h + 1) * HD]
        vh = v[:, h * HD:(h + 1) * HD]
        s = lax.dot_general(qh, kh, (((1,), (1,)), ((), ())),
                            preferred_element_type=jnp.float32)        # (A, A)
        s = _gelu_exact(s) * SCALE           # gelu first, then * scale (as in APP)
        s = s - jnp.max(s, axis=-1, keepdims=True)
        p = jnp.exp(s)
        p = p / jnp.sum(p, axis=-1, keepdims=True)
        heads.append(jnp.dot(p, vh, preferred_element_type=jnp.float32))  # (A, HD)
    o_all = jnp.concatenate(heads, axis=0)                             # (H*A, HD)

    # torch does out.reshape(B, C, N) on the contiguous (B, H, C, HD) tensor,
    # i.e. out2d[r, HD*m + d] = o_all[(E//HD)*r + m, d].  Fold this scramble
    # into the APP proj matmul with constant 0/1 selection matrices so that no
    # minor-dim reshape/transpose is needed in-kernel.
    pw = pw_ref[...]                                                   # (E, E)
    row_id = lax.broadcasted_iota(jnp.int32, (A, H * A), 0)
    col_id = lax.broadcasted_iota(jnp.int32, (A, H * A), 1)
    nblk = E // HD                                                     # = H = 4
    y = jnp.zeros((A, E), jnp.float32)
    for m in range(nblk):
        sel = (col_id == nblk * row_id + m).astype(jnp.float32)        # (A, H*A)
        blk = jnp.dot(sel, o_all, preferred_element_type=jnp.float32)  # (A, HD)
        y = y + jnp.dot(blk, pw[m * HD:(m + 1) * HD, :],
                        preferred_element_type=jnp.float32)            # (A, E)
    # APP tail: out = normalize(proj(out)); dropout is identity in eval mode
    y = _l2norm(y + pb_ref[...])

    # ---------------- ETN refine + local heads ----------------
    w2v_attr = _layernorm(y + fcoar, lng_ref[...], lnb_ref[...])
    # TODO(synk): GAFR class definition is not provided in the reference source;
    # treated as identity pass-through here.
    gafr_out = w2v_attr
    attr_refine = _l2norm(gafr_out + w2v_attr)

    # local_result = einsum('bae,ae->ba'); produced directly as a (1, A) row by
    # extracting the diagonal of attr_refine @ W_l^T (no transpose needed).
    d_mat = lax.dot_general(attr_refine, wl_ref[...], (((1,), (1,)), ((), ())),
                            preferred_element_type=jnp.float32)        # (A, A)
    eye = (lax.broadcasted_iota(jnp.int32, (A, A), 0) ==
           lax.broadcasted_iota(jnp.int32, (A, A), 1)).astype(jnp.float32)
    lres = jnp.sum(d_mat * eye, axis=0, keepdims=True)                 # (1, A)

    # CPP on attr_refine (ReLU), then mean over the attribute-token axis
    h1 = jnp.maximum(jnp.dot(attr_refine, f1w_ref[...],
                             preferred_element_type=jnp.float32) + f1b_ref[...], 0.0)
    h2 = jnp.maximum(jnp.dot(h1, f2w_ref[...],
                             preferred_element_type=jnp.float32) + f2b_ref[...], 0.0)
    lbias = jnp.mean(jnp.dot(h2, f3w_ref[...],
                             preferred_element_type=jnp.float32) + f3b_ref[...],
                     axis=0, keepdims=True)                            # (1, A)

    # ---------------- global heads ----------------
    gf = gf_ref[0]                                                     # (1, E)
    gres = jnp.dot(gf, wg_ref[...], preferred_element_type=jnp.float32)  # (1, A)
    g1 = jnp.maximum(jnp.dot(gf, f1w_ref[...],
                             preferred_element_type=jnp.float32) + f1b_ref[...], 0.0)
    g2 = jnp.maximum(jnp.dot(g1, f2w_ref[...],
                             preferred_element_type=jnp.float32) + f2b_ref[...], 0.0)
    gbias = (jnp.dot(g2, f3w_ref[...], preferred_element_type=jnp.float32)
             + f3b_ref[...])                                           # (1, A)

    # packed lane-dense result slab: (4, A)
    res_ref[0, 0:1, :] = lres
    res_ref[0, 1:2, :] = lbias
    res_ref[0, 2:3, :] = gres
    res_ref[0, 3:4, :] = gbias


# --------------------------- pallas_call wrapper ------------------------------
def run_etn_fused(local_feature, global_feature, attr_mask, w2v_proj, kp):
    b2 = lambda b: (0, 0)          # broadcast weights
    b3 = lambda b: (b, 0, 0)       # per-batch blocks

    fcoar, res = pl.pallas_call(
        etn_fused_kernel,
        out_shape=(jax.ShapeDtypeStruct((B, A, E), jnp.float32),
                   jax.ShapeDtypeStruct((B, 4, A), jnp.float32)),
        grid=(B,),
        in_specs=[
            pl.BlockSpec((1, R, E), b3),        # local_feature
            pl.BlockSpec((1, A, E), b3),        # attr_mask
            pl.BlockSpec((1, 1, E), b3),        # global_feature
            pl.BlockSpec((A, E), b2),           # coarse_extractor.weight
            pl.BlockSpec((A, E), b2),           # W1(w2v)
            pl.BlockSpec((E, E), b2),           # Wq^T
            pl.BlockSpec((1, E), b2),           # bq
            pl.BlockSpec((E, 2 * E), b2),       # fused LN_k/LN_v -> Wk/Wv
            pl.BlockSpec((1, 2 * E), b2),       # fused k/v bias
            pl.BlockSpec((E, E), b2),           # proj.weight^T
            pl.BlockSpec((1, E), b2),           # proj bias
            pl.BlockSpec((1, E), b2),           # ETN LN gamma
            pl.BlockSpec((1, E), b2),           # ETN LN beta
            pl.BlockSpec((A, E), b2),           # W_l.weight
            pl.BlockSpec((E, A), b2),           # W_g.weight^T
            pl.BlockSpec((E, E2), b2),          # CPP fc1 w^T
            pl.BlockSpec((1, E2), b2),          # CPP fc1 b
            pl.BlockSpec((E2, E4), b2),         # CPP fc2 w^T
            pl.BlockSpec((1, E4), b2),          # CPP fc2 b
            pl.BlockSpec((E4, A), b2),          # CPP fc3 w^T
            pl.BlockSpec((1, A), b2),           # CPP fc3 b
        ],
        out_specs=(pl.BlockSpec((1, A, E), b3),
                   pl.BlockSpec((1, 4, A), b3)),
        compiler_params=pltpu.CompilerParams(
            dimension_semantics=("parallel",)),   # 2-way batch over v7x's 2 TCs
    )(local_feature, attr_mask, global_feature.reshape(B, 1, E),
      kp['wc'], w2v_proj,
      kp['qw'], kp['qb'], kp['kvw'], kp['kvb'],
      kp['pw'], kp['pb'], kp['lng'], kp['lnb'],
      kp['wl'], kp['wg'],
      kp['f1w'], kp['f1b'], kp['f2w'], kp['f2b'], kp['f3w'], kp['f3b'])
    return fcoar, res


# ------------------------------ parameters -----------------------------------
def init_params(key):
    ks = jax.random.split(key, 13)

    def w(k, shape):
        return (0.02 * jax.random.normal(k, shape)).astype(jnp.float32)

    zeros = lambda n: jnp.zeros((n,), jnp.float32)
    ones = lambda n: jnp.ones((n,), jnp.float32)

    return {
        # ETN linear heads (bias=False)
        'coarse_w': w(ks[0], (A, E)),
        'W_g': w(ks[1], (A, E)),
        'W_l': w(ks[2], (A, E)),
        # W1: glove -> encoder_dim
        'W1_w': w(ks[3], (E, G)), 'W1_b': zeros(E),
        # APP
        'norm_k_g': ones(E), 'norm_k_b': zeros(E),
        'norm_v_g': ones(E), 'norm_v_b': zeros(E),
        'Wq': w(ks[4], (E, E)), 'bq': zeros(E),
        'Wk': w(ks[5], (E, E)), 'bk': zeros(E),
        'Wv': w(ks[6], (E, E)), 'bv': zeros(E),
        'proj_w': w(ks[7], (E, E)), 'proj_b': zeros(E),
        # ETN LayerNorm
        'norm_g': ones(E), 'norm_b': zeros(E),
        # CPP (shared for global/local bias, exactly as in the module)
        'fc1_w': w(ks[8], (E2, E)), 'fc1_b': zeros(E2),
        'fc2_w': w(ks[9], (E4, E2)), 'fc2_b': zeros(E4),
        'fc3_w': w(ks[10], (A, E4)), 'fc3_b': zeros(A),
        # deterministic stand-in backbone projections (see TODO below)
        'bb_local': w(ks[11], (IMG_C * IMG_HW * IMG_HW, R * E)),
        'bb_global': w(ks[12], (IMG_C * IMG_HW * IMG_HW, E)),
    }


def prepare_params(p):
    """One-time param prep: pre-transposed / pre-fused kernel-ready weights."""
    # Fold LayerNorm gamma/beta into the k/v projections and fuse them:
    #   k = LN_k(x)@Wk^T + bk = xhat @ (g_k[:,None]*Wk^T) + (b_k@Wk^T + bk)
    kvw = jnp.concatenate([p['norm_k_g'][:, None] * p['Wk'].T,
                           p['norm_v_g'][:, None] * p['Wv'].T], axis=1)   # (E, 2E)
    kvb = jnp.concatenate([p['norm_k_b'] @ p['Wk'].T + p['bk'],
                           p['norm_v_b'] @ p['Wv'].T + p['bv']])[None, :]  # (1, 2E)
    return {
        'wc': p['coarse_w'],
        'w1wt': p['W1_w'].T, 'w1b': p['W1_b'],
        'qw': p['Wq'].T, 'qb': p['bq'][None, :],
        'kvw': kvw, 'kvb': kvb,
        'pw': p['proj_w'].T, 'pb': p['proj_b'][None, :],
        'lng': p['norm_g'][None, :], 'lnb': p['norm_b'][None, :],
        'wl': p['W_l'], 'wg': p['W_g'].T,
        'f1w': p['fc1_w'].T, 'f1b': p['fc1_b'][None, :],
        'f2w': p['fc2_w'].T, 'f2b': p['fc2_b'][None, :],
        'f3w': p['fc3_w'].T, 'f3b': p['fc3_b'][None, :],
        'bb_local': p['bb_local'], 'bb_global': p['bb_global'],
    }


# ------------------------------ ETN forward -----------------------------------
def etn_forward(x, w2v, kp):
    bx = x.shape[0]
    # TODO(synk): the pretrained torchvision resnet101 backbone (Resnet wrapper)
    # is not translatable here; use a deterministic linear stand-in producing the
    # same shapes: local (B, 196, E) and global (B, E).
    flat = x.reshape(bx, -1)
    local_feature = jnp.tanh(flat @ kp['bb_local']).reshape(bx, R, E)
    global_feature = jnp.tanh(flat @ kp['bb_global'])

    # TODO(synk): CDM class definition not provided; global-feature augmentation
    # mask is skipped (equivalent to mask == 0 everywhere).
    # TODO(synk): VBL class definition not provided; attr_mask set to ones.
    attr_mask = jnp.ones((bx, A, E), jnp.float32)

    # W1(w2v) is batch independent: one tiny XLA matmul; the attr_mask multiply
    # stays inside the fused kernel (per batch), as in the reference.
    w2v_proj = w2v @ kp['w1wt'] + kp['w1b']                         # (A, E)

    # Single fused Pallas kernel: region attention, APP attention, refine and
    # local heads, global heads — all intermediates stay in VMEM/vregs.
    f_coar, res = run_etn_fused(local_feature, global_feature, attr_mask,
                                w2v_proj, kp)

    return {
        'F_coar': f_coar,
        'local_result': res[:, 0, :],
        'global_result': res[:, 2, :],
        'global_bias': res[:, 3, :],
        'local_bias': res[:, 1, :],
        'delta_l': jnp.mean(attr_mask, axis=-1),
    }


# --------------------------------- main ---------------------------------------
if __name__ == "__main__":
    key = jax.random.PRNGKey(0)
    kp_key, kx, kw = jax.random.split(key, 3)
    raw_params = init_params(kp_key)
    kparams = prepare_params(raw_params)           # one-time param prep

    x = jax.random.normal(kx, (B, IMG_C, IMG_HW, IMG_HW), jnp.float32)  # NCHW
    w2v = jax.random.normal(kw, (A, G), jnp.float32)

    fwd = jax.jit(etn_forward)
    package = fwd(x, w2v, kparams)
    jax.block_until_ready(package)

    # light sanity checks on shapes / finiteness
    assert package['F_coar'].shape == (B, A, E)
    assert package['local_result'].shape == (B, A)
    assert package['global_result'].shape == (B, A)
    assert package['global_bias'].shape == (B, A)
    assert package['local_bias'].shape == (B, A)
    assert package['delta_l'].shape == (B, A)
    assert bool(jnp.all(jnp.isfinite(package['F_coar'])))
    assert bool(jnp.all(jnp.isfinite(package['local_result'])))
    print("KERNEL_OK")
</pallas_src>

<mosaic_0001>
module attributes {stable_mosaic.version = 11 : i64} {
  func.func @etn_fused_kernel(%arg0: i32, %arg1: memref<1x196x32xf32, #tpu.memory_space<vmem>>, %arg2: memref<1x16x32xf32, #tpu.memory_space<vmem>>, %arg3: memref<1x1x32xf32, #tpu.memory_space<vmem>>, %arg4: memref<16x32xf32, #tpu.memory_space<vmem>>, %arg5: memref<16x32xf32, #tpu.memory_space<vmem>>, %arg6: memref<32x32xf32, #tpu.memory_space<vmem>>, %arg7: memref<1x32xf32, #tpu.memory_space<vmem>>, %arg8: memref<32x64xf32, #tpu.memory_space<vmem>>, %arg9: memref<1x64xf32, #tpu.memory_space<vmem>>, %arg10: memref<32x32xf32, #tpu.memory_space<vmem>>, %arg11: memref<1x32xf32, #tpu.memory_space<vmem>>, %arg12: memref<1x32xf32, #tpu.memory_space<vmem>>, %arg13: memref<1x32xf32, #tpu.memory_space<vmem>>, %arg14: memref<16x32xf32, #tpu.memory_space<vmem>>, %arg15: memref<32x16xf32, #tpu.memory_space<vmem>>, %arg16: memref<32x16xf32, #tpu.memory_space<vmem>>, %arg17: memref<1x16xf32, #tpu.memory_space<vmem>>, %arg18: memref<16x8xf32, #tpu.memory_space<vmem>>, %arg19: memref<1x8xf32, #tpu.memory_space<vmem>>, %arg20: memref<8x16xf32, #tpu.memory_space<vmem>>, %arg21: memref<1x16xf32, #tpu.memory_space<vmem>>, %arg22: memref<1x16x32xf32, #tpu.memory_space<vmem>>, %arg23: memref<1x4x16xf32, #tpu.memory_space<vmem>>) attributes {dimension_semantics = [#tpu.dimension_semantics<parallel>], iteration_bounds = array<i64: 2>, scalar_prefetch = 0 : i64, scratch_operands = 0 : i64, tpu.core_type = #tpu.core_type<tc>, window_params = [{transform_indices = @transform_0, window_bounds = array<i64: 1, 196, 32>}, {transform_indices = @transform_1, window_bounds = array<i64: 1, 16, 32>}, {transform_indices = @transform_2, window_bounds = array<i64: 1, 1, 32>}, {pipeline_mode = #tpu.pipeline_mode<synchronous>, transform_indices = @transform_3, window_bounds = array<i64: 16, 32>}, {pipeline_mode = #tpu.pipeline_mode<synchronous>, transform_indices = @transform_4, window_bounds = array<i64: 16, 32>}, {pipeline_mode = #tpu.pipeline_mode<synchronous>, transform_indices = @transform_5, window_bounds = array<i64: 32, 32>}, {pipeline_mode = #tpu.pipeline_mode<synchronous>, transform_indices = @transform_6, window_bounds = array<i64: 1, 32>}, {pipeline_mode = #tpu.pipeline_mode<synchronous>, transform_indices = @transform_7, window_bounds = array<i64: 32, 64>}, {pipeline_mode = #tpu.pipeline_mode<synchronous>, transform_indices = @transform_8, window_bounds = array<i64: 1, 64>}, {pipeline_mode = #tpu.pipeline_mode<synchronous>, transform_indices = @transform_9, window_bounds = array<i64: 32, 32>}, {pipeline_mode = #tpu.pipeline_mode<synchronous>, transform_indices = @transform_10, window_bounds = array<i64: 1, 32>}, {pipeline_mode = #tpu.pipeline_mode<synchronous>, transform_indices = @transform_11, window_bounds = array<i64: 1, 32>}, {pipeline_mode = #tpu.pipeline_mode<synchronous>, transform_indices = @transform_12, window_bounds = array<i64: 1, 32>}, {pipeline_mode = #tpu.pipeline_mode<synchronous>, transform_indices = @transform_13, window_bounds = array<i64: 16, 32>}, {pipeline_mode = #tpu.pipeline_mode<synchronous>, transform_indices = @transform_14, window_bounds = array<i64: 32, 16>}, {pipeline_mode = #tpu.pipeline_mode<synchronous>, transform_indices = @transform_15, window_bounds = array<i64: 32, 16>}, {pipeline_mode = #tpu.pipeline_mode<synchronous>, transform_indices = @transform_16, window_bounds = array<i64: 1, 16>}, {pipeline_mode = #tpu.pipeline_mode<synchronous>, transform_indices = @transform_17, window_bounds = array<i64: 16, 8>}, {pipeline_mode = #tpu.pipeline_mode<synchronous>, transform_indices = @transform_18, window_bounds = array<i64: 1, 8>}, {pipeline_mode = #tpu.pipeline_mode<synchronous>, transform_indices = @transform_19, window_bounds = array<i64: 8, 16>}, {pipeline_mode = #tpu.pipeline_mode<synchronous>, transform_indices = @transform_20, window_bounds = array<i64: 1, 16>}, {transform_indices = @transform_21, window_bounds = array<i64: 1, 16, 32>}, {transform_indices = @transform_22, window_bounds = array<i64: 1, 4, 16>}]} {
    %c0 = arith.constant 0 : index
    %c0_0 = arith.constant 0 : index
    %c0_1 = arith.constant 0 : index
    %0 = vector.load %arg1[%c0, %c0_0, %c0_1] : memref<1x196x32xf32, #tpu.memory_space<vmem>>, vector<1x196x32xf32>
    %1 = vector.shape_cast %0 : vector<1x196x32xf32> to vector<196x32xf32>
    %2 = arith.mulf %1, %1 : vector<196x32xf32>
    %cst = arith.constant dense<0.000000e+00> : vector<196xf32>
    %3 = vector.multi_reduction <add>, %2, %cst [1] : vector<196x32xf32> to vector<196xf32>
    %4 = vector.shape_cast %3 : vector<196xf32> to vector<196x1xf32>
    %5 = math.sqrt %4 : vector<196x1xf32>
    %cst_2 = arith.constant 9.99999996E-13 : f32
    %6 = vector.broadcast %cst_2 : f32 to vector<196x1xf32>
    %7 = arith.maximumf %5, %6 : vector<196x1xf32>
    %8 = vector.broadcast %7 : vector<196x1xf32> to vector<196x32xf32>
    %9 = arith.divf %1, %8 : vector<196x32xf32>
    %c0_3 = arith.constant 0 : index
    %c0_4 = arith.constant 0 : index
    %10 = vector.load %arg4[%c0_3, %c0_4] : memref<16x32xf32, #tpu.memory_space<vmem>>, vector<16x32xf32>
    %cst_5 = arith.constant dense<0.000000e+00> : vector<16x196xf32>
    %11 = tpu.matmul %10, %9, %cst_5 {dimension_numbers = #tpu.dot_dimension_numbers<[1], [1], [0], [0], [0, 0, 1, 0], [], []>} : vector<16x32xf32>, vector<196x32xf32>, vector<16x196xf32> -> vector<16x196xf32>
    %cst_6 = arith.constant dense<0xFF800000> : vector<16xf32>
    %12 = vector.multi_reduction <maximumf>, %11, %cst_6 [1] : vector<16x196xf32> to vector<16xf32>
    %13 = vector.shape_cast %12 : vector<16xf32> to vector<16x1xf32>
    %14 = vector.broadcast %13 : vector<16x1xf32> to vector<16x196xf32>
    %15 = arith.subf %11, %14 : vector<16x196xf32>
    %16 = math.exp %15 : vector<16x196xf32>
    %cst_7 = arith.constant dense<0.000000e+00> : vector<16xf32>
    %17 = vector.multi_reduction <add>, %16, %cst_7 [1] : vector<16x196xf32> to vector<16xf32>
    %18 = vector.shape_cast %17 : vector<16xf32> to vector<16x1xf32>
    %19 = vector.broadcast %18 : vector<16x1xf32> to vector<16x196xf32>
    %20 = arith.divf %16, %19 : vector<16x196xf32>
    %cst_8 = arith.constant dense<0.000000e+00> : vector<16x32xf32>
    %21 = tpu.matmul %20, %9, %cst_8 {dimension_numbers = #tpu.dot_dimension_numbers<[1], [0], [0], [1], [0, 0, 1, 1], [], []>} : vector<16x196xf32>, vector<196x32xf32>, vector<16x32xf32> -> vector<16x32xf32>
    %22 = arith.mulf %21, %21 : vector<16x32xf32>
    %cst_9 = arith.constant dense<0.000000e+00> : vector<16xf32>
    %23 = vector.multi_reduction <add>, %22, %cst_9 [1] : vector<16x32xf32> to vector<16xf32>
    %24 = vector.shape_cast %23 : vector<16xf32> to vector<16x1xf32>
    %25 = math.sqrt %24 : vector<16x1xf32>
    %cst_10 = arith.constant 9.99999996E-13 : f32
    %26 = vector.broadcast %cst_10 : f32 to vector<16x1xf32>
    %27 = arith.maximumf %25, %26 : vector<16x1xf32>
    %28 = vector.broadcast %27 : vector<16x1xf32> to vector<16x32xf32>
    %29 = arith.divf %21, %28 : vector<16x32xf32>
    %c0_11 = arith.constant 0 : index
    %c0_12 = arith.constant 0 : index
    %c0_13 = arith.constant 0 : index
    %30 = vector.load %arg22[%c0_11, %c0_12, %c0_13] : memref<1x16x32xf32, #tpu.memory_space<vmem>>, vector<1x16x32xf32>
    %31 = vector.shape_cast %30 : vector<1x16x32xf32> to vector<16x32xf32>
    %32 = vector.shape_cast %29 : vector<16x32xf32> to vector<1x16x32xf32>
    tpu.vector_store %arg22[%c0_11, %c0_12, %c0_13], %32 {strides = array<i32>} : memref<1x16x32xf32, #tpu.memory_space<vmem>>, vector<1x16x32xf32>,
    %c0_14 = arith.constant 0 : index
    %c0_15 = arith.constant 0 : index
    %33 = vector.load %arg5[%c0_14, %c0_15] : memref<16x32xf32, #tpu.memory_space<vmem>>, vector<16x32xf32>
    %c0_16 = arith.constant 0 : index
    %c0_17 = arith.constant 0 : index
    %c0_18 = arith.constant 0 : index
    %34 = vector.load %arg2[%c0_16, %c0_17, %c0_18] : memref<1x16x32xf32, #tpu.memory_space<vmem>>, vector<1x16x32xf32>
    %35 = vector.shape_cast %34 : vector<1x16x32xf32> to vector<16x32xf32>
    %36 = arith.mulf %33, %35 : vector<16x32xf32>
    %c0_19 = arith.constant 0 : index
    %c0_20 = arith.constant 0 : index
    %37 = vector.load %arg6[%c0_19, %c0_20] : memref<32x32xf32, #tpu.memory_space<vmem>>, vector<32x32xf32>
    %cst_21 = arith.constant dense<0.000000e+00> : vector<16x32xf32>
    %38 = tpu.matmul %36, %37, %cst_21 {dimension_numbers = #tpu.dot_dimension_numbers<[1], [0], [0], [1], [0, 0, 1, 1], [], []>} : vector<16x32xf32>, vector<32x32xf32>, vector<16x32xf32> -> vector<16x32xf32>
    %c0_22 = arith.constant 0 : index
    %c0_23 = arith.constant 0 : index
    %39 = vector.load %arg7[%c0_22, %c0_23] : memref<1x32xf32, #tpu.memory_space<vmem>>, vector<1x32xf32>
    %40 = vector.broadcast %39 : vector<1x32xf32> to vector<16x32xf32>
    %41 = arith.addf %38, %40 : vector<16x32xf32>
    %cst_24 = arith.constant dense<0.000000e+00> : vector<16xf32>
    %42 = vector.multi_reduction <add>, %29, %cst_24 [1] : vector<16x32xf32> to vector<16xf32>
    %43 = vector.shape_cast %42 : vector<16xf32> to vector<16x1xf32>
    %cst_25 = arith.constant 3.200000e+01 : f32
    %44 = vector.broadcast %cst_25 : f32 to vector<16x1xf32>
    %45 = arith.divf %43, %44 : vector<16x1xf32>
    %46 = vector.broadcast %45 : vector<16x1xf32> to vector<16x32xf32>
    %47 = arith.subf %29, %46 : vector<16x32xf32>
    %48 = arith.mulf %47, %47 : vector<16x32xf32>
    %cst_26 = arith.constant dense<0.000000e+00> : vector<16xf32>
    %49 = vector.multi_reduction <add>, %48, %cst_26 [1] : vector<16x32xf32> to vector<16xf32>
    %50 = vector.shape_cast %49 : vector<16xf32> to vector<16x1xf32>
    %cst_27 = arith.constant 3.200000e+01 : f32
    %51 = vector.broadcast %cst_27 : f32 to vector<16x1xf32>
    %52 = arith.divf %50, %51 : vector<16x1xf32>
    %53 = vector.broadcast %45 : vector<16x1xf32> to vector<16x32xf32>
    %54 = arith.subf %29, %53 : vector<16x32xf32>
    %cst_28 = arith.constant 9.99999974E-6 : f32
    %55 = vector.broadcast %cst_28 : f32 to vector<16x1xf32>
    %56 = arith.addf %52, %55 : vector<16x1xf32>
    %57 = math.rsqrt %56 : vector<16x1xf32>
    %58 = vector.broadcast %57 : vector<16x1xf32> to vector<16x32xf32>
    %59 = arith.mulf %54, %58 : vector<16x32xf32>
    %c0_29 = arith.constant 0 : index
    %c0_30 = arith.constant 0 : index
    %60 = vector.load %arg8[%c0_29, %c0_30] : memref<32x64xf32, #tpu.memory_space<vmem>>, vector<32x64xf32>
    %cst_31 = arith.constant dense<0.000000e+00> : vector<16x64xf32>
    %61 = tpu.matmul %59, %60, %cst_31 {dimension_numbers = #tpu.dot_dimension_numbers<[1], [0], [0], [1], [0, 0, 1, 1], [], []>} : vector<16x32xf32>, vector<32x64xf32>, vector<16x64xf32> -> vector<16x64xf32>
    %c0_32 = arith.constant 0 : index
    %c0_33 = arith.constant 0 : index
    %62 = vector.load %arg9[%c0_32, %c0_33] : memref<1x64xf32, #tpu.memory_space<vmem>>, vector<1x64xf32>
    %63 = vector.broadcast %62 : vector<1x64xf32> to vector<16x64xf32>
    %64 = arith.addf %61, %63 : vector<16x64xf32>
    %65 = vector.extract_strided_slice %64 {offsets = [0, 0], sizes = [16, 32], strides = [1, 1]} : vector<16x64xf32> to vector<16x32xf32>
    %66 = vector.extract_strided_slice %64 {offsets = [0, 32], sizes = [16, 32], strides = [1, 1]} : vector<16x64xf32> to vector<16x32xf32>
    %67 = vector.extract_strided_slice %41 {offsets = [0, 0], sizes = [16, 8], strides = [1, 1]} : vector<16x32xf32> to vector<16x8xf32>
    %68 = vector.extract_strided_slice %65 {offsets = [0, 0], sizes = [16, 8], strides = [1, 1]} : vector<16x32xf32> to vector<16x8xf32>
    %69 = vector.extract_strided_slice %66 {offsets = [0, 0], sizes = [16, 8], strides = [1, 1]} : vector<16x32xf32> to vector<16x8xf32>
    %cst_34 = arith.constant dense<0.000000e+00> : vector<16x16xf32>
    %70 = tpu.matmul %67, %68, %cst_34 {dimension_numbers = #tpu.dot_dimension_numbers<[1], [1], [0], [0], [0, 0, 1, 0], [], []>} : vector<16x8xf32>, vector<16x8xf32>, vector<16x16xf32> -> vector<16x16xf32>
    %cst_35 = arith.constant 5.000000e-01 : f32
    %71 = vector.broadcast %cst_35 : f32 to vector<16x16xf32>
    %72 = arith.mulf %71, %70 : vector<16x16xf32>
    %cst_36 = arith.constant 0.707106769 : f32
    %73 = vector.broadcast %cst_36 : f32 to vector<16x16xf32>
    %74 = arith.mulf %70, %73 : vector<16x16xf32>
    %75 = math.absf %74 : vector<16x16xf32>
    %cst_37 = arith.constant 0.327591091 : f32
    %76 = vector.broadcast %cst_37 : f32 to vector<16x16xf32>
    %77 = arith.mulf %76, %75 : vector<16x16xf32>
    %cst_38 = arith.constant 1.000000e+00 : f32
    %78 = vector.broadcast %cst_38 : f32 to vector<16x16xf32>
    %79 = arith.addf %78, %77 : vector<16x16xf32>
    %cst_39 = arith.constant 1.000000e+00 : f32
    %80 = vector.broadcast %cst_39 : f32 to vector<16x16xf32>
    %81 = arith.divf %80, %79 : vector<16x16xf32>
    %cst_40 = arith.constant 1.06140542 : f32
    %82 = vector.broadcast %cst_40 : f32 to vector<16x16xf32>
    %83 = arith.mulf %82, %81 : vector<16x16xf32>
    %cst_41 = arith.constant 1.45315206 : f32
    %84 = vector.broadcast %cst_41 : f32 to vector<16x16xf32>
    %85 = arith.subf %83, %84 : vector<16x16xf32>
    %86 = arith.mulf %85, %81 : vector<16x16xf32>
    %cst_42 = arith.constant 1.42141378 : f32
    %87 = vector.broadcast %cst_42 : f32 to vector<16x16xf32>
    %88 = arith.addf %86, %87 : vector<16x16xf32>
    %89 = arith.mulf %88, %81 : vector<16x16xf32>
    %cst_43 = arith.constant 0.284496725 : f32
    %90 = vector.broadcast %cst_43 : f32 to vector<16x16xf32>
    %91 = arith.subf %89, %90 : vector<16x16xf32>
    %92 = arith.mulf %91, %81 : vector<16x16xf32>
    %cst_44 = arith.constant 0.254829586 : f32
    %93 = vector.broadcast %cst_44 : f32 to vector<16x16xf32>
    %94 = arith.addf %92, %93 : vector<16x16xf32>
    %95 = arith.mulf %94, %81 : vector<16x16xf32>
    %cst_45 = arith.constant 0.000000e+00 : f32
    %96 = vector.broadcast %cst_45 : f32 to vector<16x16xf32>
    %97 = arith.subf %96, %75 : vector<16x16xf32>
    %98 = arith.mulf %97, %75 : vector<16x16xf32>
    %99 = math.exp %98 : vector<16x16xf32>
    %100 = arith.mulf %95, %99 : vector<16x16xf32>
    %cst_46 = arith.constant 1.000000e+00 : f32
    %101 = vector.broadcast %cst_46 : f32 to vector<16x16xf32>
    %102 = arith.subf %101, %100 : vector<16x16xf32>
    %cst_47 = arith.constant 0.000000e+00 : f32
    %103 = vector.broadcast %cst_47 : f32 to vector<16x16xf32>
    %104 = arith.cmpf oge, %74, %103 : vector<16x16xf32>
    %cst_48 = arith.constant 0.000000e+00 : f32
    %105 = vector.broadcast %cst_48 : f32 to vector<16x16xf32>
    %106 = arith.subf %105, %102 : vector<16x16xf32>
    %107 = arith.select %104, %102, %106 : vector<16x16xi1>, vector<16x16xf32>
    %cst_49 = arith.constant 1.000000e+00 : f32
    %108 = vector.broadcast %cst_49 : f32 to vector<16x16xf32>
    %109 = arith.addf %108, %107 : vector<16x16xf32>
    %110 = arith.mulf %72, %109 : vector<16x16xf32>
    %cst_50 = arith.constant 0.353553385 : f32
    %111 = vector.broadcast %cst_50 : f32 to vector<16x16xf32>
    %112 = arith.mulf %110, %111 : vector<16x16xf32>
    %cst_51 = arith.constant dense<0xFF800000> : vector<16xf32>
    %113 = vector.multi_reduction <maximumf>, %112, %cst_51 [1] : vector<16x16xf32> to vector<16xf32>
    %114 = vector.shape_cast %113 : vector<16xf32> to vector<16x1xf32>
    %115 = vector.broadcast %114 : vector<16x1xf32> to vector<16x16xf32>
    %116 = arith.subf %112, %115 : vector<16x16xf32>
    %117 = math.exp %116 : vector<16x16xf32>
    %cst_52 = arith.constant dense<0.000000e+00> : vector<16xf32>
    %118 = vector.multi_reduction <add>, %117, %cst_52 [1] : vector<16x16xf32> to vector<16xf32>
    %119 = vector.shape_cast %118 : vector<16xf32> to vector<16x1xf32>
    %120 = vector.broadcast %119 : vector<16x1xf32> to vector<16x16xf32>
    %121 = arith.divf %117, %120 : vector<16x16xf32>
    %cst_53 = arith.constant dense<0.000000e+00> : vector<16x8xf32>
    %122 = tpu.matmul %121, %69, %cst_53 {dimension_numbers = #tpu.dot_dimension_numbers<[1], [0], [0], [1], [0, 0, 1, 1], [], []>} : vector<16x16xf32>, vector<16x8xf32>, vector<16x8xf32> -> vector<16x8xf32>
    %123 = vector.extract_strided_slice %41 {offsets = [0, 8], sizes = [16, 8], strides = [1, 1]} : vector<16x32xf32> to vector<16x8xf32>
    %124 = vector.extract_strided_slice %65 {offsets = [0, 8], sizes = [16, 8], strides = [1, 1]} : vector<16x32xf32> to vector<16x8xf32>
    %125 = vector.extract_strided_slice %66 {offsets = [0, 8], sizes = [16, 8], strides = [1, 1]} : vector<16x32xf32> to vector<16x8xf32>
    %cst_54 = arith.constant dense<0.000000e+00> : vector<16x16xf32>
    %126 = tpu.matmul %123, %124, %cst_54 {dimension_numbers = #tpu.dot_dimension_numbers<[1], [1], [0], [0], [0, 0, 1, 0], [], []>} : vector<16x8xf32>, vector<16x8xf32>, vector<16x16xf32> -> vector<16x16xf32>
    %cst_55 = arith.constant 5.000000e-01 : f32
    %127 = vector.broadcast %cst_55 : f32 to vector<16x16xf32>
    %128 = arith.mulf %127, %126 : vector<16x16xf32>
    %cst_56 = arith.constant 0.707106769 : f32
    %129 = vector.broadcast %cst_56 : f32 to vector<16x16xf32>
    %130 = arith.mulf %126, %129 : vector<16x16xf32>
    %131 = math.absf %130 : vector<16x16xf32>
    %cst_57 = arith.constant 0.327591091 : f32
    %132 = vector.broadcast %cst_57 : f32 to vector<16x16xf32>
    %133 = arith.mulf %132, %131 : vector<16x16xf32>
    %cst_58 = arith.constant 1.000000e+00 : f32
    %134 = vector.broadcast %cst_58 : f32 to vector<16x16xf32>
    %135 = arith.addf %134, %133 : vector<16x16xf32>
    %cst_59 = arith.constant 1.000000e+00 : f32
    %136 = vector.broadcast %cst_59 : f32 to vector<16x16xf32>
    %137 = arith.divf %136, %135 : vector<16x16xf32>
    %cst_60 = arith.constant 1.06140542 : f32
    %138 = vector.broadcast %cst_60 : f32 to vector<16x16xf32>
    %139 = arith.mulf %138, %137 : vector<16x16xf32>
    %cst_61 = arith.constant 1.45315206 : f32
    %140 = vector.broadcast %cst_61 : f32 to vector<16x16xf32>
    %141 = arith.subf %139, %140 : vector<16x16xf32>
    %142 = arith.mulf %141, %137 : vector<16x16xf32>
    %cst_62 = arith.constant 1.42141378 : f32
    %143 = vector.broadcast %cst_62 : f32 to vector<16x16xf32>
    %144 = arith.addf %142, %143 : vector<16x16xf32>
    %145 = arith.mulf %144, %137 : vector<16x16xf32>
    %cst_63 = arith.constant 0.284496725 : f32
    %146 = vector.broadcast %cst_63 : f32 to vector<16x16xf32>
    %147 = arith.subf %145, %146 : vector<16x16xf32>
    %148 = arith.mulf %147, %137 : vector<16x16xf32>
    %cst_64 = arith.constant 0.254829586 : f32
    %149 = vector.broadcast %cst_64 : f32 to vector<16x16xf32>
    %150 = arith.addf %148, %149 : vector<16x16xf32>
    %151 = arith.mulf %150, %137 : vector<16x16xf32>
    %cst_65 = arith.constant 0.000000e+00 : f32
    %152 = vector.broadcast %cst_65 : f32 to vector<16x16xf32>
    %153 = arith.subf %152, %131 : vector<16x16xf32>
    %154 = arith.mulf %153, %131 : vector<16x16xf32>
    %155 = math.exp %154 : vector<16x16xf32>
    %156 = arith.mulf %151, %155 : vector<16x16xf32>
    %cst_66 = arith.constant 1.000000e+00 : f32
    %157 = vector.broadcast %cst_66 : f32 to vector<16x16xf32>
    %158 = arith.subf %157, %156 : vector<16x16xf32>
    %cst_67 = arith.constant 0.000000e+00 : f32
    %159 = vector.broadcast %cst_67 : f32 to vector<16x16xf32>
    %160 = arith.cmpf oge, %130, %159 : vector<16x16xf32>
    %cst_68 = arith.constant 0.000000e+00 : f32
    %161 = vector.broadcast %cst_68 : f32 to vector<16x16xf32>
    %162 = arith.subf %161, %158 : vector<16x16xf32>
    %163 = arith.select %160, %158, %162 : vector<16x16xi1>, vector<16x16xf32>
    %cst_69 = arith.constant 1.000000e+00 : f32
    %164 = vector.broadcast %cst_69 : f32 to vector<16x16xf32>
    %165 = arith.addf %164, %163 : vector<16x16xf32>
    %166 = arith.mulf %128, %165 : vector<16x16xf32>
    %cst_70 = arith.constant 0.353553385 : f32
    %167 = vector.broadcast %cst_70 : f32 to vector<16x16xf32>
    %168 = arith.mulf %166, %167 : vector<16x16xf32>
    %cst_71 = arith.constant dense<0xFF800000> : vector<16xf32>
    %169 = vector.multi_reduction <maximumf>, %168, %cst_71 [1] : vector<16x16xf32> to vector<16xf32>
    %170 = vector.shape_cast %169 : vector<16xf32> to vector<16x1xf32>
    %171 = vector.broadcast %170 : vector<16x1xf32> to vector<16x16xf32>
    %172 = arith.subf %168, %171 : vector<16x16xf32>
    %173 = math.exp %172 : vector<16x16xf32>
    %cst_72 = arith.constant dense<0.000000e+00> : vector<16xf32>
    %174 = vector.multi_reduction <add>, %173, %cst_72 [1] : vector<16x16xf32> to vector<16xf32>
    %175 = vector.shape_cast %174 : vector<16xf32> to vector<16x1xf32>
    %176 = vector.broadcast %175 : vector<16x1xf32> to vector<16x16xf32>
    %177 = arith.divf %173, %176 : vector<16x16xf32>
    %cst_73 = arith.constant dense<0.000000e+00> : vector<16x8xf32>
    %178 = tpu.matmul %177, %125, %cst_73 {dimension_numbers = #tpu.dot_dimension_numbers<[1], [0], [0], [1], [0, 0, 1, 1], [], []>} : vector<16x16xf32>, vector<16x8xf32>, vector<16x8xf32> -> vector<16x8xf32>
    %179 = vector.extract_strided_slice %41 {offsets = [0, 16], sizes = [16, 8], strides = [1, 1]} : vector<16x32xf32> to vector<16x8xf32>
    %180 = vector.extract_strided_slice %65 {offsets = [0, 16], sizes = [16, 8], strides = [1, 1]} : vector<16x32xf32> to vector<16x8xf32>
    %181 = vector.extract_strided_slice %66 {offsets = [0, 16], sizes = [16, 8], strides = [1, 1]} : vector<16x32xf32> to vector<16x8xf32>
    %cst_74 = arith.constant dense<0.000000e+00> : vector<16x16xf32>
    %182 = tpu.matmul %179, %180, %cst_74 {dimension_numbers = #tpu.dot_dimension_numbers<[1], [1], [0], [0], [0, 0, 1, 0], [], []>} : vector<16x8xf32>, vector<16x8xf32>, vector<16x16xf32> -> vector<16x16xf32>
    %cst_75 = arith.constant 5.000000e-01 : f32
    %183 = vector.broadcast %cst_75 : f32 to vector<16x16xf32>
    %184 = arith.mulf %183, %182 : vector<16x16xf32>
    %cst_76 = arith.constant 0.707106769 : f32
    %185 = vector.broadcast %cst_76 : f32 to vector<16x16xf32>
    %186 = arith.mulf %182, %185 : vector<16x16xf32>
    %187 = math.absf %186 : vector<16x16xf32>
    %cst_77 = arith.constant 0.327591091 : f32
    %188 = vector.broadcast %cst_77 : f32 to vector<16x16xf32>
    %189 = arith.mulf %188, %187 : vector<16x16xf32>
    %cst_78 = arith.constant 1.000000e+00 : f32
    %190 = vector.broadcast %cst_78 : f32 to vector<16x16xf32>
    %191 = arith.addf %190, %189 : vector<16x16xf32>
    %cst_79 = arith.constant 1.000000e+00 : f32
    %192 = vector.broadcast %cst_79 : f32 to vector<16x16xf32>
    %193 = arith.divf %192, %191 : vector<16x16xf32>
    %cst_80 = arith.constant 1.06140542 : f32
    %194 = vector.broadcast %cst_80 : f32 to vector<16x16xf32>
    %195 = arith.mulf %194, %193 : vector<16x16xf32>
    %cst_81 = arith.constant 1.45315206 : f32
    %196 = vector.broadcast %cst_81 : f32 to vector<16x16xf32>
    %197 = arith.subf %195, %196 : vector<16x16xf32>
    %198 = arith.mulf %197, %193 : vector<16x16xf32>
    %cst_82 = arith.constant 1.42141378 : f32
    %199 = vector.broadcast %cst_82 : f32 to vector<16x16xf32>
    %200 = arith.addf %198, %199 : vector<16x16xf32>
    %201 = arith.mulf %200, %193 : vector<16x16xf32>
    %cst_83 = arith.constant 0.284496725 : f32
    %202 = vector.broadcast %cst_83 : f32 to vector<16x16xf32>
    %203 = arith.subf %201, %202 : vector<16x16xf32>
    %204 = arith.mulf %203, %193 : vector<16x16xf32>
    %cst_84 = arith.constant 0.254829586 : f32
    %205 = vector.broadcast %cst_84 : f32 to vector<16x16xf32>
    %206 = arith.addf %204, %205 : vector<16x16xf32>
    %207 = arith.mulf %206, %193 : vector<16x16xf32>
    %cst_85 = arith.constant 0.000000e+00 : f32
    %208 = vector.broadcast %cst_85 : f32 to vector<16x16xf32>
    %209 = arith.subf %208, %187 : vector<16x16xf32>
    %210 = arith.mulf %209, %187 : vector<16x16xf32>
    %211 = math.exp %210 : vector<16x16xf32>
    %212 = arith.mulf %207, %211 : vector<16x16xf32>
    %cst_86 = arith.constant 1.000000e+00 : f32
    %213 = vector.broadcast %cst_86 : f32 to vector<16x16xf32>
    %214 = arith.subf %213, %212 : vector<16x16xf32>
    %cst_87 = arith.constant 0.000000e+00 : f32
    %215 = vector.broadcast %cst_87 : f32 to vector<16x16xf32>
    %216 = arith.cmpf oge, %186, %215 : vector<16x16xf32>
    %cst_88 = arith.constant 0.000000e+00 : f32
    %217 = vector.broadcast %cst_88 : f32 to vector<16x16xf32>
    %218 = arith.subf %217, %214 : vector<16x16xf32>
    %219 = arith.select %216, %214, %218 : vector<16x16xi1>, vector<16x16xf32>
    %cst_89 = arith.constant 1.000000e+00 : f32
    %220 = vector.broadcast %cst_89 : f32 to vector<16x16xf32>
    %221 = arith.addf %220, %219 : vector<16x16xf32>
    %222 = arith.mulf %184, %221 : vector<16x16xf32>
    %cst_90 = arith.constant 0.353553385 : f32
    %223 = vector.broadcast %cst_90 : f32 to vector<16x16xf32>
    %224 = arith.mulf %222, %223 : vector<16x16xf32>
    %cst_91 = arith.constant dense<0xFF800000> : vector<16xf32>
    %225 = vector.multi_reduction <maximumf>, %224, %cst_91 [1] : vector<16x16xf32> to vector<16xf32>
    %226 = vector.shape_cast %225 : vector<16xf32> to vector<16x1xf32>
    %227 = vector.broadcast %226 : vector<16x1xf32> to vector<16x16xf32>
    %228 = arith.subf %224, %227 : vector<16x16xf32>
    %229 = math.exp %228 : vector<16x16xf32>
    %cst_92 = arith.constant dense<0.000000e+00> : vector<16xf32>
    %230 = vector.multi_reduction <add>, %229, %cst_92 [1] : vector<16x16xf32> to vector<16xf32>
    %231 = vector.shape_cast %230 : vector<16xf32> to vector<16x1xf32>
    %232 = vector.broadcast %231 : vector<16x1xf32> to vector<16x16xf32>
    %233 = arith.divf %229, %232 : vector<16x16xf32>
    %cst_93 = arith.constant dense<0.000000e+00> : vector<16x8xf32>
    %234 = tpu.matmul %233, %181, %cst_93 {dimension_numbers = #tpu.dot_dimension_numbers<[1], [0], [0], [1], [0, 0, 1, 1], [], []>} : vector<16x16xf32>, vector<16x8xf32>, vector<16x8xf32> -> vector<16x8xf32>
    %235 = vector.extract_strided_slice %41 {offsets = [0, 24], sizes = [16, 8], strides = [1, 1]} : vector<16x32xf32> to vector<16x8xf32>
    %236 = vector.extract_strided_slice %65 {offsets = [0, 24], sizes = [16, 8], strides = [1, 1]} : vector<16x32xf32> to vector<16x8xf32>
    %237 = vector.extract_strided_slice %66 {offsets = [0, 24], sizes = [16, 8], strides = [1, 1]} : vector<16x32xf32> to vector<16x8xf32>
    %cst_94 = arith.constant dense<0.000000e+00> : vector<16x16xf32>
    %238 = tpu.matmul %235, %236, %cst_94 {dimension_numbers = #tpu.dot_dimension_numbers<[1], [1], [0], [0], [0, 0, 1, 0], [], []>} : vector<16x8xf32>, vector<16x8xf32>, vector<16x16xf32> -> vector<16x16xf32>
    %cst_95 = arith.constant 5.000000e-01 : f32
    %239 = vector.broadcast %cst_95 : f32 to vector<16x16xf32>
    %240 = arith.mulf %239, %238 : vector<16x16xf32>
    %cst_96 = arith.constant 0.707106769 : f32
    %241 = vector.broadcast %cst_96 : f32 to vector<16x16xf32>
    %242 = arith.mulf %238, %241 : vector<16x16xf32>
    %243 = math.absf %242 : vector<16x16xf32>
    %cst_97 = arith.constant 0.327591091 : f32
    %244 = vector.broadcast %cst_97 : f32 to vector<16x16xf32>
    %245 = arith.mulf %244, %243 : vector<16x16xf32>
    %cst_98 = arith.constant 1.000000e+00 : f32
    %246 = vector.broadcast %cst_98 : f32 to vector<16x16xf32>
    %247 = arith.addf %246, %245 : vector<16x16xf32>
    %cst_99 = arith.constant 1.000000e+00 : f32
    %248 = vector.broadcast %cst_99 : f32 to vector<16x16xf32>
    %249 = arith.divf %248, %247 : vector<16x16xf32>
    %cst_100 = arith.constant 1.06140542 : f32
    %250 = vector.broadcast %cst_100 : f32 to vector<16x16xf32>
    %251 = arith.mulf %250, %249 : vector<16x16xf32>
    %cst_101 = arith.constant 1.45315206 : f32
    %252 = vector.broadcast %cst_101 : f32 to vector<16x16xf32>
    %253 = arith.subf %251, %252 : vector<16x16xf32>
    %254 = arith.mulf %253, %249 : vector<16x16xf32>
    %cst_102 = arith.constant 1.42141378 : f32
    %255 = vector.broadcast %cst_102 : f32 to vector<16x16xf32>
    %256 = arith.addf %254, %255 : vector<16x16xf32>
    %257 = arith.mulf %256, %249 : vector<16x16xf32>
    %cst_103 = arith.constant 0.284496725 : f32
    %258 = vector.broadcast %cst_103 : f32 to vector<16x16xf32>
    %259 = arith.subf %257, %258 : vector<16x16xf32>
    %260 = arith.mulf %259, %249 : vector<16x16xf32>
    %cst_104 = arith.constant 0.254829586 : f32
    %261 = vector.broadcast %cst_104 : f32 to vector<16x16xf32>
    %262 = arith.addf %260, %261 : vector<16x16xf32>
    %263 = arith.mulf %262, %249 : vector<16x16xf32>
    %cst_105 = arith.constant 0.000000e+00 : f32
    %264 = vector.broadcast %cst_105 : f32 to vector<16x16xf32>
    %265 = arith.subf %264, %243 : vector<16x16xf32>
    %266 = arith.mulf %265, %243 : vector<16x16xf32>
    %267 = math.exp %266 : vector<16x16xf32>
    %268 = arith.mulf %263, %267 : vector<16x16xf32>
    %cst_106 = arith.constant 1.000000e+00 : f32
    %269 = vector.broadcast %cst_106 : f32 to vector<16x16xf32>
    %270 = arith.subf %269, %268 : vector<16x16xf32>
    %cst_107 = arith.constant 0.000000e+00 : f32
    %271 = vector.broadcast %cst_107 : f32 to vector<16x16xf32>
    %272 = arith.cmpf oge, %242, %271 : vector<16x16xf32>
    %cst_108 = arith.constant 0.000000e+00 : f32
    %273 = vector.broadcast %cst_108 : f32 to vector<16x16xf32>
    %274 = arith.subf %273, %270 : vector<16x16xf32>
    %275 = arith.select %272, %270, %274 : vector<16x16xi1>, vector<16x16xf32>
    %cst_109 = arith.constant 1.000000e+00 : f32
    %276 = vector.broadcast %cst_109 : f32 to vector<16x16xf32>
    %277 = arith.addf %276, %275 : vector<16x16xf32>
    %278 = arith.mulf %240, %277 : vector<16x16xf32>
    %cst_110 = arith.constant 0.353553385 : f32
    %279 = vector.broadcast %cst_110 : f32 to vector<16x16xf32>
    %280 = arith.mulf %278, %279 : vector<16x16xf32>
    %cst_111 = arith.constant dense<0xFF800000> : vector<16xf32>
    %281 = vector.multi_reduction <maximumf>, %280, %cst_111 [1] : vector<16x16xf32> to vector<16xf32>
    %282 = vector.shape_cast %281 : vector<16xf32> to vector<16x1xf32>
    %283 = vector.broadcast %282 : vector<16x1xf32> to vector<16x16xf32>
    %284 = arith.subf %280, %283 : vector<16x16xf32>
    %285 = math.exp %284 : vector<16x16xf32>
    %cst_112 = arith.constant dense<0.000000e+00> : vector<16xf32>
    %286 = vector.multi_reduction <add>, %285, %cst_112 [1] : vector<16x16xf32> to vector<16xf32>
    %287 = vector.shape_cast %286 : vector<16xf32> to vector<16x1xf32>
    %288 = vector.broadcast %287 : vector<16x1xf32> to vector<16x16xf32>
    %289 = arith.divf %285, %288 : vector<16x16xf32>
    %cst_113 = arith.constant dense<0.000000e+00> : vector<16x8xf32>
    %290 = tpu.matmul %289, %237, %cst_113 {dimension_numbers = #tpu.dot_dimension_numbers<[1], [0], [0], [1], [0, 0, 1, 1], [], []>} : vector<16x16xf32>, vector<16x8xf32>, vector<16x8xf32> -> vector<16x8xf32>
    %291 = tpu.concatenate %122, %178, %234, %290 in 0 : vector<16x8xf32>, vector<16x8xf32>, vector<16x8xf32>, vector<16x8xf32> -> vector<64x8xf32>
    %c0_114 = arith.constant 0 : index
    %c0_115 = arith.constant 0 : index
    %292 = vector.load %arg10[%c0_114, %c0_115] : memref<32x32xf32, #tpu.memory_space<vmem>>, vector<32x32xf32>
    %293 = tpu.iota {dimensions = array<i32: 0>} : vector<16x64xi32>
    %294 = tpu.iota {dimensions = array<i32: 1>} : vector<16x64xi32>
    %cst_116 = arith.constant 0.000000e+00 : f32
    %295 = vector.broadcast %cst_116 : f32 to vector<16x32xf32>
    %c4_i32 = arith.constant 4 : i32
    %296 = vector.broadcast %c4_i32 : i32 to vector<16x64xi32>
    %297 = arith.muli %296, %293 : vector<16x64xi32>
    %c0_i32 = arith.constant 0 : i32
    %298 = vector.broadcast %c0_i32 : i32 to vector<16x64xi32>
    %299 = arith.addi %297, %298 : vector<16x64xi32>
    %300 = arith.cmpi eq, %294, %299 : vector<16x64xi32>
    %301 = arith.extui %300 : vector<16x64xi1> to vector<16x64xi32>
    %302 = arith.sitofp %301 : vector<16x64xi32> to vector<16x64xf32>
    %cst_117 = arith.constant dense<0.000000e+00> : vector<16x8xf32>
    %303 = tpu.matmul %302, %291, %cst_117 {dimension_numbers = #tpu.dot_dimension_numbers<[1], [0], [0], [1], [0, 0, 1, 1], [], []>} : vector<16x64xf32>, vector<64x8xf32>, vector<16x8xf32> -> vector<16x8xf32>
    %304 = vector.extract_strided_slice %292 {offsets = [0, 0], sizes = [8, 32], strides = [1, 1]} : vector<32x32xf32> to vector<8x32xf32>
    %cst_118 = arith.constant dense<0.000000e+00> : vector<16x32xf32>
    %305 = tpu.matmul %303, %304, %cst_118 {dimension_numbers = #tpu.dot_dimension_numbers<[1], [0], [0], [1], [0, 0, 1, 1], [], []>} : vector<16x8xf32>, vector<8x32xf32>, vector<16x32xf32> -> vector<16x32xf32>
    %306 = arith.addf %295, %305 : vector<16x32xf32>
    %c4_i32_119 = arith.constant 4 : i32
    %307 = vector.broadcast %c4_i32_119 : i32 to vector<16x64xi32>
    %308 = arith.muli %307, %293 : vector<16x64xi32>
    %c1_i32 = arith.constant 1 : i32
    %309 = vector.broadcast %c1_i32 : i32 to vector<16x64xi32>
    %310 = arith.addi %308, %309 : vector<16x64xi32>
    %311 = arith.cmpi eq, %294, %310 : vector<16x64xi32>
    %312 = arith.extui %311 : vector<16x64xi1> to vector<16x64xi32>
    %313 = arith.sitofp %312 : vector<16x64xi32> to vector<16x64xf32>
    %cst_120 = arith.constant dense<0.000000e+00> : vector<16x8xf32>
    %314 = tpu.matmul %313, %291, %cst_120 {dimension_numbers = #tpu.dot_dimension_numbers<[1], [0], [0], [1], [0, 0, 1, 1], [], []>} : vector<16x64xf32>, vector<64x8xf32>, vector<16x8xf32> -> vector<16x8xf32>
    %315 = vector.extract_strided_slice %292 {offsets = [8, 0], sizes = [8, 32], strides = [1, 1]} : vector<32x32xf32> to vector<8x32xf32>
    %cst_121 = arith.constant dense<0.000000e+00> : vector<16x32xf32>
    %316 = tpu.matmul %314, %315, %cst_121 {dimension_numbers = #tpu.dot_dimension_numbers<[1], [0], [0], [1], [0, 0, 1, 1], [], []>} : vector<16x8xf32>, vector<8x32xf32>, vector<16x32xf32> -> vector<16x32xf32>
    %317 = arith.addf %306, %316 : vector<16x32xf32>
    %c4_i32_122 = arith.constant 4 : i32
    %318 = vector.broadcast %c4_i32_122 : i32 to vector<16x64xi32>
    %319 = arith.muli %318, %293 : vector<16x64xi32>
    %c2_i32 = arith.constant 2 : i32
    %320 = vector.broadcast %c2_i32 : i32 to vector<16x64xi32>
    %321 = arith.addi %319, %320 : vector<16x64xi32>
    %322 = arith.cmpi eq, %294, %321 : vector<16x64xi32>
    %323 = arith.extui %322 : vector<16x64xi1> to vector<16x64xi32>
    %324 = arith.sitofp %323 : vector<16x64xi32> to vector<16x64xf32>
    %cst_123 = arith.constant dense<0.000000e+00> : vector<16x8xf32>
    %325 = tpu.matmul %324, %291, %cst_123 {dimension_numbers = #tpu.dot_dimension_numbers<[1], [0], [0], [1], [0, 0, 1, 1], [], []>} : vector<16x64xf32>, vector<64x8xf32>, vector<16x8xf32> -> vector<16x8xf32>
    %326 = vector.extract_strided_slice %292 {offsets = [16, 0], sizes = [8, 32], strides = [1, 1]} : vector<32x32xf32> to vector<8x32xf32>
    %cst_124 = arith.constant dense<0.000000e+00> : vector<16x32xf32>
    %327 = tpu.matmul %325, %326, %cst_124 {dimension_numbers = #tpu.dot_dimension_numbers<[1], [0], [0], [1], [0, 0, 1, 1], [], []>} : vector<16x8xf32>, vector<8x32xf32>, vector<16x32xf32> -> vector<16x32xf32>
    %328 = arith.addf %317, %327 : vector<16x32xf32>
    %c4_i32_125 = arith.constant 4 : i32
    %329 = vector.broadcast %c4_i32_125 : i32 to vector<16x64xi32>
    %330 = arith.muli %329, %293 : vector<16x64xi32>
    %c3_i32 = arith.constant 3 : i32
    %331 = vector.broadcast %c3_i32 : i32 to vector<16x64xi32>
    %332 = arith.addi %330, %331 : vector<16x64xi32>
    %333 = arith.cmpi eq, %294, %332 : vector<16x64xi32>
    %334 = arith.extui %333 : vector<16x64xi1> to vector<16x64xi32>
    %335 = arith.sitofp %334 : vector<16x64xi32> to vector<16x64xf32>
    %cst_126 = arith.constant dense<0.000000e+00> : vector<16x8xf32>
    %336 = tpu.matmul %335, %291, %cst_126 {dimension_numbers = #tpu.dot_dimension_numbers<[1], [0], [0], [1], [0, 0, 1, 1], [], []>} : vector<16x64xf32>, vector<64x8xf32>, vector<16x8xf32> -> vector<16x8xf32>
    %337 = vector.extract_strided_slice %292 {offsets = [24, 0], sizes = [8, 32], strides = [1, 1]} : vector<32x32xf32> to vector<8x32xf32>
    %cst_127 = arith.constant dense<0.000000e+00> : vector<16x32xf32>
    %338 = tpu.matmul %336, %337, %cst_127 {dimension_numbers = #tpu.dot_dimension_numbers<[1], [0], [0], [1], [0, 0, 1, 1], [], []>} : vector<16x8xf32>, vector<8x32xf32>, vector<16x32xf32> -> vector<16x32xf32>
    %339 = arith.addf %328, %338 : vector<16x32xf32>
    %c0_128 = arith.constant 0 : index
    %c0_129 = arith.constant 0 : index
    %340 = vector.load %arg11[%c0_128, %c0_129] : memref<1x32xf32, #tpu.memory_space<vmem>>, vector<1x32xf32>
    %341 = vector.broadcast %340 : vector<1x32xf32> to vector<16x32xf32>
    %342 = arith.addf %339, %341 : vector<16x32xf32>
    %343 = arith.mulf %342, %342 : vector<16x32xf32>
    %cst_130 = arith.constant dense<0.000000e+00> : vector<16xf32>
    %344 = vector.multi_reduction <add>, %343, %cst_130 [1] : vector<16x32xf32> to vector<16xf32>
    %345 = vector.shape_cast %344 : vector<16xf32> to vector<16x1xf32>
    %346 = math.sqrt %345 : vector<16x1xf32>
    %cst_131 = arith.constant 9.99999996E-13 : f32
    %347 = vector.broadcast %cst_131 : f32 to vector<16x1xf32>
    %348 = arith.maximumf %346, %347 : vector<16x1xf32>
    %349 = vector.broadcast %348 : vector<16x1xf32> to vector<16x32xf32>
    %350 = arith.divf %342, %349 : vector<16x32xf32>
    %351 = arith.addf %350, %29 : vector<16x32xf32>
    %c0_132 = arith.constant 0 : index
    %c0_133 = arith.constant 0 : index
    %352 = vector.load %arg12[%c0_132, %c0_133] : memref<1x32xf32, #tpu.memory_space<vmem>>, vector<1x32xf32>
    %c0_134 = arith.constant 0 : index
    %c0_135 = arith.constant 0 : index
    %353 = vector.load %arg13[%c0_134, %c0_135] : memref<1x32xf32, #tpu.memory_space<vmem>>, vector<1x32xf32>
    %cst_136 = arith.constant dense<0.000000e+00> : vector<16xf32>
    %354 = vector.multi_reduction <add>, %351, %cst_136 [1] : vector<16x32xf32> to vector<16xf32>
    %355 = vector.shape_cast %354 : vector<16xf32> to vector<16x1xf32>
    %cst_137 = arith.constant 3.200000e+01 : f32
    %356 = vector.broadcast %cst_137 : f32 to vector<16x1xf32>
    %357 = arith.divf %355, %356 : vector<16x1xf32>
    %358 = vector.broadcast %357 : vector<16x1xf32> to vector<16x32xf32>
    %359 = arith.subf %351, %358 : vector<16x32xf32>
    %360 = arith.mulf %359, %359 : vector<16x32xf32>
    %cst_138 = arith.constant dense<0.000000e+00> : vector<16xf32>
    %361 = vector.multi_reduction <add>, %360, %cst_138 [1] : vector<16x32xf32> to vector<16xf32>
    %362 = vector.shape_cast %361 : vector<16xf32> to vector<16x1xf32>
    %cst_139 = arith.constant 3.200000e+01 : f32
    %363 = vector.broadcast %cst_139 : f32 to vector<16x1xf32>
    %364 = arith.divf %362, %363 : vector<16x1xf32>
    %365 = vector.broadcast %357 : vector<16x1xf32> to vector<16x32xf32>
    %366 = arith.subf %351, %365 : vector<16x32xf32>
    %cst_140 = arith.constant 9.99999974E-6 : f32
    %367 = vector.broadcast %cst_140 : f32 to vector<16x1xf32>
    %368 = arith.addf %364, %367 : vector<16x1xf32>
    %369 = math.rsqrt %368 : vector<16x1xf32>
    %370 = vector.broadcast %369 : vector<16x1xf32> to vector<16x32xf32>
    %371 = arith.mulf %366, %370 : vector<16x32xf32>
    %372 = vector.broadcast %352 : vector<1x32xf32> to vector<16x32xf32>
    %373 = arith.mulf %371, %372 : vector<16x32xf32>
    %374 = vector.broadcast %353 : vector<1x32xf32> to vector<16x32xf32>
    %375 = arith.addf %373, %374 : vector<16x32xf32>
    %376 = arith.addf %375, %375 : vector<16x32xf32>
    %377 = arith.mulf %376, %376 : vector<16x32xf32>
    %cst_141 = arith.constant dense<0.000000e+00> : vector<16xf32>
    %378 = vector.multi_reduction <add>, %377, %cst_141 [1] : vector<16x32xf32> to vector<16xf32>
    %379 = vector.shape_cast %378 : vector<16xf32> to vector<16x1xf32>
    %380 = math.sqrt %379 : vector<16x1xf32>
    %cst_142 = arith.constant 9.99999996E-13 : f32
    %381 = vector.broadcast %cst_142 : f32 to vector<16x1xf32>
    %382 = arith.maximumf %380, %381 : vector<16x1xf32>
    %383 = vector.broadcast %382 : vector<16x1xf32> to vector<16x32xf32>
    %384 = arith.divf %376, %383 : vector<16x32xf32>
    %c0_143 = arith.constant 0 : index
    %c0_144 = arith.constant 0 : index
    %385 = vector.load %arg14[%c0_143, %c0_144] : memref<16x32xf32, #tpu.memory_space<vmem>>, vector<16x32xf32>
    %cst_145 = arith.constant dense<0.000000e+00> : vector<16x16xf32>
    %386 = tpu.matmul %384, %385, %cst_145 {dimension_numbers = #tpu.dot_dimension_numbers<[1], [1], [0], [0], [0, 0, 1, 0], [], []>} : vector<16x32xf32>, vector<16x32xf32>, vector<16x16xf32> -> vector<16x16xf32>
    %387 = tpu.iota {dimensions = array<i32: 0>} : vector<16x16xi32>
    %388 = tpu.iota {dimensions = array<i32: 1>} : vector<16x16xi32>
    %389 = arith.cmpi eq, %387, %388 : vector<16x16xi32>
    %390 = arith.extui %389 : vector<16x16xi1> to vector<16x16xi32>
    %391 = arith.sitofp %390 : vector<16x16xi32> to vector<16x16xf32>
    %392 = arith.mulf %386, %391 : vector<16x16xf32>
    %cst_146 = arith.constant dense<0.000000e+00> : vector<16xf32>
    %393 = vector.multi_reduction <add>, %392, %cst_146 [0] : vector<16x16xf32> to vector<16xf32>
    %394 = vector.shape_cast %393 : vector<16xf32> to vector<1x16xf32>
    %c0_147 = arith.constant 0 : index
    %c0_148 = arith.constant 0 : index
    %395 = vector.load %arg16[%c0_147, %c0_148] : memref<32x16xf32, #tpu.memory_space<vmem>>, vector<32x16xf32>
    %cst_149 = arith.constant dense<0.000000e+00> : vector<16x16xf32>
    %396 = tpu.matmul %384, %395, %cst_149 {dimension_numbers = #tpu.dot_dimension_numbers<[1], [0], [0], [1], [0, 0, 1, 1], [], []>} : vector<16x32xf32>, vector<32x16xf32>, vector<16x16xf32> -> vector<16x16xf32>
    %c0_150 = arith.constant 0 : index
    %c0_151 = arith.constant 0 : index
    %397 = vector.load %arg17[%c0_150, %c0_151] : memref<1x16xf32, #tpu.memory_space<vmem>>, vector<1x16xf32>
    %398 = vector.broadcast %397 : vector<1x16xf32> to vector<16x16xf32>
    %399 = arith.addf %396, %398 : vector<16x16xf32>
    %cst_152 = arith.constant 0.000000e+00 : f32
    %400 = vector.broadcast %cst_152 : f32 to vector<16x16xf32>
    %401 = arith.maximumf %399, %400 : vector<16x16xf32>
    %c0_153 = arith.constant 0 : index
    %c0_154 = arith.constant 0 : index
    %402 = vector.load %arg18[%c0_153, %c0_154] : memref<16x8xf32, #tpu.memory_space<vmem>>, vector<16x8xf32>
    %cst_155 = arith.constant dense<0.000000e+00> : vector<16x8xf32>
    %403 = tpu.matmul %401, %402, %cst_155 {dimension_numbers = #tpu.dot_dimension_numbers<[1], [0], [0], [1], [0, 0, 1, 1], [], []>} : vector<16x16xf32>, vector<16x8xf32>, vector<16x8xf32> -> vector<16x8xf32>
    %c0_156 = arith.constant 0 : index
    %c0_157 = arith.constant 0 : index
    %404 = vector.load %arg19[%c0_156, %c0_157] : memref<1x8xf32, #tpu.memory_space<vmem>>, vector<1x8xf32>
    %405 = vector.broadcast %404 : vector<1x8xf32> to vector<16x8xf32>
    %406 = arith.addf %403, %405 : vector<16x8xf32>
    %cst_158 = arith.constant 0.000000e+00 : f32
    %407 = vector.broadcast %cst_158 : f32 to vector<16x8xf32>
    %408 = arith.maximumf %406, %407 : vector<16x8xf32>
    %c0_159 = arith.constant 0 : index
    %c0_160 = arith.constant 0 : index
    %409 = vector.load %arg20[%c0_159, %c0_160] : memref<8x16xf32, #tpu.memory_space<vmem>>, vector<8x16xf32>
    %cst_161 = arith.constant dense<0.000000e+00> : vector<16x16xf32>
    %410 = tpu.matmul %408, %409, %cst_161 {dimension_numbers = #tpu.dot_dimension_numbers<[1], [0], [0], [1], [0, 0, 1, 1], [], []>} : vector<16x8xf32>, vector<8x16xf32>, vector<16x16xf32> -> vector<16x16xf32>
    %c0_162 = arith.constant 0 : index
    %c0_163 = arith.constant 0 : index
    %411 = vector.load %arg21[%c0_162, %c0_163] : memref<1x16xf32, #tpu.memory_space<vmem>>, vector<1x16xf32>
    %412 = vector.broadcast %411 : vector<1x16xf32> to vector<16x16xf32>
    %413 = arith.addf %410, %412 : vector<16x16xf32>
    %cst_164 = arith.constant dense<0.000000e+00> : vector<16xf32>
    %414 = vector.multi_reduction <add>, %413, %cst_164 [0] : vector<16x16xf32> to vector<16xf32>
    %415 = vector.shape_cast %414 : vector<16xf32> to vector<1x16xf32>
    %cst_165 = arith.constant 1.600000e+01 : f32
    %416 = vector.broadcast %cst_165 : f32 to vector<1x16xf32>
    %417 = arith.divf %415, %416 : vector<1x16xf32>
    %c0_166 = arith.constant 0 : index
    %c0_167 = arith.constant 0 : index
    %c0_168 = arith.constant 0 : index
    %418 = vector.load %arg3[%c0_166, %c0_167, %c0_168] : memref<1x1x32xf32, #tpu.memory_space<vmem>>, vector<1x1x32xf32>
    %419 = vector.shape_cast %418 : vector<1x1x32xf32> to vector<1x32xf32>
    %c0_169 = arith.constant 0 : index
    %c0_170 = arith.constant 0 : index
    %420 = vector.load %arg15[%c0_169, %c0_170] : memref<32x16xf32, #tpu.memory_space<vmem>>, vector<32x16xf32>
    %cst_171 = arith.constant dense<0.000000e+00> : vector<1x16xf32>
    %421 = tpu.matmul %419, %420, %cst_171 {dimension_numbers = #tpu.dot_dimension_numbers<[1], [0], [0], [1], [0, 0, 1, 1], [], []>} : vector<1x32xf32>, vector<32x16xf32>, vector<1x16xf32> -> vector<1x16xf32>
    %c0_172 = arith.constant 0 : index
    %c0_173 = arith.constant 0 : index
    %422 = vector.load %arg16[%c0_172, %c0_173] : memref<32x16xf32, #tpu.memory_space<vmem>>, vector<32x16xf32>
    %cst_174 = arith.constant dense<0.000000e+00> : vector<1x16xf32>
    %423 = tpu.matmul %419, %422, %cst_174 {dimension_numbers = #tpu.dot_dimension_numbers<[1], [0], [0], [1], [0, 0, 1, 1], [], []>} : vector<1x32xf32>, vector<32x16xf32>, vector<1x16xf32> -> vector<1x16xf32>
    %c0_175 = arith.constant 0 : index
    %c0_176 = arith.constant 0 : index
    %424 = vector.load %arg17[%c0_175, %c0_176] : memref<1x16xf32, #tpu.memory_space<vmem>>, vector<1x16xf32>
    %425 = arith.addf %423, %424 : vector<1x16xf32>
    %cst_177 = arith.constant 0.000000e+00 : f32
    %426 = vector.broadcast %cst_177 : f32 to vector<1x16xf32>
    %427 = arith.maximumf %425, %426 : vector<1x16xf32>
    %c0_178 = arith.constant 0 : index
    %c0_179 = arith.constant 0 : index
    %428 = vector.load %arg18[%c0_178, %c0_179] : memref<16x8xf32, #tpu.memory_space<vmem>>, vector<16x8xf32>
    %cst_180 = arith.constant dense<0.000000e+00> : vector<1x8xf32>
    %429 = tpu.matmul %427, %428, %cst_180 {dimension_numbers = #tpu.dot_dimension_numbers<[1], [0], [0], [1], [0, 0, 1, 1], [], []>} : vector<1x16xf32>, vector<16x8xf32>, vector<1x8xf32> -> vector<1x8xf32>
    %c0_181 = arith.constant 0 : index
    %c0_182 = arith.constant 0 : index
    %430 = vector.load %arg19[%c0_181, %c0_182] : memref<1x8xf32, #tpu.memory_space<vmem>>, vector<1x8xf32>
    %431 = arith.addf %429, %430 : vector<1x8xf32>
    %cst_183 = arith.constant 0.000000e+00 : f32
    %432 = vector.broadcast %cst_183 : f32 to vector<1x8xf32>
    %433 = arith.maximumf %431, %432 : vector<1x8xf32>
    %c0_184 = arith.constant 0 : index
    %c0_185 = arith.constant 0 : index
    %434 = vector.load %arg20[%c0_184, %c0_185] : memref<8x16xf32, #tpu.memory_space<vmem>>, vector<8x16xf32>
    %cst_186 = arith.constant dense<0.000000e+00> : vector<1x16xf32>
    %435 = tpu.matmul %433, %434, %cst_186 {dimension_numbers = #tpu.dot_dimension_numbers<[1], [0], [0], [1], [0, 0, 1, 1], [], []>} : vector<1x8xf32>, vector<8x16xf32>, vector<1x16xf32> -> vector<1x16xf32>
    %c0_187 = arith.constant 0 : index
    %c0_188 = arith.constant 0 : index
    %436 = vector.load %arg21[%c0_187, %c0_188] : memref<1x16xf32, #tpu.memory_space<vmem>>, vector<1x16xf32>
    %437 = arith.addf %435, %436 : vector<1x16xf32>
    %c0_189 = arith.constant 0 : index
    %c0_190 = arith.constant 0 : index
    %c0_191 = arith.constant 0 : index
    %438 = vector.load %arg23[%c0_189, %c0_190, %c0_191] : memref<1x4x16xf32, #tpu.memory_space<vmem>>, vector<1x1x16xf32>
    %439 = vector.shape_cast %438 : vector<1x1x16xf32> to vector<1x16xf32>
    %440 = vector.shape_cast %394 : vector<1x16xf32> to vector<1x1x16xf32>
    tpu.vector_store %arg23[%c0_189, %c0_190, %c0_191], %440 {strides = array<i32>} : memref<1x4x16xf32, #tpu.memory_space<vmem>>, vector<1x1x16xf32>,
    %c0_192 = arith.constant 0 : index
    %c1 = arith.constant 1 : index
    %c0_193 = arith.constant 0 : index
    %441 = vector.load %arg23[%c0_192, %c1, %c0_193] : memref<1x4x16xf32, #tpu.memory_space<vmem>>, vector<1x1x16xf32>
    %442 = vector.shape_cast %441 : vector<1x1x16xf32> to vector<1x16xf32>
    %443 = vector.shape_cast %417 : vector<1x16xf32> to vector<1x1x16xf32>
    tpu.vector_store %arg23[%c0_192, %c1, %c0_193], %443 {strides = array<i32>} : memref<1x4x16xf32, #tpu.memory_space<vmem>>, vector<1x1x16xf32>,
    %c0_194 = arith.constant 0 : index
    %c2 = arith.constant 2 : index
    %c0_195 = arith.constant 0 : index
    %444 = vector.load %arg23[%c0_194, %c2, %c0_195] : memref<1x4x16xf32, #tpu.memory_space<vmem>>, vector<1x1x16xf32>
    %445 = vector.shape_cast %444 : vector<1x1x16xf32> to vector<1x16xf32>
    %446 = vector.shape_cast %421 : vector<1x16xf32> to vector<1x1x16xf32>
    tpu.vector_store %arg23[%c0_194, %c2, %c0_195], %446 {strides = array<i32>} : memref<1x4x16xf32, #tpu.memory_space<vmem>>, vector<1x1x16xf32>,
    %c0_196 = arith.constant 0 : index
    %c3 = arith.constant 3 : index
    %c0_197 = arith.constant 0 : index
    %447 = vector.load %arg23[%c0_196, %c3, %c0_197] : memref<1x4x16xf32, #tpu.memory_space<vmem>>, vector<1x1x16xf32>
    %448 = vector.shape_cast %447 : vector<1x1x16xf32> to vector<1x16xf32>
    %449 = vector.shape_cast %437 : vector<1x16xf32> to vector<1x1x16xf32>
    tpu.vector_store %arg23[%c0_196, %c3, %c0_197], %449 {strides = array<i32>} : memref<1x4x16xf32, #tpu.memory_space<vmem>>, vector<1x1x16xf32>,
    return
  }
  func.func @transform_0(%arg0: i32) -> (i32, i32, i32) {
    %c0_i32 = arith.constant 0 : i32
    %c0_i32_0 = arith.constant 0 : i32
    %c0_i32_1 = arith.constant 0 : i32
    return %arg0, %c0_i32, %c0_i32_0 : i32, i32, i32
  }
  func.func @transform_1(%arg0: i32) -> (i32, i32, i32) {
    %c0_i32 = arith.constant 0 : i32
    %c0_i32_0 = arith.constant 0 : i32
    %c0_i32_1 = arith.constant 0 : i32
    return %arg0, %c0_i32, %c0_i32_0 : i32, i32, i32
  }
  func.func @transform_2(%arg0: i32) -> (i32, i32, i32) {
    %c0_i32 = arith.constant 0 : i32
    %c0_i32_0 = arith.constant 0 : i32
    %c0_i32_1 = arith.constant 0 : i32
    return %arg0, %c0_i32, %c0_i32_0 : i32, i32, i32
  }
  func.func @transform_3(%arg0: i32) -> (i32, i32) {
    %c0_i32 = arith.constant 0 : i32
    %c0_i32_0 = arith.constant 0 : i32
    %c0_i32_1 = arith.constant 0 : i32
    return %c0_i32, %c0_i32_0 : i32, i32
  }
  func.func @transform_4(%arg0: i32) -> (i32, i32) {
    %c0_i32 = arith.constant 0 : i32
    %c0_i32_0 = arith.constant 0 : i32
    %c0_i32_1 = arith.constant 0 : i32
    return %c0_i32, %c0_i32_0 : i32, i32
  }
  func.func @transform_5(%arg0: i32) -> (i32, i32) {
    %c0_i32 = arith.constant 0 : i32
    %c0_i32_0 = arith.constant 0 : i32
    %c0_i32_1 = arith.constant 0 : i32
    return %c0_i32, %c0_i32_0 : i32, i32
  }
  func.func @transform_6(%arg0: i32) -> (i32, i32) {
    %c0_i32 = arith.constant 0 : i32
    %c0_i32_0 = arith.constant 0 : i32
    %c0_i32_1 = arith.constant 0 : i32
    return %c0_i32, %c0_i32_0 : i32, i32
  }
  func.func @transform_7(%arg0: i32) -> (i32, i32) {
    %c0_i32 = arith.constant 0 : i32
    %c0_i32_0 = arith.constant 0 : i32
    %c0_i32_1 = arith.constant 0 : i32
    return %c0_i32, %c0_i32_0 : i32, i32
  }
  func.func @transform_8(%arg0: i32) -> (i32, i32) {
    %c0_i32 = arith.constant 0 : i32
    %c0_i32_0 = arith.constant 0 : i32
    %c0_i32_1 = arith.constant 0 : i32
    return %c0_i32, %c0_i32_0 : i32, i32
  }
  func.func @transform_9(%arg0: i32) -> (i32, i32) {
    %c0_i32 = arith.constant 0 : i32
    %c0_i32_0 = arith.constant 0 : i32
    %c0_i32_1 = arith.constant 0 : i32
    return %c0_i32, %c0_i32_0 : i32, i32
  }
  func.func @transform_10(%arg0: i32) -> (i32, i32) {
    %c0_i32 = arith.constant 0 : i32
    %c0_i32_0 = arith.constant 0 : i32
    %c0_i32_1 = arith.constant 0 : i32
    return %c0_i32, %c0_i32_0 : i32, i32
  }
  func.func @transform_11(%arg0: i32) -> (i32, i32) {
    %c0_i32 = arith.constant 0 : i32
    %c0_i32_0 = arith.constant 0 : i32
    %c0_i32_1 = arith.constant 0 : i32
    return %c0_i32, %c0_i32_0 : i32, i32
  }
  func.func @transform_12(%arg0: i32) -> (i32, i32) {
    %c0_i32 = arith.constant 0 : i32
    %c0_i32_0 = arith.constant 0 : i32
    %c0_i32_1 = arith.constant 0 : i32
    return %c0_i32, %c0_i32_0 : i32, i32
  }
  func.func @transform_13(%arg0: i32) -> (i32, i32) {
    %c0_i32 = arith.constant 0 : i32
    %c0_i32_0 = arith.constant 0 : i32
    %c0_i32_1 = arith.constant 0 : i32
    return %c0_i32, %c0_i32_0 : i32, i32
  }
  func.func @transform_14(%arg0: i32) -> (i32, i32) {
    %c0_i32 = arith.constant 0 : i32
    %c0_i32_0 = arith.constant 0 : i32
    %c0_i32_1 = arith.constant 0 : i32
    return %c0_i32, %c0_i32_0 : i32, i32
  }
  func.func @transform_15(%arg0: i32) -> (i32, i32) {
    %c0_i32 = arith.constant 0 : i32
    %c0_i32_0 = arith.constant 0 : i32
    %c0_i32_1 = arith.constant 0 : i32
    return %c0_i32, %c0_i32_0 : i32, i32
  }
  func.func @transform_16(%arg0: i32) -> (i32, i32) {
    %c0_i32 = arith.constant 0 : i32
    %c0_i32_0 = arith.constant 0 : i32
    %c0_i32_1 = arith.constant 0 : i32
    return %c0_i32, %c0_i32_0 : i32, i32
  }
  func.func @transform_17(%arg0: i32) -> (i32, i32) {
    %c0_i32 = arith.constant 0 : i32
    %c0_i32_0 = arith.constant 0 : i32
    %c0_i32_1 = arith.constant 0 : i32
    return %c0_i32, %c0_i32_0 : i32, i32
  }
  func.func @transform_18(%arg0: i32) -> (i32, i32) {
    %c0_i32 = arith.constant 0 : i32
    %c0_i32_0 = arith.constant 0 : i32
    %c0_i32_1 = arith.constant 0 : i32
    return %c0_i32, %c0_i32_0 : i32, i32
  }
  func.func @transform_19(%arg0: i32) -> (i32, i32) {
    %c0_i32 = arith.constant 0 : i32
    %c0_i32_0 = arith.constant 0 : i32
    %c0_i32_1 = arith.constant 0 : i32
    return %c0_i32, %c0_i32_0 : i32, i32
  }
  func.func @transform_20(%arg0: i32) -> (i32, i32) {
    %c0_i32 = arith.constant 0 : i32
    %c0_i32_0 = arith.constant 0 : i32
    %c0_i32_1 = arith.constant 0 : i32
    return %c0_i32, %c0_i32_0 : i32, i32
  }
  func.func @transform_21(%arg0: i32) -> (i32, i32, i32) {
    %c0_i32 = arith.constant 0 : i32
    %c0_i32_0 = arith.constant 0 : i32
    %c0_i32_1 = arith.constant 0 : i32
    return %arg0, %c0_i32, %c0_i32_0 : i32, i32, i32
  }
  func.func @transform_22(%arg0: i32) -> (i32, i32, i32) {
    %c0_i32 = arith.constant 0 : i32
    %c0_i32_0 = arith.constant 0 : i32
    %c0_i32_1 = arith.constant 0 : i32
    return %arg0, %c0_i32, %c0_i32_0 : i32, i32, i32
  }
}

</mosaic_0001>

<bundles_post_ra>
// kernel: etn_forward.1
= control target key start
LH: loop header
LB: loop body
LE: loop exit
PB: predicated region body
PF: predicated region fallthrough
CT: control target
= control target key end

     0   :  { %s5899_s0 = inlined_call_operand.vmem [shape: f32[2,196,32], index: 0, kind: input, shape index: {}]   ;;  %s5900_s1 = inlined_call_operand.vmem [shape: f32[2,16,32], index: 1, kind: input, shape index: {}]   ;;  %s5901_s2 = inlined_call_operand.vmem [shape: f32[2,1,32], index: 2, kind: input, shape index: {}]   ;;  %s5902_s3 = inlined_call_operand.vmem [shape: f32[16,32], index: 3, kind: input, shape index: {}]   ;;  %s5903_s4 = inlined_call_operand.vmem [shape: f32[16,32], index: 4, kind: input, shape index: {}]   ;;  %s5904_s5 = inlined_call_operand.vmem [shape: f32[32,32], index: 5, kind: input, shape index: {}]   ;;  %s5905_s6 = inlined_call_operand.vmem [shape: f32[1,32], index: 6, kind: input, shape index: {}]   ;;  %s5906_s7 = inlined_call_operand.vmem [shape: f32[32,64], index: 7, kind: input, shape index: {}]   ;;  %s5907_s8 = inlined_call_operand.vmem [shape: f32[1,64], index: 8, kind: input, shape index: {}]   ;;  %s5908_s9 = inlined_call_operand.vmem [shape: f32[32,32], index: 9, kind: input, shape index: {}]   ;;  %s5909_s10 = inlined_call_operand.vmem [shape: f32[1,32], index: 10, kind: input, shape index: {}]   ;;  %s5910_s11 = inlined_call_operand.vmem [shape: f32[1,32], index: 11, kind: input, shape index: {}]   ;;  %s5911_s12 = inlined_call_operand.vmem [shape: f32[1,32], index: 12, kind: input, shape index: {}]   ;;  %s5912_s13 = inlined_call_operand.vmem [shape: f32[16,32], index: 13, kind: input, shape index: {}]   ;;  %s5913_s14 = inlined_call_operand.vmem [shape: f32[32,16], index: 14, kind: input, shape index: {}]   ;;  %s5914_s15 = inlined_call_operand.vmem [shape: f32[32,16], index: 15, kind: input, shape index: {}]   ;;  %s5915_s16 = inlined_call_operand.vmem [shape: f32[1,16], index: 16, kind: input, shape index: {}]   ;;  %s5916_s17 = inlined_call_operand.vmem [shape: f32[16,8], index: 17, kind: input, shape index: {}]   ;;  %s5917_s18 = inlined_call_operand.vmem [shape: f32[1,8], index: 18, kind: input, shape index: {}]   ;;  %s5918_s19 = inlined_call_operand.vmem [shape: f32[8,16], index: 19, kind: input, shape index: {}]   ;;  %s5919_s20 = inlined_call_operand.vmem [shape: f32[1,16], index: 20, kind: input, shape index: {}]   ;;  %s5920_s21 = inlined_call_operand.hbm [shape: f32[2,16,32], index: 21, kind: output, shape index: {0}]   ;;  %s5921_s22 = inlined_call_operand.vmem [shape: f32[2,4,16], index: 22, kind: output, shape index: {1}]  }
   0x1   :  { %5937 = sst [smem:[#allocation12_spill]] %s5899_s0 }
   0x2   :  { %5938 = sst [smem:[#allocation13_spill]] %s5900_s1 }
   0x3   :  { %5939 = sst [smem:[#allocation14_spill]] %s5901_s2 }
   0x4   :  { %5940 = sst [smem:[#allocation15_spill]] %s5902_s3 }
   0x5   :  { %5941 = sst [smem:[#allocation16_spill]] %s5903_s4 }
   0x6   :  { %5942 = sst [smem:[#allocation17_spill]] %s5904_s5 }
   0x7   :  { %5943 = sst [smem:[#allocation18_spill]] %s5905_s6 }
   0x8   :  { %5944 = sst [smem:[#allocation19_spill]] %s5906_s7 }
   0x9   :  { %5945 = sst [smem:[#allocation20_spill]] %s5907_s8 }
   0xa   :  { %5946 = sst [smem:[#allocation21_spill]] %s5908_s9 }
   0xb   :  { %5947 = sst [smem:[#allocation22_spill]] %s5909_s10 }
   0xc   :  { %5948 = sst [smem:[#allocation23_spill]] %s5919_s20 }
   0xd   :  { %5949 = sst [smem:[#allocation24_spill]] %s5920_s21 }
   0xe   :  { %28 = vsyncpa [#allocation3], 0 }
   0xf   :  { %30 = vsyncpa [#allocation3 + $0x1], 0  ;;  %s4324_s3 = smov 0   ;;  %s4326_s28 = smov 0  }
  0x10   :  { %s4328_s29 = smov 0   ;;  %s4330_s30 = smov 0  }
  0x11 LB: > { %5950 = sst [smem:[#allocation5_spill]] %s4183_s3  ;;  %s4345_s4 = sadd.s32 4294967295, %s4195_s30   ;;  %s4195_s30 = sphi %s4330_s30, %s6006_s30   ;;  %s4191_s29 = sphi %s4328_s29, %s6008_s29   ;;  %s4187_s28 = sphi %s4326_s28, %s6010_s28   ;;  %s4183_s3 = sphi %s4324_s3, %s6009_s3  }
  0x12   : > { %5951 = sst [smem:[#allocation6_spill]] %s4191_s29  ;;  %s3688_s0 = sadd.s32 4294967294, %s4195_s30  }
  0x13   : > { %5952 = sst [smem:[#allocation7_spill]] %s4195_s30  ;;  %s4349_s23 = sadd.s32 1, %s4195_s30  }
  0x14   : > { %5953 = sst [smem:[#allocation8_spill]] %s4349_s23  ;;  %s499_s1 = sadd.s32 1, %s4191_s29 }
  0x15   : > { %s496_s5 = ssub.s32 %s4195_s30, %s4349_s23  ;;  %p509_p0 = scmp.ne.s32.totalorder %s4191_s29, %s4187_s28 }
  0x16   : > { %p497_p1 = scmp.eq.s32.totalorder %s496_s5, 0  ;;  %p510_p2 = scmp.eq.s32.totalorder %s4345_s4, 1 }
  0x17   : > { %p515_p3 = scmp.ne.s32.totalorder %s4187_s28, %s4183_s3  ;;  %p516_p4 = scmp.eq.s32.totalorder %s3688_s0, 1 }
  0x18   : > { %s4360_s24 = scalar_select %p497_p1, %s4191_s29, %s499_s1  }
  0x19   : > { %p4362_p5 = por %p510_p2, %p509_p0  ;;  %p4366_p6 = por %p516_p4, %p515_p3 }
  0x1a   : > { %5954 = sst [smem:[#allocation9_spill]] %s4360_s24  ;;  %p3691_p7 = scmp.ge.s32.totalorder %s4195_s30, 1 }
  0x1b   : > { %s5955_s6 = scalar_select %p4362_p5, 1, 0 }
  0x1c   : > { %s5957_s25 = scalar_select %p4366_p6, 1, 0 }
  0x1d   : > { %5956 = sst [smem:[#allocation10_spill]] %s5955_s6  ;;  %p636_p8 = scmp.lt.s32.totalorder %s4195_s30, 3 }
  0x1e   : > { %5958 = sst [smem:[#allocation11_spill]] %s5957_s25 }
  0x1f   : > { %p637_p9 = pnand %p3691_p7, %p636_p8 }
  0x20   : > { %p710_p10 = scmp.lt.s32.totalorder (!%p637_p9), %s4345_s4, 1  ;;  %s5959_s1 = sld [smem:[#allocation12_spill]] (!%p637_p9) }
  0x21   : > { %640 = sbr.rel (%p637_p9) target bundleno = 3968 (0xf80), region = 104  ;;  %s5988_s0 = sld [smem:[#allocation15_spill]] (!%p637_p9) }
  0x22   : > { %s5925_s24 = sand.u32 (!%p637_p9), 1, %s4187_s28   ;;  %s5989_s7 = sld [smem:[#allocation19_spill]] (!%p637_p9) }
  0x23   : > { %s5990_s3 = sld [smem:[#allocation17_spill]] (!%p637_p9)  ;;  %s4198_s21 = smov (!%p637_p9), 120  }
  0x24   : > { %s5993_s25 = sld [smem:[#allocation16_spill]] (!%p637_p9)  ;;  %s4199_s30 = smov (!%p637_p9), 96  }
  0x25   : > { %s5994_s8 = sld [smem:[#allocation20_spill]] (!%p637_p9) }
  0x26   : > { %s4374_s26 = scalar_select %p710_p10, %s4345_s4, 1  ;;  %vm777_vm0 = vcmask 261120   ;;  %vm850_vm1 = vcmask 257024  }
  0x27   : > { %s5995_s23 = sld [smem:[#allocation18_spill]] }
  0x28   : > { %s3820_s2 = smul.u32 200, %s4374_s26  ;;  %s3818_s27 = sshll.u32 %s4374_s26, 4 }
  0x29   : > { %s5991_s20 = smov %s5990_s3  ;;  %s5996_s9 = sld [smem:[#allocation21_spill]] }
  0x2a   : > { %s4380_s5 = scalar_lea.vmem %s5959_s1, %s3820_s2  ;;  %s4200_s1 = smov 104  }
  0x2b   : > { %v4383_v0 = vld [vmem:[%s4380_s5 + $0x78] sm:$0xff]  ;;  %v4386_v1 = vld [vmem:[%s4380_s5 + $0x68] sm:$0xff]  ;;  %v4394_v6 = vld [vmem:[%s4380_s5 + $0x70] sm:$0xff]  ;;  %s5997_s10 = sld [smem:[#allocation22_spill]]  ;;  %s3696_s29 = sshll.u32 %s4374_s26, 2 }
  0x2c   : > { %v738_v2 = vld [vmem:[%s4380_s5 + $0x58] sm:$0xff]  ;;  %v767_v3 = vmul.f32 %v4383_v0, %v4383_v0  ;;  %v765_v4 = vmul.f32 %v4386_v1, %v4386_v1  ;;  %v4397_v7 = vld [vmem:[%s4380_s5 + $0x60] sm:$0xff]  ;;  %v737_v11 = vld [vmem:[%s4380_s5 + $0x50] sm:$0xff]  ;;  %v766_v12 = vmul.f32 %v4394_v6, %v4394_v6 }
  0x2d   : > { %v763_v5 = vmul.f32 %v738_v2, %v738_v2  ;;  %v764_v13 = vmul.f32 %v4397_v7, %v4397_v7  ;;  %v762_v14 = vmul.f32 %v737_v11, %v737_v11  ;;  %v751_v18 = vld [vmem:[%s4380_s5 + $0xc0] sm:$0xf]  ;;  %v736_v19 = vld [vmem:[%s4380_s5 + $0x48] sm:$0xff]  ;;  %v750_v27 = vld [vmem:[%s4380_s5 + $0xb8] sm:$0xff] }
  0x2e   : > { %v823_v8 = vsel %vm777_vm0, %v767_v3, 0.0  ;;  %v817_v9 = vsel %vm777_vm0, %v765_v4, 0.0  ;;  %v820_v15 = vsel %vm777_vm0, %v766_v12, 0.0  ;;  %v735_v20 = vld [vmem:[%s4380_s5 + $0x40] sm:$0xff]  ;;  %v776_v21 = vmul.f32 %v751_v18, %v751_v18  ;;  %v734_v28 = vld [vmem:[%s4380_s5 + $0x38] sm:$0xff]  ;;  %v749_v29 = vld [vmem:[%s4380_s5 + $0xb0] sm:$0xff] }
  0x2f   : > { %v811_v10 = vsel %vm777_vm0, %v763_v5, 0.0  ;;  %824 = vadd.xlane.f32.xlu0 %v823_v8  ;;  %818 = vadd.xlane.f32.xlu1 %v817_v9  ;;  %v814_v16 = vsel %vm777_vm0, %v764_v13, 0.0  ;;  %v808_v17 = vsel %vm777_vm0, %v762_v14, 0.0  ;;  %v761_v22 = vmul.f32 %v736_v19, %v736_v19  ;;  %v748_v36 = vld [vmem:[%s4380_s5 + $0xa8] sm:$0xff]  ;;  %v733_v37 = vld [vmem:[%s4380_s5 + $0x30] sm:$0xff]  ;;  %v747_v45 = vld [vmem:[%s4380_s5 + $0xa0] sm:$0xff] }
  0x30   : > { %812 = vadd.xlane.f32.xlu2 %v811_v10  ;;  %v760_v23 = vmul.f32 %v735_v20, %v735_v20  ;;  %v851_v24 = vsel %vm850_vm1, %v776_v21, 0.0  ;;  %v775_v30 = vmul.f32 %v750_v27, %v750_v27  ;;  %v759_v31 = vmul.f32 %v734_v28, %v734_v28  ;;  %v732_v38 = vld [vmem:[%s4380_s5 + $0x28] sm:$0xff]  ;;  %v731_v46 = vld [vmem:[%s4380_s5 + $0x20] sm:$0xff]  ;;  %v746_v47 = vld [vmem:[%s4380_s5 + $0x98] sm:$0xff] }
  0x31   : > { %v805_v25 = vsel %vm777_vm0, %v761_v22, 0.0  ;;  %v774_v32 = vmul.f32 %v749_v29, %v749_v29  ;;  %v773_v39 = vmul.f32 %v748_v36, %v748_v36  ;;  %v758_v40 = vmul.f32 %v733_v37, %v733_v37  ;;  %v745_v54 = vld [vmem:[%s4380_s5 + $0x90] sm:$0xff]  ;;  %v730_v55 = vld [vmem:[%s4380_s5 + $0x18] sm:$0xff]  ;;  %v744_v63 = vld [vmem:[%s4380_s5 + $0x88] sm:$0xff] }
  0x32   : > { %v802_v26 = vsel %vm777_vm0, %v760_v23, 0.0  ;;  %v847_v33 = vsel %vm777_vm0, %v775_v30, 0.0  ;;  %v799_v34 = vsel %vm777_vm0, %v759_v31, 0.0  ;;  %v757_v41 = vmul.f32 %v732_v38, %v732_v38  ;;  %v729_v56 = vld [vmem:[%s4380_s5 + $0x10] sm:$0xff]  ;;  %v728_v2 = vld [vmem:[%s4380_s5 + $0x8] sm:$0xff]  ;;  %v743_v3 = vld [vmem:[%s4380_s5 + $0x80] sm:$0xff] }
  0x33   : > { %v844_v35 = vsel %vm777_vm0, %v774_v32, 0.0  ;;  %v841_v42 = vsel %vm777_vm0, %v773_v39, 0.0  ;;  %v796_v43 = vsel %vm777_vm0, %v758_v40, 0.0  ;;  %v772_v48 = vmul.f32 %v747_v45, %v747_v45  ;;  %v727_v12 = vld [vmem:[%s4380_s5] sm:$0xff] }
  0x34   : > { %v793_v44 = vsel %vm777_vm0, %v757_v41, 0.0  ;;  %v756_v49 = vmul.f32 %v731_v46, %v731_v46  ;;  %v771_v50 = vmul.f32 %v746_v47, %v746_v47  ;;  %v770_v57 = vmul.f32 %v745_v54, %v745_v54 }
  0x35   : > { %v838_v51 = vsel %vm777_vm0, %v772_v48, 0.0  ;;  %v755_v58 = vmul.f32 %v730_v55, %v730_v55  ;;  %v754_v59 = vmul.f32 %v729_v56, %v729_v56  ;;  %v769_v4 = vmul.f32 %v744_v63, %v744_v63 }
  0x36   : > { %v790_v52 = vsel %vm777_vm0, %v756_v49, 0.0  ;;  %v835_v53 = vsel %vm777_vm0, %v771_v50, 0.0  ;;  %v832_v60 = vsel %vm777_vm0, %v770_v57, 0.0  ;;  %v753_v5 = vmul.f32 %v728_v2, %v728_v2 }
  0x37   : > { %821 = vadd.xlane.f32.xlu0 %v820_v15  ;;  %815 = vadd.xlane.f32.xlu1 %v814_v16  ;;  %v787_v61 = vsel %vm777_vm0, %v755_v58, 0.0  ;;  %v784_v62 = vsel %vm777_vm0, %v754_v59, 0.0  ;;  %v768_v8 = vmul.f32 %v743_v3, %v743_v3  ;;  %v829_v9 = vsel %vm777_vm0, %v769_v4, 0.0 }
  0x38   : > { %809 = vadd.xlane.f32.xlu2 %v808_v17  ;;  %v781_v10 = vsel %vm777_vm0, %v753_v5, 0.0  ;;  %v752_v13 = vmul.f32 %v727_v12, %v727_v12 }
  0x39   : > { %v826_v11 = vsel %vm777_vm0, %v768_v8, 0.0 }
  0x3a   : > { %v778_v14 = vsel %vm777_vm0, %v752_v13, 0.0 }
  0x3f   : > { %852 = vadd.xlane.f32.xlu1 %v851_v24  ;;  %806 = vadd.xlane.f32.xlu0 %v805_v25 }
  0x40   : > { %803 = vadd.xlane.f32.xlu2 %v802_v26 }
  0x47   : > { %848 = vadd.xlane.f32.xlu0 %v847_v33  ;;  %800 = vadd.xlane.f32.xlu1 %v799_v34 }
  0x48   : > { %845 = vadd.xlane.f32.xlu2 %v844_v35 }
  0x4f   : > { %842 = vadd.xlane.f32.xlu1 %v841_v42  ;;  %797 = vadd.xlane.f32.xlu0 %v796_v43 }
  0x50   : > { %794 = vadd.xlane.f32.xlu2 %v793_v44 }
  0x57   : > { %839 = vadd.xlane.f32.xlu0 %v838_v51  ;;  %791 = vadd.xlane.f32.xlu1 %v790_v52 }
  0x58   : > { %836 = vadd.xlane.f32.xlu2 %v835_v53 }
  0x5f   : > { %833 = vadd.xlane.f32.xlu1 %v832_v60  ;;  %788 = vadd.xlane.f32.xlu0 %v787_v61 }
  0x60   : > { %785 = vadd.xlane.f32.xlu2 %v784_v62 }
  0x67   : > { %830 = vadd.xlane.f32.xlu0 %v829_v9  ;;  %782 = vadd.xlane.f32.xlu1 %v781_v10 }
  0x68   : > { %827 = vadd.xlane.f32.xlu2 %v826_v11 }
  0x6f   : > { %779 = vadd.xlane.f32.xlu0 %v778_v14 }
  0xa2   : > { %v4447_v15 = vpop.xlane.xlu0 %824  ;;  %v4449_v16 = vpop.xlane.xlu1 %818 }
  0xa3   : > { %3900 = vrsqrt.f32 %v4447_v15  ;;  %v4452_v17 = vpop.xlane.xlu2 %812  ;;  %vm1041_vm2 = vcmp.eq.f32.partialorder %v4447_v15, inf  ;;  %v1044_v57 = vand.u32 2147483648, %v4447_v15  ;;  %vm1017_vm3 = vcmp.eq.f32.partialorder %v4449_v16, inf }
  0xa4   : > { %3902 = vrsqrt.f32 %v4449_v16  ;;  %vm1043_vm4 = vcmp.eq.f32.partialorder %v4447_v15, 0.0  ;;  %vm1019_vm5 = vcmp.eq.f32.partialorder %v4449_v16, 0.0  ;;  %v1020_v3 = vand.u32 2147483648, %v4449_v16 }
  0xa5   : > { %3904 = vrsqrt.f32 %v4452_v17  ;;  %vm993_vm6 = vcmp.eq.f32.partialorder %v4452_v17, inf  ;;  %vm995_vm7 = vcmp.eq.f32.partialorder %v4452_v17, 0.0  ;;  %v996_v8 = vand.u32 2147483648, %v4452_v17 }
  0xa9   : > { %v3901_v18 = vpop.eup %3900 }
  0xaa   : > { %v3903_v19 = vpop.eup %3902  ;;  %v4456_v20 = vpop.xlane.xlu0 %821  ;;  %v1035_v24 = vmul.f32 %v3901_v18, %v4447_v15 }
  0xab   : > { %v4458_v21 = vpop.xlane.xlu1 %815  ;;  %v3905_v22 = vpop.eup %3904  ;;  %3906 = vrsqrt.f32 %v4456_v20  ;;  %v1011_v25 = vmul.f32 %v3903_v19, %v4449_v16  ;;  %vm1029_vm8 = vcmp.eq.f32.partialorder %v4456_v20, inf  ;;  %vm1031_vm9 = vcmp.eq.f32.partialorder %v4456_v20, 0.0 }
  0xac   : > { %v4461_v23 = vpop.xlane.xlu2 %809  ;;  %3908 = vrsqrt.f32 %v4458_v21  ;;  %v987_v26 = vmul.f32 %v3905_v22, %v4452_v17  ;;  %v1036_v28 = vmul.f32 %v3901_v18, %v1035_v24  ;;  %vm1005_vm10 = vcmp.eq.f32.partialorder %v4458_v21, inf }
  0xad   : > { %3910 = vrsqrt.f32 %v4461_v23  ;;  %v1012_v29 = vmul.f32 %v3903_v19, %v1011_v25  ;;  %vm981_vm11 = vcmp.eq.f32.partialorder %v4461_v23, inf  ;;  %vm1007_vm12 = vcmp.eq.f32.partialorder %v4458_v21, 0.0 }
  0xae   : > { %v988_v30 = vmul.f32 %v3905_v22, %v987_v26  ;;  %v1037_v38 = vmul.f32 0.5, %v1036_v28  ;;  %vm983_vm13 = vcmp.eq.f32.partialorder %v4461_v23, 0.0 }
  0xaf   : > { %v1013_v39 = vmul.f32 0.5, %v1012_v29 }
  0xb0   : > { %v989_v40 = vmul.f32 0.5, %v988_v30  ;;  %v1038_v45 = vsub.f32 1.5, %v1037_v38 }
  0xb1   : > { %v3907_v27 = vpop.eup %3906  ;;  %v1014_v46 = vsub.f32 1.5, %v1013_v39 }
  0xb2   : > { %v1023_v31 = vmul.f32 %v3907_v27, %v4456_v20  ;;  %v4471_v33 = vpop.xlane.xlu0 %806  ;;  %v4473_v34 = vpop.eup %3908  ;;  %v990_v47 = vsub.f32 1.5, %v989_v40  ;;  %v1039_v56 = vmul.f32 %v3901_v18, %v1038_v45 }
  0xb3   : > { %v4469_v32 = vpop.xlane.xlu1 %852  ;;  %v4478_v36 = vpop.eup %3910  ;;  %v999_v41 = vmul.f32 %v4473_v34, %v4458_v21  ;;  %v1015_v58 = vmul.f32 %v3903_v19, %v1014_v46 }
  0xb4   : > { %3912 = vrsqrt.f32 %v4469_v32  ;;  %v4476_v35 = vpop.xlane.xlu2 %803  ;;  %v1024_v37 = vmul.f32 %v3907_v27, %v1023_v31  ;;  %v975_v43 = vmul.f32 %v4478_v36, %v4461_v23  ;;  %v991_v59 = vmul.f32 %v3905_v22, %v990_v47 }
  0xb5   : > { %3914 = vrsqrt.f32 %v4471_v33  ;;  %v1000_v48 = vmul.f32 %v4473_v34, %v999_v41  ;;  %v1040_v5 = vmul.f32 %v1039_v56, %v4447_v15  ;;  %v1016_v11 = vmul.f32 %v1015_v58, %v4449_v16 }
  0xb6   : > { %v1025_v42 = vmul.f32 0.5, %v1024_v37  ;;  %3916 = vrsqrt.f32 %v4476_v35  ;;  %v976_v52 = vmul.f32 %v4478_v36, %v975_v43  ;;  %v992_v12 = vmul.f32 %v991_v59, %v4452_v17 }
  0xb7   : > { %v1001_v60 = vmul.f32 0.5, %v1000_v48  ;;  %v1042_v30 = vsel %vm1041_vm2, %v4447_v15, %v1040_v5  ;;  %v1008_v31 = vand.u32 2147483648, %v4458_v21  ;;  %v984_v37 = vand.u32 2147483648, %v4461_v23 }
  0xb8   : > { %v1026_v51 = vsub.f32 1.5, %v1025_v42  ;;  %v977_v62 = vmul.f32 0.5, %v976_v52  ;;  %v1018_v40 = vsel %vm1017_vm3, %v4449_v16, %v1016_v11  ;;  %v994_v41 = vsel %vm993_vm6, %v4452_v17, %v992_v12 }
  0xb9   : > { %v1002_v13 = vsub.f32 1.5, %v1001_v60  ;;  %v4573_v59 = vsel %vm995_vm7, %v996_v8, %v994_v41  ;;  %vm1149_vm14 = vcmp.eq.f32.partialorder %v4469_v32, inf  ;;  %vm1151_vm1 = vcmp.eq.f32.partialorder %v4469_v32, 0.0 }
  0xba   : > { %v4485_v44 = vpop.eup %3912  ;;  %v4489_v49 = vpop.xlane.xlu0 %848  ;;  %v1027_v61 = vmul.f32 %v3907_v27, %v1026_v51  ;;  %v978_v19 = vsub.f32 1.5, %v977_v62  ;;  %v1032_v27 = vand.u32 2147483648, %v4456_v20  ;;  %vm969_vm2 = vcmp.eq.f32.partialorder %v4471_v33, inf }
  0xbb   : > { %v4491_v50 = vpop.xlane.xlu1 %800  ;;  %v1143_v53 = vmul.f32 %v4485_v44, %v4469_v32  ;;  %3918 = vrsqrt.f32 %v4489_v49  ;;  %v4499_v55 = vpop.eup %3914  ;;  %v1003_v42 = vmul.f32 %v4473_v34, %v1002_v13  ;;  %v4561_v34 = vsel %vm1043_vm4, %v1044_v57, %v1042_v30 }
  0xbc   : > { %v4496_v54 = vpop.xlane.xlu2 %845  ;;  %v4505_v2 = vpop.eup %3916  ;;  %v963_v4 = vmul.f32 %v4499_v55, %v4471_v33  ;;  %v1028_v18 = vmul.f32 %v1027_v61, %v4456_v20  ;;  %v979_v45 = vmul.f32 %v4478_v36, %v978_v19  ;;  %v1152_v36 = vand.u32 2147483648, %v4469_v32 }
  0xbd   : > { %v1144_v63 = vmul.f32 %v4485_v44, %v1143_v53  ;;  %3920 = vrsqrt.f32 %v4496_v54  ;;  %v951_v9 = vmul.f32 %v4505_v2, %v4476_v35  ;;  %v4565_v53 = vsel %vm1019_vm5, %v1020_v3, %v1018_v40 }
  0xbe   : > { %v964_v28 = vmul.f32 %v4499_v55, %v963_v4  ;;  %3922 = vrsqrt.f32 %v4491_v50  ;;  %v1030_v43 = vsel %vm1029_vm8, %v4456_v20, %v1028_v18  ;;  %v1004_v60 = vmul.f32 %v1003_v42, %v4458_v21 }
  0xbf   : > { %v1145_v22 = vmul.f32 0.5, %v1144_v63  ;;  %v952_v29 = vmul.f32 %v4505_v2, %v951_v9  ;;  %v1033_v57 = vsel %vm1031_vm9, %v1032_v27, %v1030_v43  ;;  %v980_v61 = vmul.f32 %v979_v45, %v4461_v23 }
  0xc0   : > { %v965_v48 = vmul.f32 0.5, %v964_v28  ;;  %v972_v4 = vand.u32 2147483648, %v4471_v33  ;;  %v4596_v13 = vmax.f32 %v1033_v57, 1e-12  ;;  %v1006_v18 = vsel %vm1005_vm10, %v4458_v21, %v1004_v60 }
  0xc1   : > { %v3919_v10 = vpop.eup %3918  ;;  %v1146_v46 = vsub.f32 1.5, %v1145_v22  ;;  %v953_v51 = vmul.f32 0.5, %v952_v29  ;;  %v960_v19 = vand.u32 2147483648, %v4476_v35  ;;  %vm1137_vm15 = vcmp.eq.f32.partialorder %v4489_v49, inf }
  0xc2   : > { %v4523_v14 = vpop.xlane.xlu0 %797  ;;  %v1131_v24 = vmul.f32 %v3919_v10, %v4489_v49  ;;  %v966_v3 = vsub.f32 1.5, %v965_v48  ;;  %v982_v22 = vsel %vm981_vm11, %v4461_v23, %v980_v61  ;;  %vm957_vm3 = vcmp.eq.f32.partialorder %v4476_v35, inf }
  0xc3   : > { %v4527_v25 = vpop.xlane.xlu1 %842  ;;  %v4541_v39 = vpop.eup %3920  ;;  %v1147_v62 = vmul.f32 %v4485_v44, %v1146_v46  ;;  %v954_v5 = vsub.f32 1.5, %v953_v51  ;;  %vm971_vm4 = vcmp.eq.f32.partialorder %v4471_v33, 0.0  ;;  %vm1139_vm5 = vcmp.eq.f32.partialorder %v4489_v49, 0.0 }
  0xc4   : > { %v4529_v26 = vpop.xlane.xlu2 %794  ;;  %v1132_v38 = vmul.f32 %v3919_v10, %v1131_v24  ;;  %3924 = vrsqrt.f32 %v4527_v25  ;;  %v1119_v52 = vmul.f32 %v4541_v39, %v4496_v54  ;;  %v4569_v58 = vpop.eup %3922  ;;  %v967_v30 = vmul.f32 %v4499_v55, %v966_v3 }
  0xc5   : > { %3926 = vrsqrt.f32 %v4523_v14  ;;  %v939_v17 = vmul.f32 %v4569_v58, %v4491_v50  ;;  %v1148_v24 = vmul.f32 %v1147_v62, %v4469_v32  ;;  %v1140_v55 = vand.u32 2147483648, %v4489_v49 }
  0xc6   : > { %v1133_v47 = vmul.f32 0.5, %v1132_v38  ;;  %v1120_v15 = vmul.f32 %v4541_v39, %v1119_v52  ;;  %3928 = vrsqrt.f32 %v4529_v26  ;;  %v955_v38 = vmul.f32 %v4505_v2, %v954_v5 }
  0xc7   : > { %v940_v20 = vmul.f32 %v4569_v58, %v939_v17  ;;  %v4637_v48 = vsel %vm983_vm13, %v984_v37, %v982_v22  ;;  %v1128_v21 = vand.u32 2147483648, %v4496_v54  ;;  %v1150_v51 = vsel %vm1149_vm14, %v4469_v32, %v1148_v24 }
  0xc8   : > { %v1134_v56 = vsub.f32 1.5, %v1133_v47  ;;  %v1121_v9 = vmul.f32 0.5, %v1120_v15  ;;  %v4625_v47 = vsel %vm1007_vm12, %v1008_v31, %v1006_v18  ;;  %v968_v52 = vmul.f32 %v967_v30, %v4471_v33 }
  0xc9   : > { %v941_v40 = vmul.f32 0.5, %v940_v20  ;;  %vm959_vm6 = vcmp.eq.f32.partialorder %v4476_v35, 0.0  ;;  %v956_v15 = vmul.f32 %v955_v38, %v4476_v35  ;;  %vm1125_vm7 = vcmp.eq.f32.partialorder %v4496_v54, inf }
  0xca   : > { %v4579_v16 = vpop.xlane.xlu0 %839  ;;  %v3925_v63 = vpop.eup %3924  ;;  %v1135_v8 = vmul.f32 %v3919_v10, %v1134_v56  ;;  %v1122_v42 = vsub.f32 1.5, %v1121_v9  ;;  %vm945_vm8 = vcmp.eq.f32.partialorder %v4491_v50, inf  ;;  %v948_v5 = vand.u32 2147483648, %v4491_v50 }
  0xcb   : > { %3930 = vrsqrt.f32 %v4579_v16  ;;  %v1107_v11 = vmul.f32 %v3925_v63, %v4527_v25  ;;  %v4594_v44 = vpop.eup %3926  ;;  %v4603_v10 = vpop.xlane.xlu1 %791  ;;  %v942_v56 = vsub.f32 1.5, %v941_v40  ;;  %vm1113_vm9 = vcmp.eq.f32.partialorder %v4527_v25, inf }
  0xcc   : > { %v4592_v12 = vpop.xlane.xlu2 %836  ;;  %v927_v28 = vmul.f32 %v4594_v44, %v4523_v14  ;;  %v4613_v29 = vpop.eup %3928  ;;  %v1136_v41 = vmul.f32 %v1135_v8, %v4489_v49  ;;  %v1123_v37 = vmul.f32 %v4541_v39, %v1122_v42  ;;  %v4665_v8 = vsel %vm1151_vm1, %v1152_v36, %v1150_v51 }
  0xcd   : > { %v1108_v27 = vmul.f32 %v3925_v63, %v1107_v11  ;;  %3932 = vrsqrt.f32 %v4592_v12  ;;  %v915_v2 = vmul.f32 %v4613_v29, %v4529_v26  ;;  %vm1127_vm10 = vcmp.eq.f32.partialorder %v4496_v54, 0.0 }
  0xce   : > { %v928_v45 = vmul.f32 %v4594_v44, %v927_v28  ;;  %3934 = vrcp.f32 %v4596_v13  ;;  %v1138_v23 = vsel %vm1137_vm15, %v4489_v49, %v1136_v41  ;;  %v943_v9 = vmul.f32 %v4569_v58, %v942_v56 }
  0xcf   : > { %v1109_v43 = vmul.f32 0.5, %v1108_v27  ;;  %v916_v17 = vmul.f32 %v4613_v29, %v915_v2  ;;  %3936 = vrsqrt.f32 %v4603_v10  ;;  %vm1115_vm11 = vcmp.eq.f32.partialorder %v4527_v25, 0.0 }
  0xd0   : > { %v929_v57 = vmul.f32 0.5, %v928_v45  ;;  %v958_v32 = vsel %vm957_vm3, %v4476_v35, %v956_v15  ;;  %v1141_v36 = vsel %vm1139_vm5, %v1140_v55, %v1138_v23  ;;  %v1124_v22 = vmul.f32 %v1123_v37, %v4496_v54 }
  0xd1   : > { %v3931_v46 = vpop.eup %3930  ;;  %v1110_v31 = vsub.f32 1.5, %v1109_v43  ;;  %vm947_vm12 = vcmp.eq.f32.partialorder %v4491_v50, 0.0  ;;  %v917_v27 = vmul.f32 0.5, %v916_v17  ;;  %v4686_v30 = vmax.f32 %v4561_v34, 1e-12 }
  0xd2   : > { %v1095_v60 = vmul.f32 %v3931_v46, %v4579_v16  ;;  %v930_v24 = vsub.f32 1.5, %v929_v57  ;;  %v1116_v49 = vand.u32 2147483648, %v4527_v25  ;;  %v4699_v42 = vmax.f32 %v1141_v36, 1e-12 }
  0xd3   : > { %v4652_v61 = vpop.eup %3932  ;;  %v1111_v62 = vmul.f32 %v3925_v63, %v1110_v31  ;;  %v970_v63 = vsel %vm969_vm2, %v4471_v33, %v968_v52  ;;  %v4673_v11 = vpop.xlane.xlu1 %833  ;;  %v944_v43 = vmul.f32 %v943_v9, %v4491_v50  ;;  %v936_v34 = vand.u32 2147483648, %v4523_v14 }
  0xd4   : > { %v1096_v3 = vmul.f32 %v3931_v46, %v1095_v60  ;;  %v1083_v39 = vmul.f32 %v4652_v61, %v4592_v12  ;;  %v4675_v18 = vpop.eup %3934  ;;  %v4692_v38 = vsel %vm971_vm4, %v972_v4, %v970_v63  ;;  %3938 = vrsqrt.f32 %v4673_v11  ;;  %v4724_v52 = vpop.xlane.xlu0 %788 }
  0xd5   : > { %v1112_v58 = vmul.f32 %v1111_v62, %v4527_v25  ;;  %v4697_v41 = vpop.eup %3936  ;;  %3940 = vrcp.f32 %v4686_v30  ;;  %v4708_v33 = vsel %vm959_vm6, %v960_v19, %v958_v32  ;;  %vm933_vm13 = vcmp.eq.f32.partialorder %v4523_v14, inf  ;;  %v4745_v9 = vpop.xlane.xlu2 %785 }
  0xd6   : > { %v1097_v20 = vmul.f32 0.5, %v1096_v3  ;;  %v1084_v40 = vmul.f32 %v4652_v61, %v1083_v39  ;;  %v924_v4 = vand.u32 2147483648, %v4529_v26  ;;  %v903_v55 = vmul.f32 %v4697_v41, %v4603_v10 }
  0xd7   : > { %v1126_v2 = vsel %vm1125_vm7, %v4496_v54, %v1124_v22  ;;  %v1114_v31 = vsel %vm1113_vm9, %v4527_v25, %v1112_v58  ;;  %v931_v35 = vmul.f32 %v4594_v44, %v930_v24  ;;  %v918_v19 = vsub.f32 1.5, %v917_v27 }
  0xd8   : > { %v1098_v28 = vsub.f32 1.5, %v1097_v20  ;;  %vm1101_vm14 = vcmp.eq.f32.partialorder %v4579_v16, inf  ;;  %vm1103_vm15 = vcmp.eq.f32.partialorder %v4579_v16, 0.0  ;;  %v1085_v51 = vmul.f32 0.5, %v1084_v40 }
  0xd9   : > { %3942 = vrcp.f32 %v4699_v42  ;;  %v946_v56 = vsel %vm945_vm8, %v4491_v50, %v944_v43  ;;  %v1104_v60 = vand.u32 2147483648, %v4579_v16  ;;  %v1092_v44 = vand.u32 2147483648, %v4592_v12 }
  0xda   : > { %v1099_v45 = vmul.f32 %v3931_v46, %v1098_v28  ;;  %v904_v46 = vmul.f32 %v4697_v41, %v903_v55  ;;  %v3939_v15 = vpop.eup %3938  ;;  %v4736_v23 = vsel %vm1127_vm10, %v1128_v21, %v1126_v2  ;;  %v1117_v37 = vsel %vm1115_vm11, %v1116_v49, %v1114_v31 }
  0xdb   : > { %v3941_v17 = vpop.eup %3940  ;;  %v932_v3 = vmul.f32 %v931_v35, %v4523_v14  ;;  %v919_v39 = vmul.f32 %v4613_v29, %v918_v19  ;;  %v1071_v63 = vmul.f32 %v3939_v15, %v4673_v11  ;;  %3944 = vrsqrt.f32 %v4724_v52 }
  0xdc   : > { %v1100_v57 = vmul.f32 %v1099_v45, %v4579_v16  ;;  %v905_v62 = vmul.f32 0.5, %v904_v46  ;;  %v4749_v54 = vsel %vm947_vm12, %v948_v5, %v946_v56  ;;  %v1086_v25 = vsub.f32 1.5, %v1085_v51 }
  0xdd   : > { %v912_v21 = vand.u32 2147483648, %v4603_v10  ;;  %v1405_v20 = vmul.f32 %v3941_v17, %v4686_v30  ;;  %v4753_v32 = vmax.f32 %v1117_v37, 1e-12  ;;  %v1413_v36 = vand.u32 2147483647, %v4686_v30 }
  0xde   : > { %v1415_v29 = vand.u32 2147483648, %v4686_v30  ;;  %v1072_v22 = vmul.f32 %v3939_v15, %v1071_v63  ;;  %vm921_vm1 = vcmp.eq.f32.partialorder %v4529_v26, inf  ;;  %v1102_v50 = vsel %vm1101_vm14, %v4579_v16, %v1100_v57 }
  0xdf   : > { %v906_v5 = vsub.f32 1.5, %v905_v62  ;;  %v1406_v24 = vsub.f32 1.0, %v1405_v20  ;;  %3946 = vrsqrt.f32 %v4745_v9  ;;  %v4762_v58 = vpop.eup %3942  ;;  %v934_v27 = vsel %vm933_vm13, %v4523_v14, %v932_v3 }
  0xe0   : > { %v920_v28 = vmul.f32 %v919_v39, %v4529_v26  ;;  %vm1409_vm2 = vweird.f32 %v4686_v30  ;;  %v1073_v49 = vmul.f32 0.5, %v1072_v22  ;;  %vm935_vm3 = vcmp.eq.f32.partialorder %v4523_v14, 0.0 }
  0xe1   : > { %v1087_v40 = vmul.f32 %v4652_v61, %v1086_v25  ;;  %v1407_v43 = vmul.f32 %v3941_v17, %v1406_v24  ;;  %vm1410_vm4 = vweird.f32 %v3941_v17  ;;  %v1390_v45 = vmul.f32 %v4675_v18, %v4596_v13  ;;  %v4773_v55 = vpop.eup %3944 }
  0xe2   : > { %v1105_v2 = vsel %vm1103_vm15, %v1104_v60, %v1102_v50  ;;  %vm4777_vm5 = vcmp.eq.f32.partialorder %v1413_v36, 8.507059e+37  ;;  %v1416_v35 = vor.u32 1.1754944e-38, %v1415_v29  ;;  %v1074_v19 = vsub.f32 1.5, %v1073_v49  ;;  %vm1411_vm9 = vmor %vm1409_vm2, %vm1410_vm4 }
  0xe3   : > { %vm923_vm6 = vcmp.eq.f32.partialorder %v4529_v26, 0.0  ;;  %vm1089_vm7 = vcmp.eq.f32.partialorder %v4592_v12, inf  ;;  %v907_v61 = vmul.f32 %v4697_v41, %v906_v5  ;;  %v1408_v51 = vadd.f32 %v3941_v17, %v1407_v43 }
  0xe4   : > { %v891_v46 = vmul.f32 %v4773_v55, %v4724_v52  ;;  %v1391_v56 = vsub.f32 1.0, %v1390_v45  ;;  %vm909_vm8 = vcmp.eq.f32.partialorder %v4603_v10, inf  ;;  %v1075_v16 = vmul.f32 %v3939_v15, %v1074_v19 }
  0xe5   : > { %vm1395_vm10 = vweird.f32 %v4675_v18  ;;  %v1398_v60 = vand.u32 2147483647, %v4596_v13  ;;  %v1400_v37 = vand.u32 2147483648, %v4596_v13  ;;  %v4792_v57 = vpop.eup %3946  ;;  %v1412_v41 = vsel %vm1411_vm9, %v3941_v17, %v1408_v51 }
  0xe6   : > { %v892_v62 = vmul.f32 %v4773_v55, %v891_v46  ;;  %v1392_v3 = vmul.f32 %v4675_v18, %v1391_v56  ;;  %v4797_v39 = vmax.f32 %v4565_v53, 1e-12  ;;  %vm1091_vm11 = vcmp.eq.f32.partialorder %v4592_v12, 0.0 }
  0xe7   : > { %v1417_v30 = vsel %vm4777_vm5, %v1416_v35, %v1412_v41  ;;  %v1076_v15 = vmul.f32 %v1075_v16, %v4673_v11  ;;  %v879_v63 = vmul.f32 %v4792_v57, %v4745_v9  ;;  %vm1394_vm12 = vweird.f32 %v4596_v13  ;;  %v4859_v35 = vpop.xlane.xlu1 %782 }
  0xe8   : > { %vm911_vm13 = vcmp.eq.f32.partialorder %v4603_v10, 0.0  ;;  %v1418_v17 = vmul.f32 %v1417_v30, %v4383_v0  ;;  %v1393_v25 = vadd.f32 %v4675_v18, %v1392_v3  ;;  %3948 = vrcp.f32 %v4797_v39  ;;  %vm1396_vm14 = vmor %vm1394_vm12, %vm1395_vm10 }
  0xe9   : > { %v4811_v53 = vmax.f32 %v4625_v47, 1e-12  ;;  %v922_v20 = vsel %vm921_vm1, %v4529_v26, %v920_v28  ;;  %v1088_v36 = vmul.f32 %v1087_v40, %v4592_v12  ;;  %v880_v29 = vmul.f32 %v4792_v57, %v879_v63  ;;  %v4832_v28 = vpop.xlane.xlu0 %830  ;;  %v4854_v26 = vpop.xlane.xlu2 %827 }
  0xea   : > { %v1401_v13 = vor.u32 1.1754944e-38, %v1400_v37  ;;  %v908_v0 = vmul.f32 %v907_v61, %v4603_v10  ;;  %3697 = vmatpush.xpose.msk.msra.mxu0 %vm777_vm0, %v1418_v17  ;;  %1753 = vmatpush.msra.mxu2 %v1418_v17  ;;  %v893_v22 = vmul.f32 0.5, %v892_v62  ;;  %v1397_v47 = vsel %vm1396_vm14, %v4675_v18, %v1393_v25 }
  0xeb   : > { %vm1399_vm15 = vcmp.eq.f32.partialorder %v1398_v60, 8.507059e+37  ;;  %v4827_v50 = vsel %vm935_vm3, %v936_v34, %v934_v27  ;;  %v4829_v5 = vmax.f32 %v1105_v2, 1e-12  ;;  %vm1077_vm1 = vcmp.eq.f32.partialorder %v4673_v11, inf }
  0xec   : > { %v1402_v24 = vsel %vm1399_vm15, %v1401_v13, %v1397_v47  ;;  %v1078_v49 = vsel %vm1077_vm1, %v4673_v11, %v1076_v15  ;;  %v881_v40 = vmul.f32 0.5, %v880_v29  ;;  %3950 = vrcp.f32 %v4811_v53 }
  0xed   : > { %v1403_v43 = vmul.f32 %v1402_v24, %v4394_v6  ;;  %3952 = vrcp.f32 %v4753_v32  ;;  %v4842_v14 = vsel %vm923_vm6, %v924_v4, %v922_v20  ;;  %v1090_v18 = vsel %vm1089_vm7, %v4592_v12, %v1088_v36 }
  0xee   : > { %v1080_v34 = vand.u32 2147483648, %v4673_v11  ;;  %v3949_v27 = vpop.eup %3948  ;;  %v910_v6 = vsel %vm909_vm8, %v4603_v10, %v908_v0  ;;  %vm1079_vm2 = vcmp.eq.f32.partialorder %v4673_v11, 0.0  ;;  %v894_v45 = vsub.f32 1.5, %v893_v22 }
  0xef   : > { %3698 = vmatpush.xpose.msk.msra.mxu0 %vm777_vm0, %v1403_v43  ;;  %1754 = vmatpush.msra.mxu2 %v1403_v43  ;;  %3954 = vrsqrt.f32 %v4832_v28  ;;  %v1375_v2 = vmul.f32 %v3949_v27, %v4797_v39  ;;  %v1383_v31 = vand.u32 2147483647, %v4797_v39  ;;  %v4865_v11 = vsel %vm1091_vm11, %v1092_v44, %v1090_v18 }
  0xf0   : > { %3956 = vrcp.f32 %v4829_v5  ;;  %v1081_v4 = vsel %vm1079_vm2, %v1080_v34, %v1078_v49  ;;  %v900_v19 = vand.u32 2147483648, %v4724_v52  ;;  %v882_v61 = vsub.f32 1.5, %v881_v40 }
  0xf1   : > { %v1385_v51 = vand.u32 2147483648, %v4797_v39  ;;  %v4873_v46 = vsel %vm911_vm13, %v912_v21, %v910_v6  ;;  %vm897_vm3 = vcmp.eq.f32.partialorder %v4724_v52, inf  ;;  %v888_v56 = vand.u32 2147483648, %v4745_v9 }
  0xf2   : > { %v1376_v16 = vsub.f32 1.0, %v1375_v2  ;;  %3958 = vrsqrt.f32 %v4854_v26  ;;  %v3951_v12 = vpop.eup %3950  ;;  %v4878_v44 = vmax.f32 %v1081_v4, 1e-12  ;;  %v895_v60 = vmul.f32 %v4773_v55, %v894_v45 }
  0xf3   : > { %vm1379_vm4 = vweird.f32 %v4797_v39  ;;  %3960 = vrsqrt.f32 %v4859_v35  ;;  %v4883_v37 = vpop.eup %3952  ;;  %vm1380_vm5 = vweird.f32 %v3949_v27  ;;  %vm4885_vm6 = vcmp.eq.f32.partialorder %v1383_v31, 8.507059e+37 }
  0xf4   : > { %v1377_v10 = vmul.f32 %v3949_v27, %v1376_v16  ;;  %v1360_v41 = vmul.f32 %v3951_v12, %v4811_v53  ;;  %v883_v3 = vmul.f32 %v4792_v57, %v882_v61  ;;  %vm885_vm7 = vcmp.eq.f32.partialorder %v4745_v9, inf  ;;  %vm1381_vm10 = vmor %vm1379_vm4, %vm1380_vm5 }
  0xf5   : > { %v3955_v62 = vpop.eup %3954  ;;  %v1386_v55 = vor.u32 1.1754944e-38, %v1385_v51  ;;  %vm1364_vm8 = vweird.f32 %v4811_v53  ;;  %v1368_v30 = vand.u32 2147483647, %v4811_v53  ;;  %vm899_vm9 = vcmp.eq.f32.partialorder %v4724_v52, 0.0 }
  0xf6   : > { %v4894_v15 = vpop.eup %3956  ;;  %v1378_v63 = vadd.f32 %v3949_v27, %v1377_v10  ;;  %v1361_v17 = vsub.f32 1.0, %v1360_v41  ;;  %v1059_v25 = vmul.f32 %v3955_v62, %v4832_v28  ;;  %v4899_v20 = vmax.f32 %v4573_v59, 1e-12 }
  0xf7   : > { %v896_v57 = vmul.f32 %v895_v60, %v4724_v52  ;;  %vm1365_vm11 = vweird.f32 %v3951_v12  ;;  %v1370_v36 = vand.u32 2147483648, %v4811_v53  ;;  %v4907_v29 = vmax.f32 %v4665_v8, 1e-12 }
  0xf8   : > { %v3959_v13 = vpop.eup %3958  ;;  %vm887_vm12 = vcmp.eq.f32.partialorder %v4745_v9, 0.0  ;;  %v1382_v0 = vsel %vm1381_vm10, %v3949_v27, %v1378_v63  ;;  %v1362_v22 = vmul.f32 %v3951_v12, %v1361_v17  ;;  %v1060_v47 = vmul.f32 %v3955_v62, %v1059_v25  ;;  %vm1366_vm14 = vmor %vm1364_vm8, %vm1365_vm11 }
  0xf9   : > { %3962 = vrcp.f32 %v4899_v20  ;;  %v4911_v59 = vpop.eup %3960  ;;  %v884_v24 = vmul.f32 %v883_v3, %v4745_v9  ;;  %v1387_v39 = vsel %vm4885_vm6, %v1386_v55, %v1382_v0  ;;  %vm4916_vm13 = vcmp.eq.f32.partialorder %v1368_v30, 8.507059e+37 }
  0xfa   : > { %v1047_v8 = vmul.f32 %v3959_v13, %v4854_v26  ;;  %v1388_v40 = vmul.f32 %v1387_v39, %v4386_v1  ;;  %v1363_v43 = vadd.f32 %v3951_v12, %v1362_v22  ;;  %v1061_v18 = vmul.f32 0.5, %v1060_v47 }
  0xfb   : > { %v867_v34 = vmul.f32 %v4911_v59, %v4859_v35  ;;  %v898_v27 = vsel %vm897_vm3, %v4724_v52, %v896_v57  ;;  %v1371_v6 = vor.u32 1.1754944e-38, %v1370_v36  ;;  %3964 = vrcp.f32 %v4907_v29 }
  0xfc   : > { %v1048_v45 = vmul.f32 %v3959_v13, %v1047_v8  ;;  %1755 = vmatpush.msra.mxu2 %v1388_v40  ;;  %3699 = vmatpush.xpose.msk.msra.mxu0 %vm777_vm0, %v1388_v40  ;;  %v1367_v1 = vsel %vm1366_vm14, %v3951_v12, %v1363_v43  ;;  %v1062_v4 = vsub.f32 1.5, %v1061_v18  ;;  %v4934_v31 = vmax.f32 %v4637_v48, 1e-12 }
  0xfd   : > { %v868_v2 = vmul.f32 %v4911_v59, %v867_v34  ;;  %3966 = vrcp.f32 %v4878_v44  ;;  %v1372_v53 = vsel %vm4916_vm13, %v1371_v6, %v1367_v1  ;;  %vm1065_vm15 = vcmp.eq.f32.partialorder %v4832_v28, inf }
  0xfe   : > { %v1049_v61 = vmul.f32 0.5, %v1048_v45  ;;  %v886_v16 = vsel %vm885_vm7, %v4745_v9, %v884_v24  ;;  %v1373_v12 = vmul.f32 %v1372_v53, %v4397_v7  ;;  %v1063_v60 = vmul.f32 %v3955_v62, %v1062_v4  ;;  %v4112_v53 = vld [vmem:[%s4380_s5 + $0x58] sm:$0xff] }
  0xff   : > { %v3963_v51 = vpop.eup %3962  ;;  %v869_v10 = vmul.f32 0.5, %v868_v2  ;;  %v4948_v48 = vsel %vm899_vm9, %v900_v19, %v898_v27  ;;  %vm1067_vm1 = vcmp.eq.f32.partialorder %v4832_v28, 0.0  ;;  %v1068_v21 = vand.u32 2147483648, %v4832_v28 }
 0x100   : > { %v1345_v41 = vmul.f32 %v3963_v51, %v4899_v20  ;;  %v1353_v3 = vand.u32 2147483647, %v4899_v20  ;;  %1756 = vmatpush.msra.mxu2 %v1373_v12  ;;  %v1050_v55 = vsub.f32 1.5, %v1049_v61  ;;  %v1056_v7 = vand.u32 2147483648, %v4854_v26  ;;  %3700 = vmatpush.xpose.msk.msra.mxu0 %vm777_vm0, %v1373_v12 }
 0x101   : > { %v1355_v62 = vand.u32 2147483648, %v4899_v20  ;;  %3968 = vrcp.f32 %v4934_v31  ;;  %v3965_v52 = vpop.eup %3964  ;;  %v4962_v19 = vsel %vm887_vm12, %v888_v56, %v886_v16  ;;  %v1064_v30 = vmul.f32 %v1063_v60, %v4832_v28 }
 0x102   : > { %v870_v63 = vsub.f32 1.5, %v869_v10  ;;  %v1346_v17 = vsub.f32 1.0, %v1345_v41  ;;  %v876_v25 = vand.u32 2147483648, %v4859_v35  ;;  %vm1349_vm2 = vweird.f32 %v4899_v20 }
 0x103   : > { %v1540_v57 = vmul.f32 %v3965_v52, %v4907_v29  ;;  %v1548_v36 = vand.u32 2147483647, %v4907_v29  ;;  %v4969_v0 = vpop.eup %3966  ;;  %vm1350_vm3 = vweird.f32 %v3963_v51  ;;  %vm4971_vm4 = vcmp.eq.f32.partialorder %v1353_v3, 8.507059e+37 }
 0x104   : > { %v1347_v22 = vmul.f32 %v3963_v51, %v1346_v17  ;;  %v1550_v56 = vand.u32 2147483648, %v4907_v29  ;;  %vm1750_vm5 = vcmask 1043456   ;;  %v1051_v47 = vmul.f32 %v3959_v13, %v1050_v55  ;;  %vm1351_vm9 = vmor %vm1349_vm2, %vm1350_vm3 }
 0x105   : > { %vm1053_vm6 = vcmp.eq.f32.partialorder %v4854_v26, inf  ;;  %vm873_vm7 = vcmp.eq.f32.partialorder %v4859_v35, inf  ;;  %v1356_v24 = vor.u32 1.1754944e-38, %v1355_v62  ;;  %v1541_v39 = vsub.f32 1.0, %v1540_v57 }
 0x106   : > { %vm1544_vm8 = vweird.f32 %v4907_v29  ;;  %v1066_v49 = vsel %vm1065_vm15, %v4832_v28, %v1064_v30  ;;  %v871_v8 = vmul.f32 %v4911_v59, %v870_v63  ;;  %v1348_v40 = vadd.f32 %v3963_v51, %v1347_v22  ;;  %v5009_v28 = vpop.xlane.xlu0 %779  ;;  %v4113_v29 = vld [vmem:[%s4380_s5 + $0xc0] sm:$0xf] }
 0x107   : > { %v4984_v43 = vmax.f32 %v4692_v38, 1e-12  ;;  %v3969_v18 = vpop.eup %3968  ;;  %v1542_v13 = vmul.f32 %v3965_v52, %v1541_v39  ;;  %vm1545_vm10 = vweird.f32 %v3965_v52  ;;  %vm4989_vm11 = vcmp.eq.f32.partialorder %v1548_v36, 8.507059e+37 }
 0x108   : > { %v4994_v27 = vmax.f32 %v4708_v33, 1e-12  ;;  %v1352_v59 = vsel %vm1351_vm9, %v3963_v51, %v1348_v40  ;;  %v1551_v6 = vor.u32 1.1754944e-38, %v1550_v56  ;;  %v1330_v38 = vmul.f32 %v3969_v18, %v4934_v31  ;;  %vm1546_vm12 = vmor %vm1544_vm8, %vm1545_vm10 }
 0x109   : > { %v1338_v45 = vand.u32 2147483647, %v4934_v31  ;;  %v1069_v20 = vsel %vm1067_vm1, %v1068_v21, %v1066_v49  ;;  %v1357_v1 = vsel %vm4971_vm4, %v1356_v24, %v1352_v59  ;;  %v1543_v4 = vadd.f32 %v3965_v52, %v1542_v13  ;;  %v4114_v13 = vld [vmem:[%s4380_s5 + $0x50] sm:$0xff] }
 0x10a   : > { %3970 = vrcp.f32 %v4984_v43  ;;  %v1052_v2 = vmul.f32 %v1051_v47, %v4854_v26  ;;  %v872_v33 = vmul.f32 %v871_v8, %v4859_v35  ;;  %v1358_v61 = vmul.f32 %v4112_v53, %v1357_v1 }
 0x10b   : > { %v1331_v51 = vsub.f32 1.0, %v1330_v38  ;;  %v1547_v16 = vsel %vm1546_vm12, %v3965_v52, %v1543_v4  ;;  %vm1335_vm13 = vweird.f32 %v3969_v18  ;;  %v1340_v12 = vand.u32 2147483648, %v4934_v31 }
 0x10c   : > { %3972 = vrcp.f32 %v4994_v27  ;;  %1757 = vmatpush.msra.mxu2 %v1358_v61  ;;  %v1552_v60 = vsel %vm4989_vm11, %v1551_v6, %v1547_v16  ;;  %v1323_v21 = vand.u32 2147483647, %v4984_v43  ;;  %v1325_v41 = vand.u32 2147483648, %v4984_v43  ;;  %3701 = vmatpush.xpose.msk.msra.mxu0 %vm777_vm0, %v1358_v61 }
 0x10d   : > { %v1332_v10 = vmul.f32 %v3969_v18, %v1331_v51  ;;  %v1553_v3 = vmul.f32 %v4113_v29, %v1552_v60  ;;  %vm1334_vm14 = vweird.f32 %v4934_v31  ;;  %vm5020_vm15 = vcmp.eq.f32.partialorder %v1338_v45, 8.507059e+37 }
 0x10e   : > { %3974 = vrsqrt.f32 %v5009_v28  ;;  %vm1529_vm1 = vweird.f32 %v4699_v42  ;;  %v5026_v62 = vmax.f32 %v1069_v20, 1e-12  ;;  %v5031_v52 = vsel %vm1053_vm6, %v4854_v26, %v1052_v2  ;;  %vm1336_vm2 = vmor %vm1334_vm14, %vm1335_vm13 }
 0x10f   : > { %v5036_v30 = vsel %vm873_vm7, %v4859_v35, %v872_v33  ;;  %v1333_v31 = vadd.f32 %v3969_v18, %v1332_v10  ;;  %3715 = vmatpush.xpose.msk.msra.mxu1 %vm777_vm0, %v1553_v3  ;;  %v1341_v17 = vor.u32 1.1754944e-38, %v1340_v12  ;;  %3726 = vmatpush.msk.msra.mxu3 %vm1750_vm5, %v1553_v3  ;;  %vm1319_vm3 = vweird.f32 %v4984_v43 }
 0x110   : > { %v3971_v63 = vpop.eup %3970  ;;  %v1308_v57 = vand.u32 2147483647, %v4994_v27  ;;  %v1525_v36 = vmul.f32 %v4762_v58, %v4699_v42  ;;  %vm5046_vm4 = vcmp.eq.f32.partialorder %v1323_v21, 8.507059e+37  ;;  %v1326_v47 = vor.u32 1.1754944e-38, %v1325_v41 }
 0x111   : > { %v1337_v22 = vsel %vm1336_vm2, %v3969_v18, %v1333_v31  ;;  %v1315_v9 = vmul.f32 %v3971_v63, %v4984_v43  ;;  %vm1304_vm6 = vweird.f32 %v4994_v27  ;;  %v1310_v24 = vand.u32 2147483648, %v4994_v27  ;;  %v4115_v31 = vld [vmem:[%s4380_s5 + $0xb8] sm:$0xff] }
 0x112   : > { %v3973_v39 = vpop.eup %3972  ;;  %v1342_v49 = vsel %vm5020_vm15, %v1341_v17, %v1337_v22  ;;  %v1526_v8 = vsub.f32 1.0, %v1525_v36  ;;  %v1533_v40 = vand.u32 2147483647, %v4699_v42  ;;  %v5056_v18 = vmax.f32 %v4749_v54, 1e-12 }
 0x113   : > { %v1343_v34 = vmul.f32 %v4114_v13, %v1342_v49  ;;  %v1316_v59 = vsub.f32 1.0, %v1315_v9  ;;  %v1300_v6 = vmul.f32 %v3973_v39, %v4994_v27  ;;  %v1535_v38 = vand.u32 2147483648, %v4699_v42 }
 0x114   : > { %v3975_v45 = vpop.eup %3974  ;;  %vm5061_vm5 = vcmp.eq.f32.partialorder %v1308_v57, 8.507059e+37  ;;  %v1527_v1 = vmul.f32 %v4762_v58, %v1526_v8  ;;  %vm1530_vm7 = vweird.f32 %v4762_v58  ;;  %3976 = vrcp.f32 %v5056_v18  ;;  %v4116_v57 = vld [vmem:[%s4380_s5 + $0x48] sm:$0xff] }
 0x115   : > { %1758 = vmatpush.msra.mxu2 %v1343_v34  ;;  %v1317_v54 = vmul.f32 %v3971_v63, %v1316_v59  ;;  %vm1320_vm8 = vweird.f32 %v3971_v63  ;;  %v1301_v4 = vsub.f32 1.0, %v1300_v6  ;;  %v855_v2 = vmul.f32 %v3975_v45, %v5009_v28  ;;  %3702 = vmatpush.xpose.msk.msra.mxu0 %vm777_vm0, %v1343_v34  ;;  %vm1531_vm11 = vmor %vm1529_vm1, %vm1530_vm7 }
 0x116   : > { %vm1305_vm9 = vweird.f32 %v3973_v39  ;;  %v1528_v33 = vadd.f32 %v4762_v58, %v1527_v1  ;;  %vm5071_vm10 = vcmp.eq.f32.partialorder %v1533_v40, 8.507059e+37  ;;  %v5076_v61 = vmax.f32 %v4736_v23, 1e-12  ;;  %vm1321_vm12 = vmor %vm1319_vm3, %vm1320_vm8 }
 0x117   : > { %v1318_v51 = vadd.f32 %v3971_v63, %v1317_v54  ;;  %v1302_v16 = vmul.f32 %v3973_v39, %v1301_v4  ;;  %v856_v12 = vmul.f32 %v3975_v45, %v855_v2  ;;  %v1536_v60 = vor.u32 1.1754944e-38, %v1535_v38  ;;  %vm1306_vm15 = vmor %vm1304_vm6, %vm1305_vm9 }
 0x118   : > { %vm861_vm13 = vcmp.eq.f32.partialorder %v5009_v28, inf  ;;  %v1532_v10 = vsel %vm1531_vm11, %v4762_v58, %v1528_v33  ;;  %v1293_v23 = vand.u32 2147483647, %v5056_v18  ;;  %3978 = vrcp.f32 %v5076_v61 }
 0x119   : > { %v1495_v21 = vmul.f32 %v4883_v37, %v4753_v32  ;;  %v1322_v41 = vsel %vm1321_vm12, %v3971_v63, %v1318_v51  ;;  %v1303_v42 = vadd.f32 %v3973_v39, %v1302_v16  ;;  %v857_v29 = vmul.f32 0.5, %v856_v12 }
 0x11a   : > { %vm863_vm14 = vcmp.eq.f32.partialorder %v5009_v28, 0.0  ;;  %v1537_v43 = vsel %vm5071_vm10, %v1536_v60, %v1532_v10  ;;  %v3977_v3 = vpop.eup %3976  ;;  %v1327_v58 = vsel %vm5046_vm4, %v1326_v47, %v1322_v41  ;;  %v1311_v55 = vor.u32 1.1754944e-38, %v1310_v24  ;;  %v4117_v24 = vld [vmem:[%s4380_s5 + $0x40] sm:$0xff] }
 0x11b   : > { %v1538_v17 = vmul.f32 %v4115_v31, %v1537_v43  ;;  %v1295_v63 = vand.u32 2147483648, %v5056_v18  ;;  %v1328_v36 = vmul.f32 %v4116_v57, %v1327_v58  ;;  %v1307_v22 = vsel %vm1306_vm15, %v3973_v39, %v1303_v42 }
 0x11c   : > { %v858_v9 = vsub.f32 1.5, %v857_v29  ;;  %v1285_v49 = vmul.f32 %v3977_v3, %v5056_v18  ;;  %v1312_v56 = vsel %vm5061_vm5, %v1311_v55, %v1307_v22  ;;  %v864_v47 = vand.u32 2147483648, %v5009_v28 }
 0x11d   : > { %3716 = vmatpush.xpose.msk.msra.mxu1 %vm777_vm0, %v1538_v17  ;;  %vm1289_vm1 = vweird.f32 %v5056_v18  ;;  %vm5107_vm2 = vcmp.eq.f32.partialorder %v1293_v23, 8.507059e+37  ;;  %1784 = vmatpush.msra.mxu3 %v1538_v17  ;;  %v1313_v39 = vmul.f32 %v4117_v24, %v1312_v56  ;;  %v1496_v13 = vsub.f32 1.0, %v1495_v21 }
 0x11e   : > { %1759 = vmatpush.msra.mxu2 %v1328_v36  ;;  %v859_v8 = vmul.f32 %v3975_v45, %v858_v9  ;;  %v1286_v40 = vsub.f32 1.0, %v1285_v49  ;;  %3703 = vmatpush.xpose.msk.msra.mxu0 %vm777_vm0, %v1328_v36  ;;  %v3979_v34 = vpop.eup %3978  ;;  %vm1055_vm3 = vcmp.eq.f32.partialorder %v4854_v26, 0.0  ;;  %vm1290_vm4 = vweird.f32 %v3977_v3 }
 0x11f   : > { %v1296_v59 = vor.u32 1.1754944e-38, %v1295_v63  ;;  %vm1514_vm6 = vweird.f32 %v5076_v61  ;;  %v1520_v6 = vand.u32 2147483648, %v5076_v61  ;;  %vm875_vm5 = vcmp.eq.f32.partialorder %v4859_v35, 0.0  ;;  %vm1291_vm9 = vmor %vm1289_vm1, %vm1290_vm4  ;;  %v4120_v63 = vld [vmem:[%s4380_s5 + $0xa8] sm:$0xff] }
 0x120   : > { %1760 = vmatpush.msra.mxu2 %v1313_v39  ;;  %v860_v38 = vmul.f32 %v859_v8, %v5009_v28  ;;  %v1287_v20 = vmul.f32 %v3977_v3, %v1286_v40  ;;  %v1510_v45 = vmul.f32 %v3979_v34, %v5076_v61  ;;  %vm1499_vm7 = vweird.f32 %v4753_v32 }
 0x121   : > { %v1497_v1 = vmul.f32 %v4883_v37, %v1496_v13  ;;  %vm1500_vm8 = vweird.f32 %v4883_v37  ;;  %v1505_v54 = vand.u32 2147483648, %v4753_v32  ;;  %v5124_v4 = vmax.f32 %v4827_v50, 1e-12 }
 0x122   : > { %v862_v2 = vsel %vm861_vm13, %v5009_v28, %v860_v38  ;;  %v1288_v33 = vadd.f32 %v3977_v3, %v1287_v20  ;;  %v1511_v53 = vsub.f32 1.0, %v1510_v45  ;;  %3704 = vmatpush.xpose.msk.msra.mxu0 %vm777_vm0, %v1313_v39  ;;  %v1503_v51 = vand.u32 2147483647, %v4753_v32  ;;  %vm1501_vm11 = vmor %vm1499_vm7, %vm1500_vm8 }
 0x123   : > { %v865_v16 = vsel %vm863_vm14, %v864_v47, %v862_v2  ;;  %v1498_v50 = vadd.f32 %v4883_v37, %v1497_v1  ;;  %3980 = vrcp.f32 %v5124_v4  ;;  %v5139_v12 = vmax.f32 %v4842_v14, 1e-12  ;;  %v4118_v14 = vld [vmem:[%s4380_s5 + $0x38] sm:$0xff] }
 0x124   : > { %v1292_v60 = vsel %vm1291_vm9, %v3977_v3, %v1288_v33  ;;  %v1512_v10 = vmul.f32 %v3979_v34, %v1511_v53  ;;  %vm1515_vm10 = vweird.f32 %v3979_v34  ;;  %v1518_v23 = vand.u32 2147483647, %v5076_v61 }
 0x125   : > { %v1297_v28 = vsel %vm5107_vm2, %v1296_v59, %v1292_v60  ;;  %v1521_v18 = vor.u32 1.1754944e-38, %v1520_v6  ;;  %v1502_v21 = vsel %vm1501_vm11, %v4883_v37, %v1498_v50  ;;  %v1506_v41 = vor.u32 1.1754944e-38, %v1505_v54  ;;  %vm1516_vm13 = vmor %vm1514_vm6, %vm1515_vm10  ;;  %v4122_v60 = vld [vmem:[%s4380_s5 + $0x30] sm:$0xff] }
 0x126   : > { %v5149_v42 = vmax.f32 %v865_v16, 1e-12  ;;  %v1298_v29 = vmul.f32 %v4118_v14, %v1297_v28  ;;  %v1513_v43 = vadd.f32 %v3979_v34, %v1512_v10  ;;  %vm1504_vm12 = vcmp.eq.f32.partialorder %v1503_v51, 8.507059e+37  ;;  %v4121_v51 = vld [vmem:[%s4380_s5 + $0xa0] sm:$0xff] }
 0x127   : > { %v1507_v3 = vsel %vm1504_vm12, %v1506_v41, %v1502_v21  ;;  %v1278_v32 = vand.u32 2147483647, %v5124_v4  ;;  %v1280_v58 = vand.u32 2147483648, %v5124_v4  ;;  %3982 = vrcp.f32 %v5139_v12 }
 0x128   : > { %3984 = vrcp.f32 %v5026_v62  ;;  %v5163_v37 = vsel %vm1055_vm3, %v1056_v7, %v5031_v52  ;;  %1761 = vmatpush.msra.mxu2 %v1298_v29  ;;  %v1517_v61 = vsel %vm1516_vm13, %v3979_v34, %v1513_v43  ;;  %vm1519_vm14 = vcmp.eq.f32.partialorder %v1518_v23, 8.507059e+37  ;;  %3705 = vmatpush.xpose.msk.msra.mxu0 %vm777_vm0, %v1298_v29  ;;  %v4119_v7 = vld [vmem:[%s4380_s5 + $0xb0] sm:$0xff] }
 0x129   : > { %v3981_v55 = vpop.eup %3980  ;;  %v5171_v31 = vsel %vm875_vm5, %v876_v25, %v5036_v30  ;;  %v1522_v17 = vsel %vm1519_vm14, %v1521_v18, %v1517_v61  ;;  %vm1274_vm15 = vweird.f32 %v5124_v4  ;;  %v1480_v26 = vmul.f32 %v4894_v15, %v4829_v5 }
 0x12a   : > { %3986 = vrcp.f32 %v5149_v42  ;;  %v1523_v52 = vmul.f32 %v4119_v7, %v1522_v17  ;;  %v1508_v57 = vmul.f32 %v4120_v63, %v1507_v3  ;;  %v1270_v36 = vmul.f32 %v3981_v55, %v5124_v4  ;;  %v4123_v17 = vld [vmem:[%s4380_s5 + $0x28] sm:$0xff] }
 0x12b   : > { %vm5180_vm1 = vcmp.eq.f32.partialorder %v1278_v32, 8.507059e+37  ;;  %v1281_v35 = vor.u32 1.1754944e-38, %v1280_v58  ;;  %v1263_v25 = vand.u32 2147483647, %v5139_v12  ;;  %v1481_v30 = vsub.f32 1.0, %v1480_v26 }
 0x12c   : > { %1785 = vmatpush.msra.mxu3 %v1523_v52  ;;  %3717 = vmatpush.xpose.msk.msra.mxu1 %vm777_vm0, %v1523_v52  ;;  %v1271_v9 = vsub.f32 1.0, %v1270_v36  ;;  %v1490_v49 = vand.u32 2147483648, %v4829_v5  ;;  %v5188_v56 = vmax.f32 %v4873_v46, 1e-12  ;;  %v5191_v47 = vmax.f32 %v4865_v11, 1e-12 }
 0x12d   : > { %v3983_v27 = vpop.eup %3982  ;;  %v1265_v24 = vand.u32 2147483648, %v5139_v12  ;;  %v1482_v39 = vmul.f32 %v4894_v15, %v1481_v30  ;;  %vm1485_vm2 = vweird.f32 %v4894_v15  ;;  %v1488_v8 = vand.u32 2147483647, %v4829_v5 }
 0x12e   : > { %v5197_v40 = vpop.eup %3984  ;;  %v1272_v13 = vmul.f32 %v3981_v55, %v1271_v9  ;;  %vm1275_vm3 = vweird.f32 %v3981_v55  ;;  %1786 = vmatpush.msra.mxu3 %v1508_v57  ;;  %v1255_v46 = vmul.f32 %v3983_v27, %v5139_v12  ;;  %3988 = vrcp.f32 %v5188_v56 }
 0x12f   : > { %vm1259_vm4 = vweird.f32 %v5139_v12  ;;  %v1483_v11 = vadd.f32 %v4894_v15, %v1482_v39  ;;  %vm1484_vm6 = vweird.f32 %v4829_v5  ;;  %v1450_v34 = vmul.f32 %v4969_v0, %v4878_v44  ;;  %vm1276_vm7 = vmor %vm1274_vm15, %vm1275_vm3 }
 0x130   : > { %v5206_v59 = vpop.eup %3986  ;;  %3718 = vmatpush.xpose.msk.msra.mxu1 %vm777_vm0, %v1508_v57  ;;  %v1273_v6 = vadd.f32 %v3981_v55, %v1272_v13  ;;  %v1256_v38 = vsub.f32 1.0, %v1255_v46  ;;  %vm1486_vm5 = vmor %vm1484_vm6, %vm1485_vm2  ;;  %v1491_v20 = vor.u32 1.1754944e-38, %v1490_v49  ;;  %3990 = vrcp.f32 %v5191_v47  ;;  %v4125_v13 = vld [vmem:[%s4380_s5 + $0x20] sm:$0xff] }
 0x131   : > { %vm5215_vm8 = vcmp.eq.f32.partialorder %v1263_v25, 8.507059e+37  ;;  %v1266_v45 = vor.u32 1.1754944e-38, %v1265_v24  ;;  %v1487_v1 = vsel %vm1486_vm5, %v4894_v15, %v1483_v11  ;;  %vm1489_vm9 = vcmp.eq.f32.partialorder %v1488_v8, 8.507059e+37 }
 0x132   : > { %v1277_v54 = vsel %vm1276_vm7, %v3981_v55, %v1273_v6  ;;  %v1257_v2 = vmul.f32 %v3983_v27, %v1256_v38  ;;  %vm1260_vm10 = vweird.f32 %v3983_v27  ;;  %v1492_v33 = vsel %vm1489_vm9, %v1491_v20, %v1487_v1  ;;  %v4126_v1 = vld [vmem:[%s4380_s5 + $0x98] sm:$0xff] }
 0x133   : > { %v1282_v53 = vsel %vm5180_vm1, %v1281_v35, %v1277_v54  ;;  %v1493_v16 = vmul.f32 %v4121_v51, %v1492_v33  ;;  %v1451_v4 = vsub.f32 1.0, %v1450_v34  ;;  %vm1454_vm11 = vweird.f32 %v4878_v44  ;;  %vm1261_vm12 = vmor %vm1259_vm4, %vm1260_vm10 }
 0x134   : > { %v3989_v50 = vpop.eup %3988  ;;  %v1283_v10 = vmul.f32 %v4122_v60, %v1282_v53  ;;  %v1258_v23 = vadd.f32 %v3983_v27, %v1257_v2  ;;  %v1248_v28 = vand.u32 2147483647, %v5188_v56  ;;  %v1250_v15 = vand.u32 2147483648, %v5188_v56 }
 0x135   : > { %3719 = vmatpush.xpose.msk.msra.mxu1 %vm777_vm0, %v1493_v16  ;;  %v1240_v18 = vmul.f32 %v3989_v50, %v5188_v56  ;;  %1787 = vmatpush.msra.mxu3 %v1493_v16  ;;  %v1452_v21 = vmul.f32 %v4969_v0, %v1451_v4  ;;  %vm1455_vm13 = vweird.f32 %v4969_v0  ;;  %v1458_v41 = vand.u32 2147483647, %v4878_v44 }
 0x136   : > { %v3991_v14 = vpop.eup %3990  ;;  %1762 = vmatpush.msra.mxu2 %v1283_v10  ;;  %v1262_v29 = vsel %vm1261_vm12, %v3983_v27, %v1258_v23  ;;  %3706 = vmatpush.xpose.msk.msra.mxu0 %vm777_vm0, %v1283_v10  ;;  %v1460_v12 = vand.u32 2147483648, %v4878_v44  ;;  %v5237_v43 = vmax.f32 %v4948_v48, 1e-12  ;;  %v5240_v3 = vmax.f32 %v4962_v19, 1e-12  ;;  %vm1456_vm15 = vmor %vm1454_vm11, %vm1455_vm13  ;;  %v4124_v27 = vld [vmem:[%s4380_s5 + $0x90] sm:$0xff] }
 0x137   : > { %v1267_v32 = vsel %vm5215_vm8, %v1266_v45, %v1262_v29  ;;  %v1241_v58 = vsub.f32 1.0, %v1240_v18  ;;  %v1465_v61 = vmul.f32 %v3991_v14, %v5191_v47  ;;  %v1473_v55 = vand.u32 2147483647, %v5191_v47 }
 0x138   : > { %v1268_v26 = vmul.f32 %v4123_v17, %v1267_v32  ;;  %vm1245_vm14 = vweird.f32 %v3989_v50  ;;  %v1475_v7 = vand.u32 2147483648, %v5191_v47  ;;  %v1453_v52 = vadd.f32 %v4969_v0, %v1452_v21 }
 0x139   : > { %v1242_v48 = vmul.f32 %v3989_v50, %v1241_v58  ;;  %v1466_v63 = vsub.f32 1.0, %v1465_v61  ;;  %v1461_v19 = vor.u32 1.1754944e-38, %v1460_v12  ;;  %3992 = vrcp.f32 %v5237_v43 }
 0x13a   : > { %1763 = vmatpush.msra.mxu2 %v1268_v26  ;;  %vm1244_vm1 = vweird.f32 %v5188_v56  ;;  %3707 = vmatpush.xpose.msk.msra.mxu0 %vm777_vm0, %v1268_v26  ;;  %v1457_v57 = vsel %vm1456_vm15, %v4969_v0, %v1453_v52  ;;  %vm1459_vm2 = vcmp.eq.f32.partialorder %v1458_v41, 8.507059e+37  ;;  %3994 = vrcp.f32 %v5240_v3 }
 0x13b   : > { %v1243_v36 = vadd.f32 %v3989_v50, %v1242_v48  ;;  %v1467_v22 = vmul.f32 %v3991_v14, %v1466_v63  ;;  %vm1470_vm3 = vweird.f32 %v3991_v14  ;;  %v1462_v35 = vsel %vm1459_vm2, %v1461_v19, %v1457_v57  ;;  %vm1246_vm4 = vmor %vm1244_vm1, %vm1245_vm14  ;;  %v4129_v48 = vld [vmem:[%s4380_s5 + $0x10] sm:$0xff] }
 0x13c   : > { %vm1249_vm6 = vcmp.eq.f32.partialorder %v1248_v28, 8.507059e+37  ;;  %v1251_v44 = vor.u32 1.1754944e-38, %v1250_v15  ;;  %vm1469_vm5 = vweird.f32 %v5191_v47  ;;  %vm5260_vm7 = vcmp.eq.f32.partialorder %v1473_v55, 8.507059e+37  ;;  %v4128_v55 = vld [vmem:[%s4380_s5 + $0x18] sm:$0xff] }
 0x13d   : > { %v1247_v0 = vsel %vm1246_vm4, %v3989_v50, %v1243_v36  ;;  %v1468_v30 = vadd.f32 %v3991_v14, %v1467_v22  ;;  %v1476_v9 = vor.u32 1.1754944e-38, %v1475_v7  ;;  %v1435_v49 = vmul.f32 %v5197_v40, %v5026_v62  ;;  %vm1471_vm8 = vmor %vm1469_vm5, %vm1470_vm3 }
 0x13e   : > { %v1252_v56 = vsel %vm1249_vm6, %v1251_v44, %v1247_v0  ;;  %v1463_v24 = vmul.f32 %v4124_v27, %v1462_v35  ;;  %v1233_v39 = vand.u32 2147483647, %v5237_v43  ;;  %v1235_v8 = vand.u32 2147483648, %v5237_v43 }
 0x13f   : > { %v3993_v47 = vpop.eup %3992  ;;  %v1253_v46 = vmul.f32 %v4125_v13, %v1252_v56  ;;  %v1472_v11 = vsel %vm1471_vm8, %v3991_v14, %v1468_v30  ;;  %v1218_v34 = vand.u32 2147483647, %v5240_v3  ;;  %v1436_v6 = vsub.f32 1.0, %v1435_v49  ;;  %v4127_v14 = vld [vmem:[%s4380_s5 + $0x88] sm:$0xff] }
 0x140   : > { %v3995_v38 = vpop.eup %3994  ;;  %v1477_v20 = vsel %vm5260_vm7, %v1476_v9, %v1472_v11  ;;  %v1225_v5 = vmul.f32 %v3993_v47, %v5237_v43  ;;  %v1220_v45 = vand.u32 2147483648, %v5240_v3  ;;  %vm1440_vm9 = vweird.f32 %v5197_v40 }
 0x141   : > { %1764 = vmatpush.msra.mxu2 %v1253_v46  ;;  %v1478_v54 = vmul.f32 %v4126_v1, %v1477_v20  ;;  %3708 = vmatpush.xpose.msk.msra.mxu0 %vm777_vm0, %v1253_v46  ;;  %v1210_v2 = vmul.f32 %v3995_v38, %v5240_v3  ;;  %v1437_v33 = vmul.f32 %v5197_v40, %v1436_v6  ;;  %v1443_v53 = vand.u32 2147483647, %v5026_v62  ;;  %v4132_v1 = vld [vmem:[%s4380_s5 + $0x80] sm:$0xff] }
 0x142   : > { %v1226_v51 = vsub.f32 1.0, %v1225_v5  ;;  %vm1439_vm10 = vweird.f32 %v5026_v62  ;;  %v1445_v16 = vand.u32 2147483648, %v5026_v62  ;;  %v5284_v4 = vmax.f32 %v5171_v31, 1e-12  ;;  %v4131_v5 = vld [vmem:[%s4380_s5] sm:$0xff] }
 0x143   : > { %1788 = vmatpush.msra.mxu3 %v1478_v54  ;;  %3720 = vmatpush.xpose.msk.msra.mxu1 %vm777_vm0, %v1478_v54  ;;  %vm1230_vm11 = vweird.f32 %v3993_v47  ;;  %v1211_v50 = vsub.f32 1.0, %v1210_v2  ;;  %v1438_v60 = vadd.f32 %v5197_v40, %v1437_v33  ;;  %v5289_v10 = vmax.f32 %v5163_v37, 1e-12  ;;  %vm1441_vm12 = vmor %vm1439_vm10, %vm1440_vm9  ;;  %v1554_v2 = vld [vmem:[%s5988_s0] sm:$0xff]  ;;  %v1555_v33 = vld [vmem:[%s5988_s0 + $0x8] sm:$0xff]  ;;  %s3819_s0 = sshll.u32 %s4345_s4, 4 }
 0x144   : > { %v1227_v23 = vmul.f32 %v3993_v47, %v1226_v51  ;;  %v1446_v28 = vor.u32 1.1754944e-38, %v1445_v16  ;;  %3996 = vrcp.f32 %v5284_v4  ;;  %v1180_v62 = vmul.f32 %v5206_v59, %v5149_v42 }
 0x145   : > { %1789 = vmatpush.msra.mxu3 %v1463_v24  ;;  %v1212_v31 = vmul.f32 %v3995_v38, %v1211_v50  ;;  %vm1215_vm13 = vweird.f32 %v3995_v38  ;;  %v1442_v15 = vsel %vm1441_vm12, %v5197_v40, %v1438_v60  ;;  %vm1444_vm14 = vcmp.eq.f32.partialorder %v1443_v53, 8.507059e+37 }
 0x146   : > { %v1228_v18 = vadd.f32 %v3993_v47, %v1227_v23  ;;  %vm1229_vm15 = vweird.f32 %v5237_v43  ;;  %v1447_v37 = vsel %vm1444_vm14, %v1446_v28, %v1442_v15  ;;  %3998 = vrcp.f32 %v5289_v10 }
 0x147   : > { %3721 = vmatpush.xpose.msk.msra.mxu1 %vm777_vm0, %v1463_v24  ;;  %vm1231_vm1 = vmor %vm1229_vm15, %vm1230_vm11  ;;  %v1236_v21 = vor.u32 1.1754944e-38, %v1235_v8  ;;  %v1213_v41 = vadd.f32 %v3995_v38, %v1212_v31  ;;  %vm1214_vm2 = vweird.f32 %v5240_v3  ;;  %v1448_v29 = vmul.f32 %v4127_v14, %v1447_v37 }
 0x148   : > { %v1232_v12 = vsel %vm1231_vm1, %v3993_v47, %v1228_v18  ;;  %vm1234_vm3 = vcmp.eq.f32.partialorder %v1233_v39, 8.507059e+37  ;;  %vm1216_vm4 = vmor %vm1214_vm2, %vm1215_vm13  ;;  %v1221_v40 = vor.u32 1.1754944e-38, %v1220_v45  ;;  %v1181_v43 = vsub.f32 1.0, %v1180_v62 }
 0x149   : > { %v1237_v32 = vsel %vm1234_vm3, %v1236_v21, %v1232_v12  ;;  %v1217_v58 = vsel %vm1216_vm4, %v3995_v38, %v1213_v41  ;;  %vm1219_vm6 = vcmp.eq.f32.partialorder %v1218_v34, 8.507059e+37  ;;  %1790 = vmatpush.msra.mxu3 %v1448_v29  ;;  %vm1185_vm5 = vweird.f32 %v5206_v59 }
 0x14a   : > { %v3997_v61 = vpop.eup %3996  ;;  %v1238_v17 = vmul.f32 %v4128_v55, %v1237_v32  ;;  %v1222_v26 = vsel %vm1219_vm6, %v1221_v40, %v1217_v58  ;;  %v1182_v7 = vmul.f32 %v5206_v59, %v1181_v43  ;;  %v1190_v22 = vand.u32 2147483648, %v5149_v42 }
 0x14b   : > { %3722 = vmatpush.xpose.msk.msra.mxu1 %vm777_vm0, %v1448_v29  ;;  %v1195_v3 = vmul.f32 %v3997_v61, %v5284_v4  ;;  %v1223_v63 = vmul.f32 %v4129_v48, %v1222_v26  ;;  %v1205_v35 = vand.u32 2147483648, %v5284_v4  ;;  %vm1184_vm7 = vweird.f32 %v5149_v42 }
 0x14c   : > { %v3999_v52 = vpop.eup %3998  ;;  %1765 = vmatpush.msra.mxu2 %v1238_v17  ;;  %3709 = vmatpush.xpose.msk.msra.mxu0 %vm777_vm0, %v1238_v17  ;;  %v1183_v36 = vadd.f32 %v5206_v59, %v1182_v7  ;;  %v1188_v44 = vand.u32 2147483647, %v5149_v42  ;;  %vm1200_vm8 = vweird.f32 %v3997_v61  ;;  %v1203_v0 = vand.u32 2147483647, %v5284_v4  ;;  %vm5318_vm9 = vmor %vm1184_vm7, %vm1185_vm5 }
 0x14d   : > { %v1196_v19 = vsub.f32 1.0, %v1195_v3  ;;  %v1420_v57 = vmul.f32 %v3999_v52, %v5289_v10  ;;  %vm1199_vm10 = vweird.f32 %v5284_v4  ;;  %v1428_v49 = vand.u32 2147483647, %v5289_v10 }
 0x14e   : > { %1766 = vmatpush.msra.mxu2 %v1223_v63  ;;  %v1430_v56 = vand.u32 2147483648, %v5289_v10  ;;  %v1187_v42 = vsel %vm5318_vm9, %v5206_v59, %v1183_v36  ;;  %vm1425_vm11 = vweird.f32 %v3999_v52  ;;  %v1191_v39 = vor.u32 1.1754944e-38, %v1190_v22  ;;  %vm1201_vm12 = vmor %vm1199_vm10, %vm1200_vm8  ;;  %v4130_v59 = vld [vmem:[%s4380_s5 + $0x8] sm:$0xff]  ;;  %s3692_s5 = sshll.u32 %s5925_s24, 4  ;;  %s4202_s24 = smov 88  }
 0x14f   : > { %v1197_v25 = vmul.f32 %v3997_v61, %v1196_v19  ;;  %v1421_v30 = vsub.f32 1.0, %v1420_v57  ;;  %v1206_v8 = vor.u32 1.1754944e-38, %v1205_v35  ;;  %vm1424_vm13 = vweird.f32 %v5289_v10  ;;  %s5365_s2 = scalar_lea.vmem [#allocation2], %s3692_s5  ;;  %s5992_s5 = sld [smem:[#allocation13_spill]] }
 0x150   : > { %3710 = vmatpush.xpose.msk.msra.mxu0 %vm777_vm0, %v1223_v63  ;;  %vm1189_vm14 = vcmp.eq.f32.partialorder %v1188_v44, 8.507059e+37  ;;  %vm1204_vm15 = vcmp.eq.f32.partialorder %v1203_v0, 8.507059e+37  ;;  %vm1426_vm1 = vmor %vm1424_vm13, %vm1425_vm11  ;;  %v1431_v34 = vor.u32 1.1754944e-38, %v1430_v56  ;;  %vm1429_vm2 = vcmp.eq.f32.partialorder %v1428_v49, 8.507059e+37 }
 0x151   : > { %v1198_v27 = vadd.f32 %v3997_v61, %v1197_v25  ;;  %v1422_v24 = vmul.f32 %v3999_v52, %v1421_v30  ;;  %v1192_v46 = vsel %vm1189_vm14, %v1191_v39, %v1187_v42  ;;  %vm1683_vm3 = vcmask 556032  }
 0x152   : > { %v1193_v45 = vmul.f32 %v4131_v5, %v1192_v46 }
 0x153   : > { %v1202_v47 = vsel %vm1201_vm12, %v3997_v61, %v1198_v27  ;;  %v1423_v13 = vadd.f32 %v3999_v52, %v1422_v24 }
 0x154   : > { %v1207_v11 = vsel %vm1204_vm15, %v1206_v8, %v1202_v47 }
 0x155   : > { %v1208_v6 = vmul.f32 %v4130_v59, %v1207_v11  ;;  %v1427_v38 = vsel %vm1426_vm1, %v3999_v52, %v1423_v13  ;;  %s719_s6 = scalar_lea.vmem %s5992_s5, %s3818_s27  ;;  %s4201_s27 = smov 112  }
 0x156   : > { %v1432_v20 = vsel %vm1429_vm2, %v1431_v34, %v1427_v38  ;;  %s4203_s5 = smov 72  }
 0x157   : > { %1767 = vmatpush.msra.mxu2 %v1208_v6  ;;  %v1433_v54 = vmul.f32 %v4132_v1, %v1432_v20  ;;  %3711 = vmatpush.xpose.msk.msra.mxu0 %vm777_vm0, %v1208_v6 }
 0x159   : > { %1791 = vmatpush.msra.mxu3 %v1433_v54  ;;  %3723 = vmatpush.xpose.msk.msra.mxu1 %vm777_vm0, %v1433_v54 }
 0x15a   : > { %1768 = vmatpush.msra.mxu2 %v1193_v45 }
 0x15b   : > { %3712 = vmatpush.xpose.msk.msra.mxu0 %vm777_vm0, %v1193_v45 }
 0x15c   : > { %3724 = vmatmul.msk.f32.vlgmr.msra.gmra.mxu1 %vm777_vm0, %v1554_v2 }
 0x15e   : > { %3713 = vmatmul.msk.f32.vlgmr.msra.gmra.mxu0 %vm777_vm0, %v1554_v2 }
 0x164   : > { %3725 = vmatmul.msk.f32.gmra.mxu1 %vm777_vm0, %v1555_v33 }
 0x166   : > { %3714 = vmatmul.msk.f32.gmra.mxu0 %vm777_vm0, %v1555_v33 }
 0x1d9   : > { %v1677_v53 = vpop.f32.mrf.mxu1 }
 0x1da   : > { %v1684_v51 = vsel %vm1683_vm3, %v1677_v53, -inf }
 0x1db   : > { %v1654_v16 = vpop.f32.mrf.mxu0 }
 0x1dc   : > { %v1685_v4 = vmax.f32 %v1654_v16, %v1684_v51 }
 0x1de   : > { %1686 = vmax.xlane.f32.xlu1 %v1685_v4 }
 0x1e1   : > { %v1680_v50 = vpop.f32.mrf.mxu1 }
 0x1e2   : > { %v1688_v60 = vsel %vm1683_vm3, %v1680_v50, -inf }
 0x1e3   : > { %v1657_v10 = vpop.f32.mrf.mxu0 }
 0x1e4   : > { %v1689_v23 = vmax.f32 %v1657_v10, %v1688_v60 }
 0x1e6   : > { %1690 = vmax.xlane.f32.xlu2 %v1689_v23 }
 0x251   : > { %v1687_v28 = vpop.xlane.xlu1 %1686 }
 0x252   : > { %v1692_v62 = vsub.f32 %v1654_v16, %v1687_v28  ;;  %v1693_v31 = vsub.f32 %v1677_v53, %v1687_v28 }
 0x254   : > { %v1696_v15 = vmul.f32 1.442695, %v1692_v62  ;;  %v1698_v18 = vmul.f32 1.442695, %v1693_v31 }
 0x256   : > { %4000 = vpow2.f32 %v1696_v15 }
 0x257   : > { %4002 = vpow2.f32 %v1698_v18 }
 0x259   : > { %v1691_v37 = vpop.xlane.xlu2 %1690 }
 0x25a   : > { %v1694_v21 = vsub.f32 %v1657_v10, %v1691_v37  ;;  %v1695_v41 = vsub.f32 %v1680_v50, %v1691_v37 }
 0x25c   : > { %v4001_v14 = vpop.eup %4000  ;;  %v1700_v29 = vmul.f32 1.442695, %v1694_v21  ;;  %v1702_v12 = vmul.f32 1.442695, %v1695_v41 }
 0x25d   : > { %v4003_v40 = vpop.eup %4002 }
 0x25e   : > { %4004 = vpow2.f32 %v1700_v29  ;;  %v1704_v43 = vsel %vm1683_vm3, %v4003_v40, 0.0 }
 0x25f   : > { %4006 = vpow2.f32 %v1702_v12  ;;  %v1705_v32 = vadd.f32 %v4001_v14, %v1704_v43 }
 0x261   : > { %1706 = vadd.xlane.f32.xlu0 %v1705_v32 }
 0x264   : > { %v4005_v58 = vpop.eup %4004 }
 0x265   : > { %v4007_v61 = vpop.eup %4006 }
 0x266   : > { %v1708_v55 = vsel %vm1683_vm3, %v4007_v61, 0.0 }
 0x267   : > { %v1709_v17 = vadd.f32 %v4005_v58, %v1708_v55 }
 0x269   : > { %1710 = vadd.xlane.f32.xlu1 %v1709_v17 }
 0x2d4   : > { %v1707_v26 = vpop.xlane.xlu0 %1706 }
 0x2d5   : > { %4008 = vrcp.f32 %v1707_v26  ;;  %v1723_v63 = vand.u32 2147483648, %v1707_v26  ;;  %v1721_v57 = vand.u32 2147483647, %v1707_v26  ;;  %vm1717_vm6 = vweird.f32 %v1707_v26 }
 0x2d7   : > { %v1724_v35 = vor.u32 1.1754944e-38, %v1723_v63  ;;  %vm1722_vm7 = vcmp.eq.f32.partialorder %v1721_v57, 8.507059e+37 }
 0x2db   : > { %v4009_v3 = vpop.eup %4008 }
 0x2dc   : > { %v1713_v7 = vmul.f32 %v4009_v3, %v1707_v26  ;;  %v1711_v52 = vpop.xlane.xlu1 %1710  ;;  %vm1718_vm4 = vweird.f32 %v4009_v3 }
 0x2dd   : > { %4010 = vrcp.f32 %v1711_v52  ;;  %vm1719_vm5 = vmor %vm1717_vm6, %vm1718_vm4  ;;  %v1739_v56 = vand.u32 2147483648, %v1711_v52  ;;  %v1737_v27 = vand.u32 2147483647, %v1711_v52  ;;  %vm1733_vm9 = vweird.f32 %v1711_v52 }
 0x2de   : > { %v1714_v48 = vsub.f32 1.0, %v1713_v7 }
 0x2df   : > { %v1740_v39 = vor.u32 1.1754944e-38, %v1739_v56  ;;  %vm1738_vm11 = vcmp.eq.f32.partialorder %v1737_v27, 8.507059e+37 }
 0x2e0   : > { %v1715_v19 = vmul.f32 %v4009_v3, %v1714_v48 }
 0x2e2   : > { %v1716_v36 = vadd.f32 %v4009_v3, %v1715_v19 }
 0x2e3   : > { %v4011_v22 = vpop.eup %4010 }
 0x2e4   : > { %v1729_v44 = vmul.f32 %v4011_v22, %v1711_v52  ;;  %v1720_v25 = vsel %vm1719_vm5, %v4009_v3, %v1716_v36  ;;  %vm1734_vm8 = vweird.f32 %v4011_v22 }
 0x2e5   : > { %v1725_v0 = vsel %vm1722_vm7, %v1724_v35, %v1720_v25  ;;  %vm1735_vm10 = vmor %vm1733_vm9, %vm1734_vm8 }
 0x2e6   : > { %v1730_v30 = vsub.f32 1.0, %v1729_v44  ;;  %v1726_v9 = vmul.f32 %v4001_v14, %v1725_v0  ;;  %v1727_v49 = vmul.f32 %v4003_v40, %v1725_v0 }
 0x2e8   : > { %v1731_v42 = vmul.f32 %v4011_v22, %v1730_v30  ;;  %1769 = vmatmul.f32.vlgmr.msra.gmra.mxu2 %v1726_v9  ;;  %3727 = vmatmul.msk.f32.vlgmr.msra.gmra.mxu3 %vm1683_vm3, %v1727_v49 }
 0x2ea   : > { %v1732_v24 = vadd.f32 %v4011_v22, %v1731_v42 }
 0x2ec   : > { %v1736_v8 = vsel %vm1735_vm10, %v4011_v22, %v1732_v24  ;;  %v4197_v24 = vmov 32.0  }
 0x2ed   : > { %v1741_v47 = vsel %vm1738_vm11, %v1740_v39, %v1736_v8 }
 0x2ee   : > { %v1742_v13 = vmul.f32 %v4005_v58, %v1741_v47  ;;  %v1743_v46 = vmul.f32 %v4007_v61, %v1741_v47 }
 0x2f0   : > { %1772 = vmatmul.f32.gmra.mxu2 %v1742_v13  ;;  %3728 = vmatmul.msk.f32.gmra.mxu3 %vm1683_vm3, %v1743_v46 }
 0x36b   : > { %v1770_v11 = vpop.f32.mrf.mxu2  ;;  %v1793_v34 = vpop.f32.mrf.mxu3 }
 0x36c   : > { %v1794_v59 = vadd.f32 %v1793_v34, %v1770_v11 }
 0x36e   : > { %v1799_v6 = vmul.f32 %v1794_v59, %v1794_v59 }
 0x370   : > { %v1801_v38 = vsel %vm777_vm0, %v1799_v6, 0.0 }
 0x371   : > { %1802 = vadd.xlane.f32.xlu2 %v1801_v38 }
 0x373   : > { %v1773_v20 = vpop.f32.mrf.mxu2  ;;  %v1796_v5 = vpop.f32.mrf.mxu3 }
 0x374   : > { %v5353_v45 = vadd.f32 %v1796_v5, %v1773_v20 }
 0x376   : > { %v1800_v1 = vmul.f32 %v5353_v45, %v5353_v45 }
 0x378   : > { %v1804_v54 = vsel %vm777_vm0, %v1800_v1, 0.0 }
 0x379   : > { %1805 = vadd.xlane.f32.xlu0 %v1804_v54 }
 0x3e4   : > { %v1803_v2 = vpop.xlane.xlu2 %1802 }
 0x3e5   : > { %4012 = vrsqrt.f32 %v1803_v2  ;;  %vm1814_vm12 = vcmp.eq.f32.partialorder %v1803_v2, inf  ;;  %v1817_v31 = vand.u32 2147483648, %v1803_v2  ;;  %vm1816_vm13 = vcmp.eq.f32.partialorder %v1803_v2, 0.0 }
 0x3eb   : > { %v4013_v33 = vpop.eup %4012 }
 0x3ec   : > { %v1808_v53 = vmul.f32 %v4013_v33, %v1803_v2  ;;  %v1806_v51 = vpop.xlane.xlu0 %1805 }
 0x3ed   : > { %4014 = vrsqrt.f32 %v1806_v51  ;;  %vm1826_vm14 = vcmp.eq.f32.partialorder %v1806_v51, inf  ;;  %v1829_v12 = vand.u32 2147483648, %v1806_v51  ;;  %vm1828_vm15 = vcmp.eq.f32.partialorder %v1806_v51, 0.0 }
 0x3ee   : > { %v1809_v16 = vmul.f32 %v4013_v33, %v1808_v53  ;;  %v1961_v53 = vld [vmem:[%s5989_s7 + $0x10] sm:$0xff] }
 0x3f0   : > { %v1810_v4 = vmul.f32 0.5, %v1809_v16  ;;  %v1874_v16 = vld [vmem:[%s5990_s3 + $0x18] sm:$0xff] }
 0x3f1   : > { %1897 = vmatpush.msrb.mxu3 %v1874_v16 }
 0x3f2   : > { %v1811_v50 = vsub.f32 1.5, %v1810_v4  ;;  %v1959_v4 = vld [vmem:[%s5989_s7] sm:$0xff] }
 0x3f3   : > { %v4015_v60 = vpop.eup %4014 }
 0x3f4   : > { %v1812_v10 = vmul.f32 %v4013_v33, %v1811_v50  ;;  %v1820_v23 = vmul.f32 %v4015_v60, %v1806_v51  ;;  %v1962_v33 = vld [vmem:[%s5989_s7 + $0x18] sm:$0xff] }
 0x3f5   : > { %1985 = vmatpush.msrb.mxu2 %v1962_v33 }
 0x3f6   : > { %v1813_v28 = vmul.f32 %v1812_v10, %v1803_v2  ;;  %v1821_v62 = vmul.f32 %v4015_v60, %v1820_v23  ;;  %v1873_v10 = vld [vmem:[%s5991_s20 + $0x10] sm:$0xff]  ;;  %v1872_v23 = vld [vmem:[%s5991_s20 + $0x8] sm:$0xff] }
 0x3f7   : > { %1986 = vmatpush.msrb.mxu2 %v1961_v53  ;;  %1898 = vmatpush.msrb.mxu3 %v1873_v10 }
 0x3f8   : > { %v1815_v15 = vsel %vm1814_vm12, %v1803_v2, %v1813_v28  ;;  %v1822_v18 = vmul.f32 0.5, %v1821_v62  ;;  %v1865_v28 = vld [vmem:[%s5993_s25] sm:$0xff] }
 0x3f9   : > { %v1818_v37 = vsel %vm1816_vm13, %v1817_v31, %v1815_v15  ;;  %v1867_v62 = vld [vmem:[%s719_s6] sm:$0xff]  ;;  %1899 = vmatpush.msrb.mxu3 %v1872_v23 }
 0x3fa   : > { %v1831_v21 = vmax.f32 %v1818_v37, 1e-12  ;;  %v1823_v41 = vsub.f32 1.5, %v1822_v18  ;;  %v1871_v15 = vld [vmem:[%s5991_s20] sm:$0xff]  ;;  %v1869_v18 = vmul.f32 %v1867_v62, %v1865_v28 }
 0x3fb   : > { %1900 = vmatpush.msrb.mxu3 %v1871_v15 }
 0x3fc   : > { %4016 = vrcp.f32 %v1831_v21  ;;  %v1824_v14 = vmul.f32 %v4015_v60, %v1823_v41  ;;  %v1844_v17 = vand.u32 2147483648, %v1831_v21  ;;  %v1842_v3 = vand.u32 2147483647, %v1831_v21  ;;  %3729 = vmatmul.msk.f32.vlgmr.msrb.gmra.mxu3 %vm777_vm0, %v1869_v18  ;;  %v1868_v41 = vld [vmem:[%s719_s6 + $0x8] sm:$0xff]  ;;  %s4204_s6 = smov 80  }
 0x3fd   : > { %vm1838_vm2 = vweird.f32 %v1831_v21 }
 0x3fe   : > { %v1825_v29 = vmul.f32 %v1824_v14, %v1806_v51  ;;  %v1845_v48 = vor.u32 1.1754944e-38, %v1844_v17  ;;  %vm1843_vm4 = vcmp.eq.f32.partialorder %v1842_v3, 8.507059e+37 }
 0x400   : > { %v1827_v40 = vsel %vm1826_vm14, %v1806_v51, %v1825_v29  ;;  %v1960_v51 = vld [vmem:[%s5989_s7 + $0x8] sm:$0xff] }
 0x401   : > { %v1830_v43 = vsel %vm1828_vm15, %v1829_v12, %v1827_v40  ;;  %1987 = vmatpush.msrb.mxu2 %v1960_v51 }
 0x402   : > { %v4017_v32 = vpop.eup %4016  ;;  %v1832_v58 = vmax.f32 %v1830_v43, 1e-12 }
 0x403   : > { %v1834_v61 = vmul.f32 %v4017_v32, %v1831_v21  ;;  %vm1839_vm1 = vweird.f32 %v4017_v32  ;;  %1988 = vmatpush.msrb.mxu2 %v1959_v4  ;;  %v1866_v21 = vld [vmem:[%s5993_s25 + $0x8] sm:$0xff] }
 0x404   : > { %4018 = vrcp.f32 %v1832_v58  ;;  %vm1840_vm3 = vmor %vm1838_vm2, %vm1839_vm1  ;;  %v1859_v35 = vand.u32 2147483648, %v1832_v58  ;;  %v1857_v0 = vand.u32 2147483647, %v1832_v58  ;;  %vm1853_vm5 = vweird.f32 %v1832_v58 }
 0x405   : > { %v1835_v55 = vsub.f32 1.0, %v1834_v61  ;;  %4020 = vrcp.f32 %v4197_v24  ;;  %v1870_v40 = vmul.f32 %v1868_v41, %v1866_v21  ;;  %vm1996_vm1 = vcmask 64512  }
 0x406   : > { %v1860_v9 = vor.u32 1.1754944e-38, %v1859_v35  ;;  %vm1858_vm8 = vcmp.eq.f32.partialorder %v1857_v0, 8.507059e+37 }
 0x407   : > { %v1836_v26 = vmul.f32 %v4017_v32, %v1835_v55  ;;  %3730 = vmatmul.msk.f32.gmra.mxu3 %vm777_vm0, %v1870_v40 }
 0x409   : > { %v1837_v7 = vadd.f32 %v4017_v32, %v1836_v26 }
 0x40a   : > { %v4019_v52 = vpop.eup %4018 }
 0x40b   : > { %v1841_v63 = vsel %vm1840_vm3, %v4017_v32, %v1837_v7  ;;  %v1849_v19 = vmul.f32 %v4019_v52, %v1832_v58  ;;  %vm1854_vm6 = vweird.f32 %v4019_v52  ;;  %v4021_v39 = vpop.eup %4020 }
 0x40c   : > { %v1846_v57 = vsel %vm1843_vm4, %v1845_v48, %v1841_v63  ;;  %vm1855_vm7 = vmor %vm1853_vm5, %vm1854_vm6  ;;  %v1915_v8 = vmul.f32 32.0, %v4021_v39  ;;  %vm1919_vm9 = vweird.f32 %v4021_v39 }
 0x40d   : > { %v5361_v36 = vmul.f32 %v1846_v57, %v1794_v59  ;;  %v1850_v22 = vsub.f32 1.0, %v1849_v19 }
 0x40e   : > { %v1916_v47 = vsub.f32 1.0, %v1915_v8 }
 0x40f   : > { %v1908_v44 = vsel %vm777_vm0, %v5361_v36, 0.0  ;;  %v1851_v25 = vmul.f32 %v4019_v52, %v1850_v22  ;;  %1863 = vst.msk [vmem:[%s5365_s2] sm:$0xff] %vm777_vm0, %v5361_v36 }
 0x410   : > { %1909 = vadd.xlane.f32.xlu1 %v1908_v44  ;;  %v1917_v13 = vmul.f32 %v4021_v39, %v1916_v47  ;;  %v3892_v44 = vld [vmem:[%s5994_s8] ss:$0 sm:$0xff] }
 0x411   : > { %v1852_v30 = vadd.f32 %v4019_v52, %v1851_v25 }
 0x412   : > { %v1918_v46 = vadd.f32 %v4021_v39, %v1917_v13 }
 0x413   : > { %v1856_v49 = vsel %vm1855_vm7, %v4019_v52, %v1852_v30 }
 0x414   : > { %v1861_v56 = vsel %vm1858_vm8, %v1860_v9, %v1856_v49  ;;  %v5378_v11 = vsel %vm1919_vm9, %v4021_v39, %v1918_v46  ;;  %v3893_v9 = vld [vmem:[%s5995_s23] ss:$0 sm:$0xff]  ;;  %s5998_s23 = sld [smem:[#allocation14_spill]] }
 0x415   : > { %v5371_v42 = vmul.f32 %v1861_v56, %v5353_v45 }
 0x417   : > { %v1911_v27 = vsel %vm777_vm0, %v5371_v42, 0.0  ;;  %1864 = vst.msk [vmem:[%s5365_s2 + $0x8] sm:$0xff] %vm777_vm0, %v5371_v42 }
 0x418   : > { %1912 = vadd.xlane.f32.xlu2 %v1911_v27 }
 0x47f   : > { %v1902_v30 = vpop.f32.mrf.mxu3 }
 0x480   : > { %v5440_v56 = vadd.f32 %v3893_v9, %v1902_v30 }
 0x483   : > { %v1910_v34 = vpop.xlane.xlu1 %1909 }
 0x484   : > { %v1921_v59 = vmul.f32 %v5378_v11, %v1910_v34 }
 0x486   : > { %v1923_v6 = vsub.f32 %v5361_v36, %v1921_v59 }
 0x488   : > { %v1925_v38 = vmul.f32 %v1923_v6, %v1923_v6 }
 0x48a   : > { %v1927_v20 = vsel %vm777_vm0, %v1925_v38, 0.0  ;;  %v1905_v27 = vpop.f32.mrf.mxu3 }
 0x48b   : > { %1928 = vadd.xlane.f32.xlu0 %v1927_v20  ;;  %v1913_v5 = vpop.xlane.xlu2 %1912  ;;  %v5446_v24 = vadd.f32 %v3893_v9, %v1905_v27 }
 0x48c   : > { %v1922_v45 = vmul.f32 %v5378_v11, %v1913_v5 }
 0x48e   : > { %v1924_v1 = vsub.f32 %v5371_v42, %v1922_v45 }
 0x490   : > { %v1926_v54 = vmul.f32 %v1924_v1, %v1924_v1 }
 0x492   : > { %v1930_v2 = vsel %vm777_vm0, %v1926_v54, 0.0 }
 0x493   : > { %1931 = vadd.xlane.f32.xlu1 %v1930_v2 }
 0x4fe   : > { %v1929_v50 = vpop.xlane.xlu0 %1928 }
 0x4ff   : > { %v1933_v60 = vmul.f32 %v1929_v50, %v5378_v11 }
 0x501   : > { %v1935_v31 = vadd.f32 1e-05, %v1933_v60 }
 0x503   : > { %4022 = vrsqrt.f32 %v1935_v31  ;;  %vm1943_vm11 = vweird.f32 %v1935_v31 }
 0x506   : > { %v1932_v37 = vpop.xlane.xlu1 %1931 }
 0x507   : > { %v1934_v14 = vmul.f32 %v1932_v37, %v5378_v11 }
 0x509   : > { %v4023_v29 = vpop.eup %4022  ;;  %v1936_v12 = vadd.f32 1e-05, %v1934_v14 }
 0x50a   : > { %v1938_v43 = vmul.f32 %v4023_v29, %v1935_v31  ;;  %vm1944_vm10 = vweird.f32 %v4023_v29 }
 0x50b   : > { %4024 = vrsqrt.f32 %v1936_v12  ;;  %vm1945_vm12 = vmor %vm1943_vm11, %vm1944_vm10  ;;  %vm1953_vm14 = vweird.f32 %v1936_v12  ;;  %vm2114_vm11 = vcmask 130048  }
 0x50c   : > { %v1939_v32 = vmul.f32 %v4023_v29, %v1938_v43 }
 0x50e   : > { %v1940_v58 = vmul.f32 0.5, %v1939_v32 }
 0x510   : > { %v1941_v61 = vsub.f32 1.5, %v1940_v58 }
 0x511   : > { %v4025_v55 = vpop.eup %4024 }
 0x512   : > { %v1942_v17 = vmul.f32 %v4023_v29, %v1941_v61  ;;  %v1948_v26 = vmul.f32 %v4025_v55, %v1936_v12  ;;  %vm1954_vm13 = vweird.f32 %v4025_v55 }
 0x513   : > { %vm1955_vm15 = vmor %vm1953_vm14, %vm1954_vm13 }
 0x514   : > { %v1949_v3 = vmul.f32 %v4025_v55, %v1948_v26  ;;  %v1946_v7 = vsel %vm1945_vm12, %v4023_v29, %v1942_v17 }
 0x515   : > { %v1957_v52 = vmul.f32 %v1946_v7, %v1923_v6 }
 0x516   : > { %v1950_v48 = vmul.f32 0.5, %v1949_v3 }
 0x517   : > { %3731 = vmatmul.msk.f32.vlgmr.msrb.gmra.mxu2 %vm777_vm0, %v1957_v52 }
 0x518   : > { %v1951_v63 = vsub.f32 1.5, %v1950_v48 }
 0x51a   : > { %v1952_v19 = vmul.f32 %v4025_v55, %v1951_v63 }
 0x51c   : > { %v1956_v57 = vsel %vm1955_vm15, %v4025_v55, %v1952_v19 }
 0x51d   : > { %v1958_v22 = vmul.f32 %v1956_v57, %v1924_v1 }
 0x51f   : > { %3732 = vmatmul.msk.f32.gmra.mxu2 %vm777_vm0, %v1958_v22 }
 0x59a   : > { %v1990_v35 = vpop.f32.mrf.mxu2 }
 0x59b   : > { %v5438_v49 = vadd.f32 %v3892_v44, %v1990_v35 }
 0x5a2   : > { %v1993_v25 = vpop.f32.mrf.mxu2 }
 0x5a3   : > { %v5429_v0 = vadd.f32 %v3892_v44, %v1993_v25 }
 0x5a5   : > { %2204 = vrot.lane.b32.xlu1 %v5429_v0, %s4198_s21  ;;  %3733 = vmatpush.xpose.msk.msra.mxu3 %vm1996_vm1, %v5429_v0 }
 0x5a9   : > { %3734 = vmatpush.xpose.msk.msra.mxu3 %vm1996_vm1, %v5438_v49 }
 0x5ac   : > { %3735 = vmatmul.msk.f32.vlgmr.msra.gmra.mxu3 %vm1996_vm1, %v5440_v56 }
 0x5b4   : > { %3736 = vmatmul.msk.f32.gmra.mxu3 %vm1996_vm1, %v5446_v24 }
 0x617   : > { %v2205_v39 = vpop.permute.xlu1 %2204 }
 0x618   : > { %3743 = vmatpush.xpose.msk.msra.mxu2 %vm1996_vm1, %v2205_v39 }
 0x62f   : > { %v5451_v8 = vpop.f32.mrf.mxu3 }
 0x630   : > { %v5454_v47 = vmul.f32 0.70710677, %v5451_v8 }
 0x632   : > { %v2036_v13 = vand.u32 2147483647, %v5454_v47  ;;  %vm2102_vm10 = vcmp.ge.f32.partialorder %v5454_v47, 0.0 }
 0x634   : > { %v2038_v46 = vmul.f32 0.3275911, %v2036_v13  ;;  %v2090_v60 = vsub.f32 0.0, %v2036_v13 }
 0x636   : > { %v2040_v34 = vadd.f32 1.0, %v2038_v46  ;;  %v2092_v18 = vmul.f32 %v2090_v60, %v2036_v13  ;;  %v2032_v46 = vmul.f32 0.5, %v5451_v8 }
 0x637   : > { %v5457_v59 = vpop.f32.mrf.mxu3 }
 0x638   : > { %4026 = vrcp.f32 %v2040_v34  ;;  %v5460_v6 = vmul.f32 0.70710677, %v5457_v59  ;;  %v2053_v2 = vand.u32 2147483648, %v2040_v34  ;;  %v2051_v53 = vand.u32 2147483647, %v2040_v34 }
 0x639   : > { %vm2047_vm3 = vweird.f32 %v2040_v34  ;;  %v2094_v40 = vmul.f32 1.442695, %v2092_v18  ;;  %v2033_v47 = vmul.f32 0.5, %v5457_v59 }
 0x63a   : > { %v2037_v38 = vand.u32 2147483647, %v5460_v6  ;;  %v2054_v16 = vor.u32 1.1754944e-38, %v2053_v2  ;;  %vm2052_vm6 = vcmp.eq.f32.partialorder %v2051_v53, 8.507059e+37  ;;  %vm2103_vm12 = vcmp.ge.f32.partialorder %v5460_v6, 0.0 }
 0x63b   : > { %v5477_v6 = vpack.i.bf16 %v5438_v49, %v5429_v0 }
 0x63c   : > { %v2039_v20 = vmul.f32 0.3275911, %v2037_v38  ;;  %v2091_v32 = vsub.f32 0.0, %v2037_v38 }
 0x63e   : > { %v4027_v5 = vpop.eup %4026  ;;  %v2041_v1 = vadd.f32 1.0, %v2039_v20  ;;  %v2093_v3 = vmul.f32 %v2091_v32, %v2037_v38 }
 0x63f   : > { %v2043_v45 = vmul.f32 %v4027_v5, %v2040_v34  ;;  %vm2048_vm2 = vweird.f32 %v4027_v5 }
 0x640   : > { %4028 = vrcp.f32 %v2041_v1  ;;  %vm2049_vm4 = vmor %vm2047_vm3, %vm2048_vm2  ;;  %v2068_v31 = vand.u32 2147483648, %v2041_v1  ;;  %v2066_v21 = vand.u32 2147483647, %v2041_v1  ;;  %vm2062_vm7 = vweird.f32 %v2041_v1 }
 0x641   : > { %v2044_v54 = vsub.f32 1.0, %v2043_v45  ;;  %4030 = vpow2.f32 %v2094_v40  ;;  %v2096_v19 = vmul.f32 1.442695, %v2093_v3 }
 0x642   : > { %v2069_v29 = vor.u32 1.1754944e-38, %v2068_v31  ;;  %vm2067_vm9 = vcmp.eq.f32.partialorder %v2066_v21, 8.507059e+37 }
 0x643   : > { %v2045_v33 = vmul.f32 %v4027_v5, %v2044_v54  ;;  %4032 = vpow2.f32 %v2096_v19 }
 0x645   : > { %v2046_v51 = vadd.f32 %v4027_v5, %v2045_v33 }
 0x646   : > { %v4029_v4 = vpop.eup %4028 }
 0x647   : > { %v2050_v50 = vsel %vm2049_vm4, %v4027_v5, %v2046_v51  ;;  %v2058_v10 = vmul.f32 %v4029_v4, %v2041_v1  ;;  %vm2063_vm5 = vweird.f32 %v4029_v4  ;;  %v4031_v22 = vpop.eup %4030 }
 0x648   : > { %v2055_v23 = vsel %vm2052_vm6, %v2054_v16, %v2050_v50  ;;  %vm2064_vm8 = vmor %vm2062_vm7, %vm2063_vm5 }
 0x649   : > { %v2072_v28 = vmul.f32 1.0614054, %v2055_v23  ;;  %v2059_v62 = vsub.f32 1.0, %v2058_v10  ;;  %v4033_v20 = vpop.eup %4032 }
 0x64b   : > { %v3737_v15 = vadd.f32 -1.4531521, %v2072_v28  ;;  %v2060_v37 = vmul.f32 %v4029_v4, %v2059_v62 }
 0x64d   : > { %v2076_v41 = vmul.f32 %v3737_v15, %v2055_v23  ;;  %v2061_v14 = vadd.f32 %v4029_v4, %v2060_v37 }
 0x64f   : > { %v2078_v12 = vadd.f32 1.4214138, %v2076_v41  ;;  %v2065_v43 = vsel %vm2064_vm8, %v4029_v4, %v2061_v14 }
 0x650   : > { %v2070_v61 = vsel %vm2067_vm9, %v2069_v29, %v2065_v43 }
 0x651   : > { %v2080_v58 = vmul.f32 %v2078_v12, %v2055_v23  ;;  %v2073_v55 = vmul.f32 1.0614054, %v2070_v61 }
 0x653   : > { %v3739_v17 = vadd.f32 -0.28449672, %v2080_v58  ;;  %v3738_v26 = vadd.f32 -1.4531521, %v2073_v55 }
 0x655   : > { %v2084_v7 = vmul.f32 %v3739_v17, %v2055_v23  ;;  %v2077_v52 = vmul.f32 %v3738_v26, %v2070_v61 }
 0x657   : > { %v2086_v48 = vadd.f32 0.2548296, %v2084_v7  ;;  %v2079_v63 = vadd.f32 1.4214138, %v2077_v52 }
 0x659   : > { %v2088_v57 = vmul.f32 %v2086_v48, %v2055_v23  ;;  %v2081_v35 = vmul.f32 %v2079_v63, %v2070_v61 }
 0x65b   : > { %v2098_v44 = vmul.f32 %v4031_v22, %v2088_v57  ;;  %v3740_v25 = vadd.f32 -0.28449672, %v2081_v35 }
 0x65d   : > { %v2100_v30 = vsub.f32 1.0, %v2098_v44  ;;  %v2085_v9 = vmul.f32 %v3740_v25, %v2070_v61 }
 0x65f   : > { %v2104_v27 = vsub.f32 0.0, %v2100_v30  ;;  %v2087_v39 = vadd.f32 0.2548296, %v2085_v9 }
 0x661   : > { %v2106_v13 = vsel %vm2102_vm10, %v2100_v30, %v2104_v27  ;;  %v2089_v38 = vmul.f32 %v2087_v39, %v2070_v61 }
 0x662   : > { %v2108_v34 = vadd.f32 1.0, %v2106_v13 }
 0x663   : > { %v2099_v45 = vmul.f32 %v4033_v20, %v2089_v38 }
 0x664   : > { %v2110_v5 = vmul.f32 %v2108_v34, %v2032_v46 }
 0x665   : > { %v2101_v54 = vsub.f32 1.0, %v2099_v45 }
 0x666   : > { %v2112_v1 = vmul.f32 0.35355338, %v2110_v5 }
 0x667   : > { %v2105_v33 = vsub.f32 0.0, %v2101_v54 }
 0x668   : > { %v2115_v2 = vsel %vm2114_vm11, %v2112_v1, -inf }
 0x669   : > { %2116 = vmax.xlane.f32.xlu2 %v2115_v2  ;;  %v2107_v53 = vsel %vm2103_vm12, %v2101_v54, %v2105_v33 }
 0x66a   : > { %v2109_v51 = vadd.f32 1.0, %v2107_v53 }
 0x66c   : > { %v2111_v16 = vmul.f32 %v2109_v51, %v2033_v47 }
 0x66e   : > { %v2113_v8 = vmul.f32 0.35355338, %v2111_v16 }
 0x670   : > { %v2118_v4 = vsel %vm2114_vm11, %v2113_v8, -inf }
 0x671   : > { %2119 = vmax.xlane.f32.xlu0 %v2118_v4 }
 0x681   : > { %2198 = vrot.lane.b32.xlu2 %v5440_v56, %s4198_s21 }
 0x685   : > { %2202 = vrot.lane.b32.xlu0 %v5438_v49, %s4198_s21 }
 0x68d   : > { %2200 = vrot.lane.b32.xlu0 %v5446_v24, %s4198_s21  ;;  %s722_s21 = scalar_lea.vmem %s5998_s23, %s4374_s26  ;;  %s5831_s23 = scalar_lea.vmem %s5921_s22, %s3696_s29 }
 0x68e   : > { %s6000_s26 = sld [smem:[#allocation24_spill]] }
 0x694   : > { %s4153_s4 = scalar_lea.hbm %s6000_s26, 32 }
 0x695   : > { %3873 = vrot.lane.b32.xlu0 %v5477_v6, %s4199_s30  ;;  %s3574_s30 = scalar_lea.hbm %s6000_s26, %s3819_s0 }
 0x69d   : > { %2606 = vrot.lane.b32.xlu0 %v5440_v56, %s4200_s1 }
 0x6a5   : > { %2408 = vrot.lane.b32.xlu0 %v5429_v0, %s4201_s27 }
 0x6ad   : > { %2402 = vrot.lane.b32.xlu0 %v5440_v56, %s4201_s27 }
 0x6dc   : > { %v2117_v59 = vpop.xlane.xlu2 %2116 }
 0x6dd   : > { %v2121_v50 = vsub.f32 %v2112_v1, %v2117_v59 }
 0x6df   : > { %v2123_v60 = vmul.f32 1.442695, %v2121_v50 }
 0x6e1   : > { %4034 = vpow2.f32 %v2123_v60 }
 0x6e4   : > { %v2120_v10 = vpop.xlane.xlu0 %2119  ;;  %v2199_v56 = vpop.permute.xlu2 %2198 }
 0x6e5   : > { %v2122_v23 = vsub.f32 %v2113_v8, %v2120_v10 }
 0x6e7   : > { %v4035_v28 = vpop.eup %4034  ;;  %v2125_v62 = vmul.f32 1.442695, %v2122_v23 }
 0x6e8   : > { %v2127_v31 = vsel %vm2114_vm11, %v4035_v28, 0.0 }
 0x6e9   : > { %2128 = vadd.xlane.f32.xlu2 %v2127_v31  ;;  %4036 = vpow2.f32 %v2125_v62 }
 0x6ef   : > { %v5487_v15 = vpop.eup %4036 }
 0x6f0   : > { %v2130_v18 = vsel %vm2114_vm11, %v5487_v15, 0.0 }
 0x6f1   : > { %2131 = vadd.xlane.f32.xlu1 %v2130_v18 }
 0x6f7   : > { %v2203_v37 = vpop.permute.xlu0 %2202 }
 0x6f8   : > { %3744 = vmatpush.xpose.msk.msra.mxu2 %vm1996_vm1, %v2203_v37 }
 0x6fb   : > { %3745 = vmatmul.msk.f32.vlgmr.msra.gmra.mxu2 %vm1996_vm1, %v2199_v56 }
 0x6ff   : > { %v2201_v21 = vpop.permute.xlu0 %2200 }
 0x701   : > { %2612 = vrot.lane.b32.xlu2 %v5429_v0, %s4200_s1 }
 0x703   : > { %3746 = vmatmul.msk.f32.gmra.mxu2 %vm1996_vm1, %v2201_v21 }
 0x707   : > { %v3874_v41 = vpop.permute.xlu0 %3873 }
 0x708   : > { %v3875_v14 = vunpack.i.l.bf16 %v3874_v41  ;;  %v3876_v29 = vunpack.i.h.bf16 %v3874_v41 }
 0x709   : > { %2610 = vrot.lane.b32.xlu2 %v5438_v49, %s4200_s1 }
 0x70a   : > { %2189 = vmatpush.msrb.mxu1 %v3875_v14 }
 0x70c   : > { %2190 = vmatpush.msrb.mxu1 %v3876_v29 }
 0x70f   : > { %v2607_v12 = vpop.permute.xlu0 %2606 }
 0x711   : > { %2608 = vrot.lane.b32.xlu2 %v5446_v24, %s4200_s1  ;;  %s3575_s1 = sshll.u32 %s5365_s2, 4  ;;  %s3576_s1 = int_to_ptr.vmem [resolvable:$true] %s3575_s1 }
 0x717   : > { %v2409_v40 = vpop.permute.xlu0 %2408 }
 0x718   : > { %3753 = vmatpush.xpose.msk.msra.mxu1 %vm1996_vm1, %v2409_v40 }
 0x719   : > { %2406 = vrot.lane.b32.xlu2 %v5438_v49, %s4201_s27 }
 0x71f   : > { %v2403_v20 = vpop.permute.xlu0 %2402 }
 0x721   : > { %2404 = vrot.lane.b32.xlu2 %v5446_v24, %s4201_s27  ;;  %s3577_s27 = sshll.u32 %s3574_s30, 4  ;;  %s3578_s27 = int_to_ptr.hbm [resolvable:$true] %s3577_s27 }
 0x722   : > { %s4147_s8 = sshra.s32 %s3578_s27, 4  ;;  %s4148_s8 = int_to_ptr.hbm [resolvable:$true] %s4147_s8 }
 0x723   : > { %p4154_p0 = scmp.lt.s32.totalorder %s4148_s8, %s6000_s26 }
 0x75c   : > { %v2129_v0 = vpop.xlane.xlu2 %2128 }
 0x75d   : > { %4038 = vrcp.f32 %v2129_v0  ;;  %v2144_v17 = vand.u32 2147483648, %v2129_v0  ;;  %v2142_v3 = vand.u32 2147483647, %v2129_v0  ;;  %vm2138_vm14 = vweird.f32 %v2129_v0 }
 0x75f   : > { %v2145_v49 = vor.u32 1.1754944e-38, %v2144_v17  ;;  %vm2143_vm2 = vcmp.eq.f32.partialorder %v2142_v3, 8.507059e+37 }
 0x763   : > { %v4039_v43 = vpop.eup %4038 }
 0x764   : > { %v2134_v32 = vmul.f32 %v4039_v43, %v2129_v0  ;;  %v2613_v58 = vpop.permute.xlu2 %2612  ;;  %v2132_v61 = vpop.xlane.xlu1 %2131  ;;  %vm2139_vm13 = vweird.f32 %v4039_v43 }
 0x765   : > { %3763 = vmatpush.xpose.msk.msrb.mxu2 %vm1996_vm1, %v2613_v58  ;;  %4040 = vrcp.f32 %v2132_v61  ;;  %vm2140_vm15 = vmor %vm2138_vm14, %vm2139_vm13  ;;  %v2159_v35 = vand.u32 2147483648, %v2132_v61  ;;  %v2157_v25 = vand.u32 2147483647, %v2132_v61  ;;  %vm2153_vm4 = vweird.f32 %v2132_v61 }
 0x766   : > { %v2135_v55 = vsub.f32 1.0, %v2134_v32 }
 0x767   : > { %v2160_v9 = vor.u32 1.1754944e-38, %v2159_v35  ;;  %vm2158_vm5 = vcmp.eq.f32.partialorder %v2157_v25, 8.507059e+37 }
 0x768   : > { %v2136_v26 = vmul.f32 %v4039_v43, %v2135_v55 }
 0x76a   : > { %v2137_v7 = vadd.f32 %v4039_v43, %v2136_v26 }
 0x76b   : > { %v4041_v52 = vpop.eup %4040 }
 0x76c   : > { %v2611_v24 = vpop.permute.xlu2 %2610  ;;  %v2141_v48 = vsel %vm2140_vm15, %v4039_v43, %v2137_v7  ;;  %v2149_v63 = vmul.f32 %v4041_v52, %v2132_v61  ;;  %vm2154_vm3 = vweird.f32 %v4041_v52 }
 0x76d   : > { %3764 = vmatpush.xpose.msk.msrb.mxu2 %vm1996_vm1, %v2611_v24  ;;  %v2146_v19 = vsel %vm2143_vm2, %v2145_v49, %v2141_v48  ;;  %vm2155_vm6 = vmor %vm2153_vm4, %vm2154_vm3 }
 0x76e   : > { %v2147_v57 = vmul.f32 %v4035_v28, %v2146_v19  ;;  %v2150_v22 = vsub.f32 1.0, %v2149_v63 }
 0x770   : > { %3741 = vmatmul.msk.f32.vlgmr.msrb.gmra.mxu1 %vm2114_vm11, %v2147_v57  ;;  %3765 = vmatmul.msk.f32.vlgmr.msrb.gmra.mxu2 %vm1996_vm1, %v2607_v12  ;;  %v2151_v44 = vmul.f32 %v4041_v52, %v2150_v22 }
 0x772   : > { %v2152_v30 = vadd.f32 %v4041_v52, %v2151_v44 }
 0x774   : > { %v2609_v27 = vpop.permute.xlu2 %2608  ;;  %v2156_v39 = vsel %vm2155_vm6, %v4041_v52, %v2152_v30 }
 0x775   : > { %v2161_v13 = vsel %vm2158_vm5, %v2160_v9, %v2156_v39 }
 0x776   : > { %v2162_v46 = vmul.f32 %v5487_v15, %v2161_v13 }
 0x778   : > { %3766 = vmatmul.msk.f32.gmra.mxu2 %vm1996_vm1, %v2609_v27  ;;  %3742 = vmatmul.msk.f32.gmra.mxu1 %vm2114_vm11, %v2162_v46 }
 0x77c   : > { %v2407_v34 = vpop.permute.xlu2 %2406 }
 0x77d   : > { %3754 = vmatpush.xpose.msk.msra.mxu1 %vm1996_vm1, %v2407_v34 }
 0x77e   : > { %v5513_v38 = vpop.f32.mrf.mxu2 }
 0x77f   : > { %v5516_v5 = vmul.f32 0.70710677, %v5513_v38 }
 0x780   : > { %3755 = vmatmul.msk.f32.vlgmr.msra.gmra.mxu1 %vm1996_vm1, %v2403_v20  ;;  %v2237_v20 = vmul.f32 0.5, %v5513_v38 }
 0x781   : > { %v2241_v45 = vand.u32 2147483647, %v5516_v5  ;;  %vm2307_vm2 = vcmp.ge.f32.partialorder %v5516_v5, 0.0 }
 0x783   : > { %v2243_v1 = vmul.f32 0.3275911, %v2241_v45  ;;  %v2295_v15 = vsub.f32 0.0, %v2241_v45 }
 0x784   : > { %v2405_v33 = vpop.permute.xlu2 %2404 }
 0x785   : > { %v2245_v54 = vadd.f32 1.0, %v2243_v1  ;;  %v2297_v29 = vmul.f32 %v2295_v15, %v2241_v45 }
 0x786   : > { %v5520_v2 = vpop.f32.mrf.mxu2 }
 0x787   : > { %4042 = vrcp.f32 %v2245_v54  ;;  %v5523_v53 = vmul.f32 0.70710677, %v5520_v2  ;;  %v2258_v50 = vand.u32 2147483648, %v2245_v54  ;;  %v2256_v10 = vand.u32 2147483647, %v2245_v54 }
 0x788   : > { %3756 = vmatmul.msk.f32.gmra.mxu1 %vm1996_vm1, %v2405_v33  ;;  %vm2252_vm8 = vweird.f32 %v2245_v54  ;;  %v2299_v61 = vmul.f32 1.442695, %v2297_v29 }
 0x789   : > { %v2242_v47 = vand.u32 2147483647, %v5523_v53  ;;  %v2259_v28 = vor.u32 1.1754944e-38, %v2258_v50  ;;  %vm2257_vm10 = vcmp.eq.f32.partialorder %v2256_v10, 8.507059e+37  ;;  %vm2308_vm3 = vcmp.ge.f32.partialorder %v5523_v53, 0.0 }
 0x78b   : > { %v2244_v51 = vmul.f32 0.3275911, %v2242_v47  ;;  %v2296_v17 = vsub.f32 0.0, %v2242_v47 }
 0x78d   : > { %v4043_v16 = vpop.eup %4042  ;;  %v2246_v4 = vadd.f32 1.0, %v2244_v51  ;;  %v2298_v24 = vmul.f32 %v2296_v17, %v2242_v47 }
 0x78e   : > { %v2248_v8 = vmul.f32 %v4043_v16, %v2245_v54  ;;  %vm2253_vm7 = vweird.f32 %v4043_v16 }
 0x78f   : > { %4044 = vrcp.f32 %v2246_v4  ;;  %vm2254_vm9 = vmor %vm2252_vm8, %vm2253_vm7  ;;  %v2273_v41 = vand.u32 2147483648, %v2246_v4  ;;  %v2271_v40 = vand.u32 2147483647, %v2246_v4  ;;  %vm2267_vm13 = vweird.f32 %v2246_v4 }
 0x790   : > { %v2249_v59 = vsub.f32 1.0, %v2248_v8  ;;  %4046 = vpow2.f32 %v2299_v61  ;;  %v2301_v22 = vmul.f32 1.442695, %v2298_v24 }
 0x791   : > { %v2274_v32 = vor.u32 1.1754944e-38, %v2273_v41  ;;  %vm2272_vm15 = vcmp.eq.f32.partialorder %v2271_v40, 8.507059e+37 }
 0x792   : > { %v2250_v60 = vmul.f32 %v4043_v16, %v2249_v59  ;;  %4048 = vpow2.f32 %v2301_v22  ;;  %v2238_v59 = vmul.f32 0.5, %v5520_v2 }
 0x794   : > { %v2251_v23 = vadd.f32 %v4043_v16, %v2250_v60 }
 0x795   : > { %v4045_v62 = vpop.eup %4044 }
 0x796   : > { %v2255_v31 = vsel %vm2254_vm9, %v4043_v16, %v2251_v23  ;;  %v2263_v18 = vmul.f32 %v4045_v62, %v2246_v4  ;;  %vm2268_vm12 = vweird.f32 %v4045_v62  ;;  %v4047_v44 = vpop.eup %4046 }
 0x797   : > { %v2260_v37 = vsel %vm2257_vm10, %v2259_v28, %v2255_v31  ;;  %vm2269_vm14 = vmor %vm2267_vm13, %vm2268_vm12 }
 0x798   : > { %v2277_v56 = vmul.f32 1.0614054, %v2260_v37  ;;  %v2264_v21 = vsub.f32 1.0, %v2263_v18  ;;  %v4049_v54 = vpop.eup %4048 }
 0x79a   : > { %v3747_v14 = vadd.f32 -1.4531521, %v2277_v56  ;;  %v2265_v12 = vmul.f32 %v4045_v62, %v2264_v21 }
 0x79c   : > { %v2281_v0 = vmul.f32 %v3747_v14, %v2260_v37  ;;  %v2266_v43 = vadd.f32 %v4045_v62, %v2265_v12 }
 0x79e   : > { %v2283_v58 = vadd.f32 1.4214138, %v2281_v0  ;;  %v2270_v55 = vsel %vm2269_vm14, %v4045_v62, %v2266_v43 }
 0x79f   : > { %v2275_v3 = vsel %vm2272_vm15, %v2274_v32, %v2270_v55 }
 0x7a0   : > { %v2285_v26 = vmul.f32 %v2283_v58, %v2260_v37  ;;  %v2278_v7 = vmul.f32 1.0614054, %v2275_v3 }
 0x7a2   : > { %v3749_v49 = vadd.f32 -0.28449672, %v2285_v26  ;;  %v3748_v52 = vadd.f32 -1.4531521, %v2278_v7 }
 0x7a4   : > { %v2289_v48 = vmul.f32 %v3749_v49, %v2260_v37  ;;  %v2282_v63 = vmul.f32 %v3748_v52, %v2275_v3 }
 0x7a6   : > { %v2291_v19 = vadd.f32 0.2548296, %v2289_v48  ;;  %v2284_v57 = vadd.f32 1.4214138, %v2282_v63 }
 0x7a8   : > { %v2293_v35 = vmul.f32 %v2291_v19, %v2260_v37  ;;  %v2286_v25 = vmul.f32 %v2284_v57, %v2275_v3 }
 0x7aa   : > { %v2303_v30 = vmul.f32 %v4047_v44, %v2293_v35  ;;  %v3750_v9 = vadd.f32 -0.28449672, %v2286_v25 }
 0x7ac   : > { %v2305_v27 = vsub.f32 1.0, %v2303_v30  ;;  %v2290_v39 = vmul.f32 %v3750_v9, %v2275_v3 }
 0x7ae   : > { %v2309_v13 = vsub.f32 0.0, %v2305_v27  ;;  %v2292_v46 = vadd.f32 0.2548296, %v2290_v39 }
 0x7b0   : > { %v2311_v34 = vsel %vm2307_vm2, %v2305_v27, %v2309_v13  ;;  %v2294_v1 = vmul.f32 %v2292_v46, %v2275_v3 }
 0x7b1   : > { %v2313_v45 = vadd.f32 1.0, %v2311_v34 }
 0x7b2   : > { %v2304_v47 = vmul.f32 %v4049_v54, %v2294_v1 }
 0x7b3   : > { %v2315_v33 = vmul.f32 %v2313_v45, %v2237_v20 }
 0x7b4   : > { %v2306_v16 = vsub.f32 1.0, %v2304_v47 }
 0x7b5   : > { %v5529_v51 = vmul.f32 0.35355338, %v2315_v33 }
 0x7b6   : > { %v2310_v4 = vsub.f32 0.0, %v2306_v16 }
 0x7b7   : > { %v2319_v8 = vsel %vm2114_vm11, %v5529_v51, -inf }
 0x7b8   : > { %2320 = vmax.xlane.f32.xlu1 %v2319_v8  ;;  %v2312_v5 = vsel %vm2308_vm3, %v2306_v16, %v2310_v4 }
 0x7b9   : > { %v2314_v50 = vadd.f32 1.0, %v2312_v5 }
 0x7bb   : > { %v2316_v38 = vmul.f32 %v2314_v50, %v2238_v59 }
 0x7bd   : > { %v5535_v60 = vmul.f32 0.35355338, %v2316_v38 }
 0x7bf   : > { %v2322_v10 = vsel %vm2114_vm11, %v5535_v60, -inf }
 0x7c0   : > { %2323 = vmax.xlane.f32.xlu0 %v2322_v10 }
 0x7ed   : > { %v5539_v23 = vpop.f32.mrf.mxu1 }
 0x7f3   : > { %v5541_v28 = vpop.f32.mrf.mxu2 }
 0x7f4   : > { %v5544_v62 = vmul.f32 0.70710677, %v5541_v28 }
 0x7f5   : > { %v5547_v31 = vpop.f32.mrf.mxu1 }
 0x7f6   : > { %v2649_v53 = vand.u32 2147483647, %v5544_v62 }
 0x7f8   : > { %v2651_v2 = vmul.f32 0.3275911, %v2649_v53  ;;  %v2703_v7 = vsub.f32 0.0, %v2649_v53 }
 0x7fa   : > { %v2653_v15 = vadd.f32 1.0, %v2651_v2  ;;  %v2705_v35 = vmul.f32 %v2703_v7, %v2649_v53 }
 0x7fb   : > { %v5549_v18 = vpop.f32.mrf.mxu2 }
 0x7fc   : > { %4050 = vrcp.f32 %v2653_v15  ;;  %v5552_v37 = vmul.f32 0.70710677, %v5549_v18  ;;  %v2666_v58 = vand.u32 2147483648, %v2653_v15  ;;  %v2664_v3 = vand.u32 2147483647, %v2653_v15 }
 0x7fd   : > { %v5554_v56 = vpop.f32.mrf.mxu1  ;;  %vm2660_vm6 = vweird.f32 %v2653_v15  ;;  %v2707_v20 = vmul.f32 1.442695, %v2705_v35 }
 0x7fe   : > { %v2650_v21 = vand.u32 2147483647, %v5552_v37  ;;  %v5558_v41 = vmul.f32 0.70710677, %v5554_v56  ;;  %v2667_v24 = vor.u32 1.1754944e-38, %v2666_v58  ;;  %vm2665_vm7 = vcmp.eq.f32.partialorder %v2664_v3, 8.507059e+37 }
 0x800   : > { %v2652_v14 = vmul.f32 0.3275911, %v2650_v21  ;;  %v5561_v29 = vand.u32 2147483647, %v5558_v41  ;;  %v2704_v45 = vsub.f32 0.0, %v2650_v21 }
 0x802   : > { %v4051_v12 = vpop.eup %4050  ;;  %v2654_v0 = vadd.f32 1.0, %v2652_v14  ;;  %v2447_v43 = vmul.f32 0.3275911, %v5561_v29  ;;  %v2706_v10 = vmul.f32 %v2704_v45, %v2650_v21 }
 0x803   : > { %v2656_v40 = vmul.f32 %v4051_v12, %v2653_v15  ;;  %vm2661_vm4 = vweird.f32 %v4051_v12 }
 0x804   : > { %4052 = vrcp.f32 %v2654_v0  ;;  %v2449_v61 = vadd.f32 1.0, %v2447_v43  ;;  %vm2662_vm5 = vmor %vm2660_vm6, %vm2661_vm4  ;;  %v2681_v27 = vand.u32 2147483648, %v2654_v0  ;;  %v2679_v39 = vand.u32 2147483647, %v2654_v0 }
 0x805   : > { %v2657_v32 = vsub.f32 1.0, %v2656_v40  ;;  %v5564_v55 = vpop.f32.mrf.mxu1  ;;  %vm2675_vm9 = vweird.f32 %v2654_v0  ;;  %v2709_v35 = vmul.f32 1.442695, %v2706_v10 }
 0x806   : > { %v5567_v26 = vmul.f32 0.70710677, %v5564_v55  ;;  %4054 = vrcp.f32 %v2449_v61  ;;  %v2682_v47 = vor.u32 1.1754944e-38, %v2681_v27  ;;  %v2462_v16 = vand.u32 2147483648, %v2449_v61 }
 0x807   : > { %v2658_v17 = vmul.f32 %v4051_v12, %v2657_v32  ;;  %vm2680_vm12 = vcmp.eq.f32.partialorder %v2679_v39, 8.507059e+37  ;;  %v2460_v59 = vand.u32 2147483647, %v2449_v61  ;;  %vm2456_vm14 = vweird.f32 %v2449_v61 }
 0x808   : > { %v5570_v49 = vand.u32 2147483647, %v5567_v26  ;;  %v2463_v14 = vor.u32 1.1754944e-38, %v2462_v16 }
 0x809   : > { %v2659_v52 = vadd.f32 %v4051_v12, %v2658_v17  ;;  %vm2461_vm2 = vcmp.eq.f32.partialorder %v2460_v59, 8.507059e+37 }
 0x80a   : > { %v4053_v48 = vpop.eup %4052  ;;  %v2448_v63 = vmul.f32 0.3275911, %v5570_v49 }
 0x80b   : > { %v2663_v19 = vsel %vm2662_vm5, %v4051_v12, %v2659_v52  ;;  %v2671_v57 = vmul.f32 %v4053_v48, %v2654_v0  ;;  %vm2676_vm8 = vweird.f32 %v4053_v48  ;;  %v2499_v12 = vsub.f32 0.0, %v5561_v29 }
 0x80c   : > { %v5573_v22 = vsel %vm2665_vm7, %v2667_v24, %v2663_v19  ;;  %v5575_v44 = vadd.f32 1.0, %v2448_v63  ;;  %v4055_v9 = vpop.eup %4054  ;;  %vm2677_vm10 = vmor %vm2675_vm9, %vm2676_vm8  ;;  %vm2715_vm7 = vcmp.ge.f32.partialorder %v5544_v62, 0.0  ;;  %vm2716_vm8 = vcmp.ge.f32.partialorder %v5552_v37, 0.0 }
 0x80d   : > { %v2685_v25 = vmul.f32 1.0614054, %v5573_v22  ;;  %v2672_v30 = vsub.f32 1.0, %v2671_v57  ;;  %v2452_v46 = vmul.f32 %v4055_v9, %v2449_v61  ;;  %vm2457_vm13 = vweird.f32 %v4055_v9 }
 0x80e   : > { %4056 = vrcp.f32 %v5575_v44  ;;  %vm2458_vm15 = vmor %vm2456_vm14, %vm2457_vm13  ;;  %v2477_v58 = vand.u32 2147483648, %v5575_v44  ;;  %v2475_v21 = vand.u32 2147483647, %v5575_v44  ;;  %vm2471_vm4 = vweird.f32 %v5575_v44 }
 0x80f   : > { %v2673_v13 = vmul.f32 %v4053_v48, %v2672_v30  ;;  %v3767_v34 = vadd.f32 -1.4531521, %v2685_v25  ;;  %v2453_v1 = vsub.f32 1.0, %v2452_v46  ;;  %4058 = vpow2.f32 %v2707_v20 }
 0x810   : > { %v2501_v25 = vmul.f32 %v2499_v12, %v5561_v29  ;;  %v2478_v30 = vor.u32 1.1754944e-38, %v2477_v58  ;;  %vm2476_vm5 = vcmp.eq.f32.partialorder %v2475_v21, 8.507059e+37  ;;  %v2500_v46 = vsub.f32 0.0, %v5570_v49 }
 0x811   : > { %v2689_v54 = vmul.f32 %v3767_v34, %v5573_v22  ;;  %v2674_v33 = vadd.f32 %v4053_v48, %v2673_v13  ;;  %v2454_v8 = vmul.f32 %v4055_v9, %v2453_v1  ;;  %4060 = vpow2.f32 %v2709_v35 }
 0x812   : > { %v2646_v35 = vmul.f32 0.5, %v5549_v18  ;;  %vm2511_vm9 = vcmp.ge.f32.partialorder %v5558_v41, 0.0 }
 0x813   : > { %v2691_v4 = vadd.f32 1.4214138, %v2689_v54  ;;  %v2678_v5 = vsel %vm2677_vm10, %v4053_v48, %v2674_v33  ;;  %v2455_v40 = vadd.f32 %v4055_v9, %v2454_v8  ;;  %v2503_v33 = vmul.f32 1.442695, %v2501_v25 }
 0x814   : > { %v4057_v50 = vpop.eup %4056  ;;  %v2683_v38 = vsel %vm2680_vm12, %v2682_v47, %v2678_v5  ;;  %v2502_v8 = vmul.f32 %v2500_v46, %v5570_v49  ;;  %vm2512_vm10 = vcmp.ge.f32.partialorder %v5567_v26, 0.0 }
 0x815   : > { %v2467_v53 = vmul.f32 %v4057_v50, %v5575_v44  ;;  %v2693_v2 = vmul.f32 %v2691_v4, %v5573_v22  ;;  %v2686_v15 = vmul.f32 1.0614054, %v2683_v38  ;;  %vm2472_vm3 = vweird.f32 %v4057_v50  ;;  %v4059_v24 = vpop.eup %4058 }
 0x816   : > { %v2459_v17 = vsel %vm2458_vm15, %v4055_v9, %v2455_v40  ;;  %vm2473_vm6 = vmor %vm2471_vm4, %vm2472_vm3  ;;  %4062 = vpow2.f32 %v2503_v33  ;;  %v2505_v12 = vmul.f32 1.442695, %v2502_v8  ;;  %v2442_v8 = vmul.f32 0.5, %v5564_v55 }
 0x817   : > { %v2468_v0 = vsub.f32 1.0, %v2467_v53  ;;  %v3769_v43 = vadd.f32 -0.28449672, %v2693_v2  ;;  %v3768_v32 = vadd.f32 -1.4531521, %v2686_v15  ;;  %v2464_v61 = vsel %vm2461_vm2, %v2463_v14, %v2459_v17  ;;  %v4061_v15 = vpop.eup %4060 }
 0x818   : > { %v2481_v48 = vmul.f32 1.0614054, %v2464_v61  ;;  %v2645_v14 = vmul.f32 0.5, %v5541_v28  ;;  %4064 = vpow2.f32 %v2505_v12 }
 0x819   : > { %v2469_v3 = vmul.f32 %v4057_v50, %v2468_v0  ;;  %v2697_v7 = vmul.f32 %v3769_v43, %v5573_v22  ;;  %v2690_v52 = vmul.f32 %v3768_v32, %v2683_v38 }
 0x81a   : > { %v3757_v9 = vadd.f32 -1.4531521, %v2481_v48 }
 0x81b   : > { %v2699_v63 = vadd.f32 0.2548296, %v2697_v7  ;;  %v2692_v19 = vadd.f32 1.4214138, %v2690_v52  ;;  %v2470_v57 = vadd.f32 %v4057_v50, %v2469_v3 }
 0x81c   : > { %v2485_v34 = vmul.f32 %v3757_v9, %v2464_v61  ;;  %v4063_v7 = vpop.eup %4062 }
 0x81d   : > { %v2701_v27 = vmul.f32 %v2699_v63, %v5573_v22  ;;  %v2694_v39 = vmul.f32 %v2692_v19, %v2683_v38  ;;  %v2474_v13 = vsel %vm2473_vm6, %v4057_v50, %v2470_v57 }
 0x81e   : > { %v2479_v20 = vsel %vm2476_vm5, %v2478_v30, %v2474_v13  ;;  %v2487_v54 = vadd.f32 1.4214138, %v2485_v34 }
 0x81f   : > { %v2711_v44 = vmul.f32 %v4059_v24, %v2701_v27  ;;  %v3770_v45 = vadd.f32 -0.28449672, %v2694_v39  ;;  %v2482_v1 = vmul.f32 1.0614054, %v2479_v20  ;;  %v4065_v27 = vpop.eup %4064 }
 0x820   : > { %v2489_v4 = vmul.f32 %v2487_v54, %v2464_v61  ;;  %v2441_v54 = vmul.f32 0.5, %v5554_v56 }
 0x821   : > { %v2713_v29 = vsub.f32 1.0, %v2711_v44  ;;  %v2698_v47 = vmul.f32 %v3770_v45, %v2683_v38  ;;  %v3758_v16 = vadd.f32 -1.4531521, %v2482_v1 }
 0x822   : > { %v3759_v50 = vadd.f32 -0.28449672, %v2489_v4 }
 0x823   : > { %v2717_v22 = vsub.f32 0.0, %v2713_v29  ;;  %v2700_v5 = vadd.f32 0.2548296, %v2698_v47  ;;  %v2486_v59 = vmul.f32 %v3758_v16, %v2479_v20 }
 0x824   : > { %v2493_v0 = vmul.f32 %v3759_v50, %v2464_v61 }
 0x825   : > { %v2719_v10 = vsel %vm2715_vm7, %v2713_v29, %v2717_v22  ;;  %v2702_v53 = vmul.f32 %v2700_v5, %v2683_v38  ;;  %v2488_v2 = vadd.f32 1.4214138, %v2486_v59 }
 0x826   : > { %v2721_v40 = vadd.f32 1.0, %v2719_v10  ;;  %v2495_v58 = vadd.f32 0.2548296, %v2493_v0 }
 0x827   : > { %v2712_v43 = vmul.f32 %v4061_v15, %v2702_v53  ;;  %v2490_v32 = vmul.f32 %v2488_v2, %v2479_v20 }
 0x828   : > { %v2723_v49 = vmul.f32 %v2721_v40, %v2645_v14  ;;  %v2497_v62 = vmul.f32 %v2495_v58, %v2464_v61 }
 0x829   : > { %v2714_v17 = vsub.f32 1.0, %v2712_v43  ;;  %v3760_v21 = vadd.f32 -0.28449672, %v2490_v32 }
 0x82a   : > { %v2725_v3 = vmul.f32 0.35355338, %v2723_v49  ;;  %v2507_v63 = vmul.f32 %v4063_v7, %v2497_v62 }
 0x82b   : > { %v2321_v52 = vpop.xlane.xlu1 %2320  ;;  %v2718_v24 = vsub.f32 0.0, %v2714_v17  ;;  %v2494_v38 = vmul.f32 %v3760_v21, %v2479_v20 }
 0x82c   : > { %v2325_v28 = vsub.f32 %v5529_v51, %v2321_v52  ;;  %v2727_v48 = vsel %vm2114_vm11, %v2725_v3, -inf  ;;  %v2509_v30 = vsub.f32 1.0, %v2507_v63 }
 0x82d   : > { %2728 = vmax.xlane.f32.xlu2 %v2727_v48  ;;  %v2720_v19 = vsel %vm2716_vm8, %v2714_v17, %v2718_v24  ;;  %v2496_v57 = vadd.f32 0.2548296, %v2494_v38 }
 0x82e   : > { %v2722_v25 = vadd.f32 1.0, %v2720_v19  ;;  %v2327_v9 = vmul.f32 1.442695, %v2325_v28  ;;  %v2513_v13 = vsub.f32 0.0, %v2509_v30 }
 0x82f   : > { %v2498_v61 = vmul.f32 %v2496_v57, %v2479_v20 }
 0x830   : > { %v2724_v39 = vmul.f32 %v2722_v25, %v2646_v35  ;;  %4066 = vpow2.f32 %v2327_v9  ;;  %v2515_v37 = vsel %vm2511_vm9, %v2509_v30, %v2513_v13 }
 0x831   : > { %v2508_v46 = vmul.f32 %v4065_v27, %v2498_v61  ;;  %v2517_v45 = vadd.f32 1.0, %v2515_v37 }
 0x832   : > { %v2726_v34 = vmul.f32 0.35355338, %v2724_v39 }
 0x833   : > { %v2510_v44 = vsub.f32 1.0, %v2508_v46  ;;  %v2519_v33 = vmul.f32 %v2517_v45, %v2441_v54  ;;  %v2324_v41 = vpop.xlane.xlu0 %2323 }
 0x834   : > { %v2730_v51 = vsel %vm2114_vm11, %v2726_v34, -inf  ;;  %v2326_v4 = vsub.f32 %v5535_v60, %v2324_v41 }
 0x835   : > { %2731 = vmax.xlane.f32.xlu1 %v2730_v51  ;;  %v2514_v18 = vsub.f32 0.0, %v2510_v44  ;;  %v2521_v47 = vmul.f32 0.35355338, %v2519_v33 }
 0x836   : > { %v5600_v1 = vpop.eup %4066  ;;  %v2329_v56 = vmul.f32 1.442695, %v2326_v4 }
 0x837   : > { %v2331_v20 = vsel %vm2114_vm11, %v5600_v1, 0.0  ;;  %v2516_v29 = vsel %vm2512_vm10, %v2510_v44, %v2514_v18  ;;  %v2523_v22 = vsel %vm2114_vm11, %v2521_v47, -inf }
 0x838   : > { %v2518_v16 = vadd.f32 1.0, %v2516_v29  ;;  %4068 = vpow2.f32 %v2329_v56 }
 0x83a   : > { %v2520_v5 = vmul.f32 %v2518_v16, %v2442_v8 }
 0x83c   : > { %v2522_v26 = vmul.f32 0.35355338, %v2520_v5 }
 0x83d   : > { %2332 = vadd.xlane.f32.xlu1 %v2331_v20 }
 0x83e   : > { %v2526_v59 = vsel %vm2114_vm11, %v2522_v26, -inf  ;;  %v5611_v50 = vpop.eup %4068 }
 0x83f   : > { %v2334_v55 = vsel %vm2114_vm11, %v5611_v50, 0.0 }
 0x845   : > { %3878 = vrot.lane.b32.xlu2 %v5477_v6, %s4202_s24  ;;  %2524 = vmax.xlane.f32.xlu1 %v2523_v22  ;;  %s6001_s24 = sand.u32 1, %s4187_s28  }
 0x846   : > { %s3559_s7 = scalar_lea.sflag [#allocation3], %s6001_s24 }
 0x84d   : > { %2527 = vmax.xlane.f32.xlu1 %v2526_v59 }
 0x855   : > { %2335 = vadd.xlane.f32.xlu1 %v2334_v55 }
 0x8a0   : > { %v2729_v60 = vpop.xlane.xlu2 %2728 }
 0x8a1   : > { %v2733_v10 = vsub.f32 %v2725_v3, %v2729_v60 }
 0x8a3   : > { %v2735_v53 = vmul.f32 1.442695, %v2733_v10 }
 0x8a5   : > { %4070 = vpow2.f32 %v2735_v53 }
 0x8a8   : > { %v3879_v2 = vpop.permute.xlu2 %3878  ;;  %v2732_v15 = vpop.xlane.xlu1 %2731 }
 0x8a9   : > { %v3880_v14 = vunpack.i.l.bf16 %v3879_v2  ;;  %v2734_v12 = vsub.f32 %v2726_v34, %v2732_v15  ;;  %v3881_v0 = vunpack.i.h.bf16 %v3879_v2 }
 0x8ab   : > { %v5615_v40 = vpop.eup %4070  ;;  %v2737_v43 = vmul.f32 1.442695, %v2734_v12  ;;  %2393 = vmatpush.msrb.mxu3 %v3880_v14 }
 0x8ac   : > { %v2739_v32 = vsel %vm2114_vm11, %v5615_v40, 0.0 }
 0x8ad   : > { %4072 = vpow2.f32 %v2737_v43  ;;  %2740 = vadd.xlane.f32.xlu0 %v2739_v32  ;;  %2394 = vmatpush.msrb.mxu3 %v3881_v0 }
 0x8b0   : > { %v2333_v49 = vpop.xlane.xlu1 %2332 }
 0x8b1   : > { %4074 = vrcp.f32 %v2333_v49  ;;  %v2348_v24 = vand.u32 2147483648, %v2333_v49  ;;  %v2346_v48 = vand.u32 2147483647, %v2333_v49  ;;  %vm2342_vm13 = vweird.f32 %v2333_v49 }
 0x8b3   : > { %v5619_v58 = vpop.eup %4072  ;;  %v2349_v19 = vor.u32 1.1754944e-38, %v2348_v24  ;;  %vm2347_vm15 = vcmp.eq.f32.partialorder %v2346_v48, 8.507059e+37 }
 0x8b4   : > { %v2742_v17 = vsel %vm2114_vm11, %v5619_v58, 0.0 }
 0x8b5   : > { %2743 = vadd.xlane.f32.xlu1 %v2742_v17 }
 0x8b7   : > { %v4075_v21 = vpop.eup %4074 }
 0x8b8   : > { %v2338_v3 = vmul.f32 %v4075_v21, %v2333_v49  ;;  %v2525_v62 = vpop.xlane.xlu1 %2524  ;;  %vm2343_vm12 = vweird.f32 %v4075_v21 }
 0x8b9   : > { %v2529_v7 = vsub.f32 %v2521_v47, %v2525_v62  ;;  %vm2344_vm14 = vmor %vm2342_vm13, %vm2343_vm12 }
 0x8ba   : > { %v2339_v52 = vsub.f32 1.0, %v2338_v3 }
 0x8bb   : > { %v2531_v38 = vmul.f32 1.442695, %v2529_v7 }
 0x8bc   : > { %v2340_v28 = vmul.f32 %v4075_v21, %v2339_v52 }
 0x8bd   : > { %4076 = vpow2.f32 %v2531_v38 }
 0x8be   : > { %v2341_v63 = vadd.f32 %v4075_v21, %v2340_v28 }
 0x8c0   : > { %v2345_v57 = vsel %vm2344_vm14, %v4075_v21, %v2341_v63  ;;  %v2528_v35 = vpop.xlane.xlu1 %2527 }
 0x8c1   : > { %v2350_v25 = vsel %vm2347_vm15, %v2349_v19, %v2345_v57  ;;  %v2530_v30 = vsub.f32 %v2522_v26, %v2528_v35 }
 0x8c2   : > { %v2351_v9 = vmul.f32 %v5600_v1, %v2350_v25 }
 0x8c3   : > { %v5624_v61 = vpop.eup %4076  ;;  %v2533_v27 = vmul.f32 1.442695, %v2530_v30 }
 0x8c4   : > { %3751 = vmatmul.msk.f32.vlgmr.msrb.gmra.mxu3 %vm2114_vm11, %v2351_v9  ;;  %v2535_v39 = vsel %vm2114_vm11, %v5624_v61, 0.0 }
 0x8c5   : > { %4078 = vpow2.f32 %v2533_v27  ;;  %2536 = vadd.xlane.f32.xlu0 %v2535_v39 }
 0x8c8   : > { %v2336_v13 = vpop.xlane.xlu1 %2335 }
 0x8c9   : > { %4080 = vrcp.f32 %v2336_v13  ;;  %v2363_v45 = vand.u32 2147483648, %v2336_v13  ;;  %v2361_v18 = vand.u32 2147483647, %v2336_v13  ;;  %vm2357_vm3 = vweird.f32 %v2336_v13 }
 0x8cb   : > { %v5629_v46 = vpop.eup %4078  ;;  %v2364_v20 = vor.u32 1.1754944e-38, %v2363_v45  ;;  %vm2362_vm6 = vcmp.eq.f32.partialorder %v2361_v18, 8.507059e+37 }
 0x8cc   : > { %v2538_v34 = vsel %vm2114_vm11, %v5629_v46, 0.0 }
 0x8cd   : > { %2539 = vadd.xlane.f32.xlu0 %v2538_v34 }
 0x8ce   : > { %3883 = vrot.lane.b32.xlu1 %v5477_v6, %s4203_s5  ;;  %s4149_s5 = scalar_lea.hbm %s4148_s8, 16 }
 0x8cf   : > { %v4081_v51 = vpop.eup %4080  ;;  %p4150_p11 = scmp.ne.s32.totalorder %s4148_s8, %s4149_s5  ;;  %p4155_p1 = scmp.lt.s32.totalorder %s4153_s4, %s4149_s5 }
 0x8d0   : > { %v2353_v37 = vmul.f32 %v4081_v51, %v2336_v13  ;;  %vm2358_vm2 = vweird.f32 %v4081_v51 }
 0x8d1   : > { %vm2359_vm4 = vmor %vm2357_vm3, %vm2358_vm2  ;;  %p4151_p12 = pnand %p4150_p11, %p4362_p5  ;;  %p4156_p2 = por %p4155_p1, %p4154_p0 }
 0x8d2   : > { %v2354_v44 = vsub.f32 1.0, %v2353_v37 }
 0x8d3   : > { %p4152_p13 = pneg %p4151_p12 }
 0x8d4   : > { %v2355_v1 = vmul.f32 %v4081_v51, %v2354_v44 }
 0x8d5   : > { %p4157_p3 = pnand %p4156_p2, %p4152_p13 }
 0x8d6   : > { %v2356_v54 = vadd.f32 %v4081_v51, %v2355_v1 }
 0x8d8   : > { %v2360_v33 = vsel %vm2359_vm4, %v4081_v51, %v2356_v54 }
 0x8d9   : > { %v2365_v29 = vsel %vm2362_vm6, %v2364_v20, %v2360_v33  ;;  %v2811_v33 = vld [vmem:[%s5996_s9 + $0x8] sm:$0xff] }
 0x8da   : > { %v2366_v41 = vmul.f32 %v5611_v50, %v2365_v29  ;;  %2915 = vmatpush.msra.mxu2 %v2811_v33 }
 0x8dc   : > { %3752 = vmatmul.msk.f32.gmra.mxu3 %vm2114_vm11, %v2366_v41 }
 0x8e1   : > { %3888 = vrot.lane.b32.xlu0 %v5477_v6, %s4204_s6 }
 0x920   : > { %v2741_v47 = vpop.xlane.xlu0 %2740 }
 0x921   : > { %4082 = vrcp.f32 %v2741_v47  ;;  %v2756_v60 = vand.u32 2147483648, %v2741_v47  ;;  %vm2750_vm7 = vweird.f32 %v2741_v47  ;;  %v2754_v10 = vand.u32 2147483647, %v2741_v47 }
 0x923   : > { %v2757_v15 = vor.u32 1.1754944e-38, %v2756_v60  ;;  %vm2755_vm9 = vcmp.eq.f32.partialorder %v2754_v10, 8.507059e+37 }
 0x927   : > { %v4083_v8 = vpop.eup %4082 }
 0x928   : > { %v2744_v16 = vpop.xlane.xlu1 %2743  ;;  %v2746_v4 = vmul.f32 %v4083_v8, %v2741_v47  ;;  %vm2751_vm5 = vweird.f32 %v4083_v8 }
 0x929   : > { %4084 = vrcp.f32 %v2744_v16  ;;  %vm2752_vm8 = vmor %vm2750_vm7, %vm2751_vm5  ;;  %v2771_v17 = vand.u32 2147483648, %v2744_v16  ;;  %vm2765_vm12 = vweird.f32 %v2744_v16  ;;  %v2769_v7 = vand.u32 2147483647, %v2744_v16 }
 0x92a   : > { %v2747_v22 = vsub.f32 1.0, %v2746_v4 }
 0x92b   : > { %v2772_v38 = vor.u32 1.1754944e-38, %v2771_v17  ;;  %vm2770_vm14 = vcmp.eq.f32.partialorder %v2769_v7, 8.507059e+37 }
 0x92c   : > { %v2748_v56 = vmul.f32 %v4083_v8, %v2747_v22 }
 0x92e   : > { %v2749_v55 = vadd.f32 %v4083_v8, %v2748_v56 }
 0x92f   : > { %v4085_v5 = vpop.eup %4084 }
 0x930   : > { %v2761_v26 = vmul.f32 %v4085_v5, %v2744_v16  ;;  %v2753_v53 = vsel %vm2752_vm8, %v4083_v8, %v2749_v55  ;;  %vm2766_vm10 = vweird.f32 %v4085_v5  ;;  %v2814_v16 = vlaneseq }
 0x931   : > { %v2758_v43 = vsel %vm2755_vm9, %v2757_v15, %v2753_v53  ;;  %vm2767_vm13 = vmor %vm2765_vm12, %vm2766_vm10  ;;  %vm2827_vm12 = vcmask 523264   ;;  %v4205_v55 = vmov 0.0  }
 0x932   : > { %v2762_v50 = vsub.f32 1.0, %v2761_v26  ;;  %v2759_v62 = vmul.f32 %v5615_v40, %v2758_v43 }
 0x934   : > { %v2763_v2 = vmul.f32 %v4085_v5, %v2762_v50 }
 0x936   : > { %v2764_v49 = vadd.f32 %v4085_v5, %v2763_v2 }
 0x938   : > { %v2537_v59 = vpop.xlane.xlu0 %2536  ;;  %v2768_v24 = vsel %vm2767_vm13, %v4085_v5, %v2764_v49  ;;  %v5653_v5 = vand.u32 127, %v2814_v16 }
 0x939   : > { %4086 = vrcp.f32 %v2537_v59  ;;  %v2773_v63 = vsel %vm2770_vm14, %v2772_v38, %v2768_v24  ;;  %v2552_v25 = vand.u32 2147483648, %v2537_v59  ;;  %vm2546_vm2 = vweird.f32 %v2537_v59  ;;  %v2813_v24 = vld [vmem:[%s5996_s9 + $0x18] sm:$0xff] }
 0x93a   : > { %v2774_v35 = vmul.f32 %v5619_v58, %v2773_v63  ;;  %v2550_v40 = vand.u32 2147483647, %v2537_v59 }
 0x93b   : > { %v2553_v27 = vor.u32 1.1754944e-38, %v2552_v25 }
 0x93c   : > { %vm2551_vm4 = vcmp.eq.f32.partialorder %v2550_v40, 8.507059e+37 }
 0x93f   : > { %v4087_v6 = vpop.eup %4086 }
 0x940   : > { %v2540_v14 = vpop.xlane.xlu0 %2539  ;;  %v3884_v12 = vpop.permute.xlu1 %3883  ;;  %v2542_v0 = vmul.f32 %v4087_v6, %v2537_v59  ;;  %vm2547_vm15 = vweird.f32 %v4087_v6 }
 0x941   : > { %4088 = vrcp.f32 %v2540_v14  ;;  %v3885_v32 = vunpack.i.l.bf16 %v3884_v12  ;;  %v3886_v21 = vunpack.i.h.bf16 %v3884_v12  ;;  %vm2548_vm3 = vmor %vm2546_vm2, %vm2547_vm15  ;;  %v2567_v37 = vand.u32 2147483648, %v2540_v14 }
 0x942   : > { %v2543_v3 = vsub.f32 1.0, %v2542_v0  ;;  %vm2561_vm5 = vweird.f32 %v2540_v14  ;;  %v2565_v45 = vand.u32 2147483647, %v2540_v14  ;;  %v2810_v0 = vld [vmem:[%s5996_s9] sm:$0xff] }
 0x943   : > { %2801 = vmatpush.msra.mxu3 %v3885_v32  ;;  %v2568_v18 = vor.u32 1.1754944e-38, %v2567_v37 }
 0x944   : > { %v2544_v28 = vmul.f32 %v4087_v6, %v2543_v3  ;;  %vm2566_vm8 = vcmp.eq.f32.partialorder %v2565_v45, 8.507059e+37 }
 0x945   : > { %2802 = vmatpush.msra.mxu3 %v3886_v21 }
 0x946   : > { %3771 = vmatmul.msk.f32.vlgmr.msra.gmra.mxu3 %vm2114_vm11, %v2759_v62  ;;  %v2545_v19 = vadd.f32 %v4087_v6, %v2544_v28 }
 0x947   : > { %v4089_v52 = vpop.eup %4088  ;;  %v2396_v29 = vpop.f32.mrf.mxu3  ;;  %2944 = vmatpush.msrb.mxu3 %v2810_v0 }
 0x948   : > { %v2557_v48 = vmul.f32 %v4089_v52, %v2540_v14  ;;  %v2549_v9 = vsel %vm2548_vm3, %v4087_v6, %v2545_v19  ;;  %vm2562_vm6 = vweird.f32 %v4089_v52 }
 0x949   : > { %v2554_v34 = vsel %vm2551_vm4, %v2553_v27, %v2549_v9  ;;  %vm2563_vm7 = vmor %vm2561_vm5, %vm2562_vm6  ;;  %3078 = vmatpush.msra.mxu3 %v2813_v24 }
 0x94a   : > { %v2558_v57 = vsub.f32 1.0, %v2557_v48  ;;  %v2555_v58 = vmul.f32 %v5624_v61, %v2554_v34 }
 0x94c   : > { %v2559_v30 = vmul.f32 %v4089_v52, %v2558_v57 }
 0x94e   : > { %3772 = vmatmul.msk.f32.gmra.mxu3 %vm2114_vm11, %v2774_v35  ;;  %v2560_v51 = vadd.f32 %v4089_v52, %v2559_v30  ;;  %v3894_v30 = vld [vmem:[%s5997_s10] ss:$0 sm:$0xff] }
 0x950   : > { %v2564_v1 = vsel %vm2563_vm7, %v4089_v52, %v2560_v51 }
 0x951   : > { %v2569_v54 = vsel %vm2566_vm8, %v2568_v18, %v2564_v1 }
 0x952   : > { %v2570_v20 = vmul.f32 %v5629_v46, %v2569_v54  ;;  %v5648_v46 = vshrl.u32 %v2814_v16, 7 }
 0x953   : > { %v3889_v39 = vpop.permute.xlu0 %3888 }
 0x954   : > { %v3890_v13 = vunpack.i.l.bf16 %v3889_v39  ;;  %v3891_v44 = vunpack.i.h.bf16 %v3889_v39  ;;  %v5651_v4 = vmul.u32 4, %v5648_v46  ;;  %v5657_v26 = vadd.s32 8, %v5648_v46 }
 0x956   : > { %2597 = vmatpush.msrb.mxu0 %v3890_v13  ;;  %v2857_v56 = vadd.s32 1, %v5651_v4  ;;  %v2820_v59 = vmul.u32 4, %v5657_v26  ;;  %vm2821_vm10 = vcmp.eq.s32.totalorder %v5653_v5, %v5651_v4  ;;  %v2952_v2 = vadd.s32 2, %v5651_v4 }
 0x957   : > { %v3773_v10 = vsel %vm2821_vm10, 1.0, %v4205_v55  ;;  %v3020_v32 = vadd.s32 3, %v5651_v4 }
 0x958   : > { %2598 = vmatpush.msrb.mxu0 %v3891_v44  ;;  %vm2859_vm9 = vcmp.eq.s32.totalorder %v5653_v5, %v2857_v56  ;;  %v2858_v60 = vadd.s32 1, %v2820_v59  ;;  %vm2822_vm14 = vcmp.eq.s32.totalorder %v5653_v5, %v2820_v59  ;;  %vm2954_vm15 = vcmp.eq.s32.totalorder %v5653_v5, %v2952_v2 }
 0x959   : > { %3761 = vmatmul.msk.f32.vlgmr.msrb.gmra.mxu0 %vm2114_vm11, %v2555_v58  ;;  %v3777_v50 = vsel %vm2859_vm9, 1.0, %v4205_v55  ;;  %v3774_v53 = vsel %vm2822_vm14, 1.0, %v4205_v55  ;;  %v3785_v15 = vsel %vm2954_vm15, 1.0, %v4205_v55  ;;  %v2953_v14 = vadd.s32 2, %v2820_v59 }
 0x95a   : > { %vm2860_vm13 = vcmp.eq.s32.totalorder %v5653_v5, %v2858_v60  ;;  %vm3022_vm3 = vcmp.eq.s32.totalorder %v5653_v5, %v3020_v32  ;;  %v3021_v3 = vadd.s32 3, %v2820_v59 }
 0x95b   : > { %v3778_v6 = vsel %vm2860_vm13, 1.0, %v4205_v55  ;;  %vm2955_vm2 = vcmp.eq.s32.totalorder %v5653_v5, %v2953_v14  ;;  %v3791_v21 = vsel %vm3022_vm3, 1.0, %v4205_v55 }
 0x95c   : > { %v3786_v12 = vsel %vm2955_vm2, 1.0, %v4205_v55  ;;  %vm3023_vm4 = vcmp.eq.s32.totalorder %v5653_v5, %v3021_v3 }
 0x95d   : > { %v3792_v7 = vsel %vm3023_vm4, 1.0, %v4205_v55 }
 0x95f   : > { %v2399_v61 = vpop.f32.mrf.mxu3 }
 0x961   : > { %3762 = vmatmul.msk.f32.gmra.mxu0 %vm2114_vm11, %v2570_v20 }
 0x9c9   : > { %v2804_v41 = vpop.f32.mrf.mxu3 }
 0x9d1   : > { %v2807_v47 = vpop.f32.mrf.mxu3 }
 0x9d2   : > { %2842 = vmatpush.msrb.mxu1 %v2807_v47  ;;  %2879 = vmatpush.msra.mxu0 %v2807_v47 }
 0x9d3   : > { %3042 = vmatpush.msrb.mxu2 %v2807_v47 }
 0x9d4   : > { %2843 = vmatpush.msrb.mxu1 %v2804_v41  ;;  %2880 = vmatpush.msra.mxu0 %v2804_v41 }
 0x9d5   : > { %3043 = vmatpush.msrb.mxu2 %v2804_v41 }
 0x9d6   : > { %v2600_v8 = vpop.f32.mrf.mxu0 }
 0x9de   : > { %v2603_v22 = vpop.f32.mrf.mxu0 }
 0x9df   : > { %2844 = vmatpush.msrb.mxu1 %v2603_v22  ;;  %2881 = vmatpush.msra.mxu0 %v2603_v22 }
 0x9e0   : > { %3044 = vmatpush.msrb.mxu2 %v2603_v22 }
 0x9e1   : > { %2845 = vmatpush.msrb.mxu1 %v2600_v8  ;;  %2882 = vmatpush.msra.mxu0 %v2600_v8 }
 0x9e2   : > { %3045 = vmatpush.msrb.mxu2 %v2600_v8 }
 0x9e3   : > { %2846 = vmatpush.msrb.mxu1 %v2399_v61  ;;  %2883 = vmatpush.msra.mxu0 %v2399_v61 }
 0x9e4   : > { %3046 = vmatpush.msrb.mxu2 %v2399_v61 }
 0x9e5   : > { %2847 = vmatpush.msrb.mxu1 %v2396_v29  ;;  %2884 = vmatpush.msra.mxu0 %v2396_v29 }
 0x9e6   : > { %3047 = vmatpush.msrb.mxu2 %v2396_v29 }
 0x9e7   : > { %2848 = vmatpush.msrb.mxu1 %v5547_v31  ;;  %2885 = vmatpush.msra.mxu0 %v5547_v31 }
 0x9e8   : > { %3048 = vmatpush.msrb.mxu2 %v5547_v31 }
 0x9e9   : > { %2849 = vmatpush.msrb.mxu1 %v5539_v23  ;;  %2886 = vmatpush.msra.mxu0 %v5539_v23 }
 0x9ea   : > { %3049 = vmatpush.msrb.mxu2 %v5539_v23  ;;  %3779 = vmatmul.msk.f32.vlgmr.msra.gmra.mxu0 %vm2827_vm12, %v3777_v50 }
 0x9eb   : > { %2974 = vmatpush.msra.mxu1 %v2807_v47 }
 0x9ec   : > { %3775 = vmatmul.msk.f32.vlgmr.msrb.gmra.mxu1 %vm2827_vm12, %v3773_v10 }
 0x9ed   : > { %2975 = vmatpush.msra.mxu1 %v2804_v41 }
 0x9ef   : > { %2976 = vmatpush.msra.mxu1 %v2603_v22 }
 0x9f1   : > { %2977 = vmatpush.msra.mxu1 %v2600_v8 }
 0x9f2   : > { %3780 = vmatmul.msk.f32.gmra.mxu0 %vm2827_vm12, %v3778_v6 }
 0x9f3   : > { %2978 = vmatpush.msra.mxu1 %v2399_v61 }
 0x9f4   : > { %3776 = vmatmul.msk.f32.gmra.mxu1 %vm2827_vm12, %v3774_v53 }
 0x9f5   : > { %2979 = vmatpush.msra.mxu1 %v2396_v29 }
 0x9f7   : > { %2980 = vmatpush.msra.mxu1 %v5547_v31 }
 0x9f9   : > { %2981 = vmatpush.msra.mxu1 %v5539_v23  ;;  %v2812_v23 = vld [vmem:[%s5996_s9 + $0x10] sm:$0xff] }
 0x9fa   : > { %3010 = vmatpush.msrb.mxu0 %v2812_v23 }
 0x9fc   : > { %3787 = vmatmul.msk.f32.vlgmr.msra.gmra.mxu1 %vm2827_vm12, %v3785_v15 }
 0xa04   : > { %3788 = vmatmul.msk.f32.gmra.mxu1 %vm2827_vm12, %v3786_v12 }
 0xa67   : > { %v2888_v31 = vpop.f32.mrf.mxu0 }
 0xa68   : > { %3781 = vmatmul.msk.f32.vlgmr.msra.gmra.mxu2 %vm1996_vm1, %v2888_v31 }
 0xa69   : > { %v2851_v43 = vpop.f32.mrf.mxu1 }
 0xa6a   : > { %3783 = vmatmul.msk.f32.vlgmr.msrb.gmra.mxu3 %vm1996_vm1, %v2851_v43 }
 0xa6f   : > { %v2891_v49 = vpop.f32.mrf.mxu0 }
 0xa70   : > { %3782 = vmatmul.msk.f32.gmra.mxu2 %vm1996_vm1, %v2891_v49 }
 0xa71   : > { %v2854_v17 = vpop.f32.mrf.mxu1 }
 0xa72   : > { %3784 = vmatmul.msk.f32.gmra.mxu3 %vm1996_vm1, %v2854_v17 }
 0xa78   : > { %3793 = vmatmul.msk.f32.vlgmr.msrb.gmra.mxu2 %vm2827_vm12, %v3791_v21 }
 0xa79   : > { %v2983_v62 = vpop.f32.mrf.mxu1 }
 0xa7a   : > { %3789 = vmatmul.msk.f32.vlgmr.msrb.gmra.mxu0 %vm1996_vm1, %v2983_v62 }
 0xa80   : > { %3794 = vmatmul.msk.f32.gmra.mxu2 %vm2827_vm12, %v3792_v7 }
 0xa81   : > { %v2986_v52 = vpop.f32.mrf.mxu1 }
 0xa82   : > { %3790 = vmatmul.msk.f32.gmra.mxu0 %vm1996_vm1, %v2986_v52 }
 0xaeb   : > { %v2917_v38 = vpop.f32.mrf.mxu2 }
 0xaed   : > { %v2946_v19 = vpop.f32.mrf.mxu3 }
 0xaee   : > { %v2947_v25 = vadd.f32 %v2946_v19, %v2917_v38 }
 0xaf3   : > { %v2920_v28 = vpop.f32.mrf.mxu2 }
 0xaf5   : > { %v2949_v57 = vpop.f32.mrf.mxu3 }
 0xaf6   : > { %v2950_v34 = vadd.f32 %v2949_v57, %v2920_v28 }
 0xaf7   : > { %v3012_v35 = vpop.f32.mrf.mxu0 }
 0xaf8   : > { %v3018_v40 = vadd.f32 %v3012_v35, %v2947_v25 }
 0xafb   : > { %v3051_v48 = vpop.f32.mrf.mxu2 }
 0xafc   : > { %3795 = vmatmul.msk.f32.vlgmr.msra.gmra.mxu3 %vm1996_vm1, %v3051_v48 }
 0xaff   : > { %v3015_v13 = vpop.f32.mrf.mxu0 }
 0xb00   : > { %v3019_v37 = vadd.f32 %v3015_v13, %v2950_v34 }
 0xb03   : > { %v3054_v63 = vpop.f32.mrf.mxu2 }
 0xb04   : > { %3796 = vmatmul.msk.f32.gmra.mxu3 %vm1996_vm1, %v3054_v63 }
 0xb7f   : > { %v3080_v9 = vpop.f32.mrf.mxu3 }
 0xb80   : > { %v3086_v27 = vadd.f32 %v3080_v9, %v3018_v40 }
 0xb82   : > { %v3092_v39 = vadd.f32 %v3894_v30, %v3086_v27 }
 0xb84   : > { %v3094_v51 = vmul.f32 %v3092_v39, %v3092_v39 }
 0xb86   : > { %v3096_v44 = vsel %vm777_vm0, %v3094_v51, 0.0 }
 0xb87   : > { %3097 = vadd.xlane.f32.xlu2 %v3096_v44  ;;  %v3083_v58 = vpop.f32.mrf.mxu3 }
 0xb88   : > { %v3087_v45 = vadd.f32 %v3083_v58, %v3019_v37 }
 0xb8a   : > { %v5716_v1 = vadd.f32 %v3894_v30, %v3087_v45 }
 0xb8c   : > { %v3095_v18 = vmul.f32 %v5716_v1, %v5716_v1 }
 0xb8e   : > { %v3099_v54 = vsel %vm777_vm0, %v3095_v18, 0.0 }
 0xb8f   : > { %3100 = vadd.xlane.f32.xlu1 %v3099_v54 }
 0xbfa   : > { %v3098_v20 = vpop.xlane.xlu2 %3097 }
 0xbfb   : > { %4090 = vrsqrt.f32 %v3098_v20  ;;  %vm3109_vm6 = vcmp.eq.f32.partialorder %v3098_v20, inf  ;;  %v3112_v50 = vand.u32 2147483648, %v3098_v20  ;;  %vm3111_vm5 = vcmp.eq.f32.partialorder %v3098_v20, 0.0 }
 0xc01   : > { %v4091_v33 = vpop.eup %4090 }
 0xc02   : > { %v3103_v29 = vmul.f32 %v4091_v33, %v3098_v20  ;;  %v3101_v61 = vpop.xlane.xlu1 %3100 }
 0xc03   : > { %4092 = vrsqrt.f32 %v3101_v61  ;;  %vm3121_vm7 = vcmp.eq.f32.partialorder %v3101_v61, inf  ;;  %v3124_v12 = vand.u32 2147483648, %v3101_v61  ;;  %vm3123_vm8 = vcmp.eq.f32.partialorder %v3101_v61, 0.0 }
 0xc04   : > { %v3104_v41 = vmul.f32 %v4091_v33, %v3103_v29 }
 0xc06   : > { %v3105_v47 = vmul.f32 0.5, %v3104_v41 }
 0xc08   : > { %v3106_v16 = vsub.f32 1.5, %v3105_v47 }
 0xc09   : > { %v4093_v8 = vpop.eup %4092 }
 0xc0a   : > { %v3107_v4 = vmul.f32 %v4091_v33, %v3106_v16  ;;  %v3115_v22 = vmul.f32 %v4093_v8, %v3101_v61 }
 0xc0c   : > { %v3108_v56 = vmul.f32 %v3107_v4, %v3098_v20  ;;  %v3116_v59 = vmul.f32 %v4093_v8, %v3115_v22 }
 0xc0e   : > { %v3110_v60 = vsel %vm3109_vm6, %v3098_v20, %v3108_v56  ;;  %v3117_v10 = vmul.f32 0.5, %v3116_v59 }
 0xc0f   : > { %v3113_v6 = vsel %vm3111_vm5, %v3112_v50, %v3110_v60 }
 0xc10   : > { %v3126_v53 = vmax.f32 %v3113_v6, 1e-12  ;;  %v3118_v2 = vsub.f32 1.5, %v3117_v10  ;;  %v3895_v6 = vld [vmem:[%s5910_s11] ss:$0 sm:$0xff] }
 0xc12   : > { %4094 = vrcp.f32 %v3126_v53  ;;  %v3119_v15 = vmul.f32 %v4093_v8, %v3118_v2  ;;  %v3139_v17 = vand.u32 2147483648, %v3126_v53  ;;  %v3137_v3 = vand.u32 2147483647, %v3126_v53 }
 0xc13   : > { %vm3133_vm10 = vweird.f32 %v3126_v53 }
 0xc14   : > { %v3120_v14 = vmul.f32 %v3119_v15, %v3101_v61  ;;  %v3140_v52 = vor.u32 1.1754944e-38, %v3139_v17  ;;  %vm3138_vm13 = vcmp.eq.f32.partialorder %v3137_v3, 8.507059e+37  ;;  %v3896_v15 = vld [vmem:[%s5911_s12] ss:$0 sm:$0xff] }
 0xc16   : > { %v3122_v0 = vsel %vm3121_vm7, %v3101_v61, %v3120_v14 }
 0xc17   : > { %v3125_v23 = vsel %vm3123_vm8, %v3124_v12, %v3122_v0 }
 0xc18   : > { %v4095_v31 = vpop.eup %4094  ;;  %v3127_v43 = vmax.f32 %v3125_v23, 1e-12 }
 0xc19   : > { %v3129_v32 = vmul.f32 %v4095_v31, %v3126_v53  ;;  %vm3134_vm9 = vweird.f32 %v4095_v31 }
 0xc1a   : > { %4096 = vrcp.f32 %v3127_v43  ;;  %vm3135_vm12 = vmor %vm3133_vm10, %vm3134_vm9  ;;  %v3154_v19 = vand.u32 2147483648, %v3127_v43  ;;  %v3152_v25 = vand.u32 2147483647, %v3127_v43  ;;  %vm3148_vm15 = vweird.f32 %v3127_v43 }
 0xc1b   : > { %v3130_v49 = vsub.f32 1.0, %v3129_v32 }
 0xc1c   : > { %v3155_v9 = vor.u32 1.1754944e-38, %v3154_v19  ;;  %vm3153_vm3 = vcmp.eq.f32.partialorder %v3152_v25, 8.507059e+37  ;;  %v3282_v19 = vld [vmem:[%s5912_s13] sm:$0xff] }
 0xc1d   : > { %v3131_v21 = vmul.f32 %v4095_v31, %v3130_v49 }
 0xc1f   : > { %v3132_v62 = vadd.f32 %v4095_v31, %v3131_v21 }
 0xc20   : > { %v4097_v7 = vpop.eup %4096 }
 0xc21   : > { %v3136_v24 = vsel %vm3135_vm12, %v4095_v31, %v3132_v62  ;;  %v3144_v38 = vmul.f32 %v4097_v7, %v3127_v43  ;;  %vm3149_vm14 = vweird.f32 %v4097_v7 }
 0xc22   : > { %v3141_v28 = vsel %vm3138_vm13, %v3140_v52, %v3136_v24  ;;  %vm3150_vm2 = vmor %vm3148_vm15, %vm3149_vm14 }
 0xc23   : > { %v3142_v48 = vmul.f32 %v3141_v28, %v3092_v39  ;;  %v3145_v63 = vsub.f32 1.0, %v3144_v38  ;;  %v3283_v28 = vld [vmem:[%s5912_s13 + $0x8] sm:$0xff] }
 0xc24   : > { %3797 = vmatpush.xpose.msk.msrb.mxu1 %vm777_vm0, %v3283_v28 }
 0xc25   : > { %v3158_v57 = vadd.f32 %v3142_v48, %v5361_v36  ;;  %v3146_v35 = vmul.f32 %v4097_v7, %v3145_v63  ;;  %v5754_v48 = vld [vmem:[%s5914_s15 + $0x18] sm:$0xff]  ;;  %v5759_v63 = vld [vmem:[%s5914_s15 + $0x10] sm:$0xff] }
 0xc26   : > { %3356 = vmatpush.msra.mxu0 %v5754_v48 }
 0xc27   : > { %v3162_v40 = vsel %vm777_vm0, %v3158_v57, 0.0  ;;  %v3147_v30 = vadd.f32 %v4097_v7, %v3146_v35  ;;  %v5775_v35 = vld [vmem:[%s5914_s15] sm:$0xff] }
 0xc28   : > { %3163 = vadd.xlane.f32.xlu0 %v3162_v40  ;;  %3357 = vmatpush.msra.mxu0 %v5759_v63 }
 0xc29   : > { %v3151_v27 = vsel %vm3150_vm2, %v4097_v7, %v3147_v30  ;;  %3798 = vmatpush.xpose.msk.msrb.mxu1 %vm777_vm0, %v3282_v19 }
 0xc2a   : > { %v3156_v13 = vsel %vm3153_vm3, %v3155_v9, %v3151_v27 }
 0xc2b   : > { %v3157_v34 = vmul.f32 %v3156_v13, %v5716_v1 }
 0xc2d   : > { %v3159_v39 = vadd.f32 %v3157_v34, %v5371_v42 }
 0xc2f   : > { %v3165_v51 = vsel %vm777_vm0, %v3159_v39, 0.0 }
 0xc30   : > { %3166 = vadd.xlane.f32.xlu2 %v3165_v51 }
 0xc9b   : > { %v3164_v36 = vpop.xlane.xlu0 %3163 }
 0xc9c   : > { %v3168_v37 = vmul.f32 %v3164_v36, %v5378_v11 }
 0xc9e   : > { %v3170_v44 = vsub.f32 %v3158_v57, %v3168_v37  ;;  %v5769_v57 = vld [vmem:[%s5914_s15 + $0x8] sm:$0xff] }
 0xc9f   : > { %3358 = vmatpush.msra.mxu0 %v5769_v57 }
 0xca0   : > { %v3172_v58 = vmul.f32 %v3170_v44, %v3170_v44 }
 0xca1   : > { %3359 = vmatpush.msra.mxu0 %v5775_v35 }
 0xca2   : > { %v3174_v45 = vsel %vm777_vm0, %v3172_v58, 0.0  ;;  %v3461_v58 = vld [vmem:[%s5913_s14 + $0x18] sm:$0xff] }
 0xca3   : > { %3175 = vadd.xlane.f32.xlu2 %v3174_v45  ;;  %v3167_v18 = vpop.xlane.xlu2 %3166  ;;  %v3460_v45 = vld [vmem:[%s5913_s14 + $0x10] sm:$0xff]  ;;  %3477 = vmatpush.msra.mxu1 %v3461_v58 }
 0xca4   : > { %v3169_v54 = vmul.f32 %v3167_v18, %v5378_v11 }
 0xca5   : > { %3478 = vmatpush.msra.mxu1 %v3460_v45 }
 0xca6   : > { %v3171_v20 = vsub.f32 %v3159_v39, %v3169_v54 }
 0xca8   : > { %v3173_v33 = vmul.f32 %v3171_v20, %v3171_v20 }
 0xcaa   : > { %v3177_v1 = vsel %vm777_vm0, %v3173_v33, 0.0  ;;  %v3459_v33 = vld [vmem:[%s5913_s14 + $0x8] sm:$0xff] }
 0xcab   : > { %3178 = vadd.xlane.f32.xlu1 %v3177_v1  ;;  %3479 = vmatpush.msra.mxu1 %v3459_v33 }
 0xd16   : > { %v3176_v42 = vpop.xlane.xlu2 %3175 }
 0xd17   : > { %v3180_v29 = vmul.f32 %v3176_v42, %v5378_v11 }
 0xd19   : > { %v3182_v61 = vadd.f32 1e-05, %v3180_v29  ;;  %v3458_v29 = vld [vmem:[%s5913_s14] sm:$0xff] }
 0xd1a   : > { %3480 = vmatpush.msra.mxu1 %v3458_v29 }
 0xd1b   : > { %4098 = vrsqrt.f32 %v3182_v61  ;;  %vm3190_vm6 = vweird.f32 %v3182_v61 }
 0xd1e   : > { %v3179_v41 = vpop.xlane.xlu1 %3178 }
 0xd1f   : > { %v3181_v47 = vmul.f32 %v3179_v41, %v5378_v11 }
 0xd21   : > { %v4099_v16 = vpop.eup %4098  ;;  %v3183_v8 = vadd.f32 1e-05, %v3181_v47 }
 0xd22   : > { %v3185_v4 = vmul.f32 %v4099_v16, %v3182_v61  ;;  %vm3191_vm4 = vweird.f32 %v4099_v16 }
 0xd23   : > { %4100 = vrsqrt.f32 %v3183_v8  ;;  %vm3192_vm5 = vmor %vm3190_vm6, %vm3191_vm4  ;;  %vm3200_vm8 = vweird.f32 %v3183_v8 }
 0xd24   : > { %v3186_v22 = vmul.f32 %v4099_v16, %v3185_v4 }
 0xd26   : > { %v3187_v56 = vmul.f32 0.5, %v3186_v22 }
 0xd28   : > { %v3188_v59 = vsub.f32 1.5, %v3187_v56 }
 0xd29   : > { %v4101_v50 = vpop.eup %4100 }
 0xd2a   : > { %v3189_v60 = vmul.f32 %v4099_v16, %v3188_v59  ;;  %v3195_v10 = vmul.f32 %v4101_v50, %v3183_v8  ;;  %vm3201_vm7 = vweird.f32 %v4101_v50 }
 0xd2b   : > { %vm3202_vm9 = vmor %vm3200_vm8, %vm3201_vm7 }
 0xd2c   : > { %v3193_v53 = vsel %vm3192_vm5, %v4099_v16, %v3189_v60  ;;  %v3196_v2 = vmul.f32 %v4101_v50, %v3195_v10 }
 0xd2d   : > { %v3204_v11 = vmul.f32 %v3193_v53, %v3170_v44 }
 0xd2e   : > { %v3197_v14 = vmul.f32 0.5, %v3196_v2 }
 0xd2f   : > { %v3209_v12 = vmul.f32 %v3895_v6, %v3204_v11 }
 0xd30   : > { %v3198_v0 = vsub.f32 1.5, %v3197_v14 }
 0xd31   : > { %v3214_v23 = vadd.f32 %v3896_v15, %v3209_v12 }
 0xd32   : > { %v3199_v31 = vmul.f32 %v4101_v50, %v3198_v0 }
 0xd33   : > { %v5738_v43 = vadd.f32 %v3214_v23, %v3214_v23 }
 0xd34   : > { %v3203_v32 = vsel %vm3202_vm9, %v4101_v50, %v3199_v31  ;;  %vm3320_vm9 = vcmp.eq.s32.totalorder %v5657_v26, %v5653_v5 }
 0xd35   : > { %v3218_v49 = vmul.f32 %v5738_v43, %v5738_v43  ;;  %v3205_v17 = vmul.f32 %v3203_v32, %v3171_v20 }
 0xd37   : > { %v3220_v21 = vsel %vm777_vm0, %v3218_v49, 0.0  ;;  %v3210_v3 = vmul.f32 %v3895_v6, %v3205_v17 }
 0xd38   : > { %3221 = vadd.xlane.f32.xlu2 %v3220_v21 }
 0xd39   : > { %v3215_v62 = vadd.f32 %v3896_v15, %v3210_v3 }
 0xd3b   : > { %v5743_v7 = vadd.f32 %v3215_v62, %v3215_v62  ;;  %v3457_v62 = vld [vmem:[%s722_s21] sm:$0x1] }
 0xd3d   : > { %v3219_v52 = vmul.f32 %v5743_v7, %v5743_v7 }
 0xd3f   : > { %v3223_v24 = vsel %vm777_vm0, %v3219_v52, 0.0  ;;  %v3370_v52 = vld [vmem:[%s5916_s17 + $0x8] sm:$0xff] }
 0xd40   : > { %3224 = vadd.xlane.f32.xlu0 %v3223_v24  ;;  %3395 = vmatpush.msra.mxu2 %v3370_v52  ;;  %v3897_v24 = vld [vmem:[%s5915_s16] ss:$0 sm:$0xff] }
 0xd41   : > { %3523 = vmatpush.msrb.mxu0 %v3370_v52 }
 0xdab   : > { %v3222_v38 = vpop.xlane.xlu2 %3221 }
 0xdac   : > { %4102 = vrsqrt.f32 %v3222_v38  ;;  %vm3233_vm10 = vcmp.eq.f32.partialorder %v3222_v38, inf  ;;  %v3236_v44 = vand.u32 2147483648, %v3222_v38  ;;  %vm3235_vm12 = vcmp.eq.f32.partialorder %v3222_v38, 0.0 }
 0xdb2   : > { %v4103_v25 = vpop.eup %4102 }
 0xdb3   : > { %v3227_v40 = vmul.f32 %v4103_v25, %v3222_v38  ;;  %v3225_v30 = vpop.xlane.xlu0 %3224 }
 0xdb4   : > { %4104 = vrsqrt.f32 %v3225_v30  ;;  %vm3245_vm13 = vcmp.eq.f32.partialorder %v3225_v30, inf  ;;  %v3248_v47 = vand.u32 2147483648, %v3225_v30  ;;  %vm3247_vm14 = vcmp.eq.f32.partialorder %v3225_v30, 0.0 }
 0xdb5   : > { %v3228_v9 = vmul.f32 %v4103_v25, %v3227_v40 }
 0xdb7   : > { %v3229_v27 = vmul.f32 0.5, %v3228_v9 }
 0xdb9   : > { %v3230_v13 = vsub.f32 1.5, %v3229_v27 }
 0xdba   : > { %v4105_v34 = vpop.eup %4104 }
 0xdbb   : > { %v3231_v39 = vmul.f32 %v4103_v25, %v3230_v13  ;;  %v3239_v51 = vmul.f32 %v4105_v34, %v3225_v30 }
 0xdbd   : > { %v3232_v36 = vmul.f32 %v3231_v39, %v3222_v38  ;;  %v3240_v37 = vmul.f32 %v4105_v34, %v3239_v51 }
 0xdbf   : > { %v3234_v18 = vsel %vm3233_vm10, %v3222_v38, %v3232_v36  ;;  %v3241_v54 = vmul.f32 0.5, %v3240_v37  ;;  %vm3553_vm10 = vcmask 122880   ;;  %v3340_v36 = vld [vmem:[%s5915_s16] sm:$0x1] }
 0xdc0   : > { %v3237_v20 = vsel %vm3235_vm12, %v3236_v44, %v3234_v18 }
 0xdc1   : > { %v3250_v1 = vmax.f32 %v3237_v20, 1e-12  ;;  %v3242_v42 = vsub.f32 1.5, %v3241_v54  ;;  %v3406_v54 = vld [vmem:[%s5918_s19] sm:$0xff] }
 0xdc2   : > { %3432 = vmatpush.msrb.mxu3 %v3406_v54  ;;  %v3898_v20 = vld [vmem:[%s5917_s18] ss:$0 sm:$0xff] }
 0xdc3   : > { %4106 = vrcp.f32 %v3250_v1  ;;  %v3243_v61 = vmul.f32 %v4105_v34, %v3242_v42  ;;  %v3263_v50 = vand.u32 2147483648, %v3250_v1  ;;  %v3261_v10 = vand.u32 2147483647, %v3250_v1 }
 0xdc4   : > { %vm3257_vm2 = vweird.f32 %v3250_v1 }
 0xdc5   : > { %v3244_v41 = vmul.f32 %v3243_v61, %v3225_v30  ;;  %v3264_v2 = vor.u32 1.1754944e-38, %v3263_v50  ;;  %vm3262_vm4 = vcmp.eq.f32.partialorder %v3261_v10, 8.507059e+37 }
 0xdc7   : > { %v3246_v16 = vsel %vm3245_vm13, %v3225_v30, %v3244_v41 }
 0xdc8   : > { %v3249_v8 = vsel %vm3247_vm14, %v3248_v47, %v3246_v16  ;;  %v3371_v47 = vld [vmem:[%s5917_s18] sm:$0x1] }
 0xdc9   : > { %v4107_v4 = vpop.eup %4106  ;;  %v3251_v22 = vmax.f32 %v3249_v8, 1e-12 }
 0xdca   : > { %v3253_v56 = vmul.f32 %v4107_v4, %v3250_v1  ;;  %vm3258_vm15 = vweird.f32 %v4107_v4 }
 0xdcb   : > { %4108 = vrcp.f32 %v3251_v22  ;;  %vm3259_vm3 = vmor %vm3257_vm2, %vm3258_vm15  ;;  %v3278_v23 = vand.u32 2147483648, %v3251_v22  ;;  %v3276_v32 = vand.u32 2147483647, %v3251_v22  ;;  %vm3272_vm5 = vweird.f32 %v3251_v22 }
 0xdcc   : > { %v3254_v59 = vsub.f32 1.0, %v3253_v56 }
 0xdcd   : > { %v3279_v17 = vor.u32 1.1754944e-38, %v3278_v23  ;;  %vm3277_vm8 = vcmp.eq.f32.partialorder %v3276_v32, 8.507059e+37 }
 0xdce   : > { %v3255_v60 = vmul.f32 %v4107_v4, %v3254_v59 }
 0xdd0   : > { %v3256_v6 = vadd.f32 %v4107_v4, %v3255_v60 }
 0xdd1   : > { %v4109_v53 = vpop.eup %4108 }
 0xdd2   : > { %v3260_v11 = vsel %vm3259_vm3, %v4107_v4, %v3256_v6  ;;  %v3268_v15 = vmul.f32 %v4109_v53, %v3251_v22  ;;  %vm3273_vm6 = vweird.f32 %v4109_v53 }
 0xdd3   : > { %v3265_v14 = vsel %vm3262_vm4, %v3264_v2, %v3260_v11  ;;  %vm3274_vm7 = vmor %vm3272_vm5, %vm3273_vm6 }
 0xdd4   : > { %v3266_v12 = vmul.f32 %v3265_v14, %v5738_v43  ;;  %v3269_v0 = vsub.f32 1.0, %v3268_v15 }
 0xdd6   : > { %3799 = vmatmul.msk.f32.vlgmr.msrb.gmra.mxu1 %vm777_vm0, %v3266_v12  ;;  %3803 = vmatmul.msk.f32.vlgmr.msra.gmra.mxu0 %vm777_vm0, %v3266_v12  ;;  %v3270_v31 = vmul.f32 %v4109_v53, %v3269_v0 }
 0xdd7   : > { %3497 = vmatpush.msrb.mxu1 %v5754_v48 }
 0xdd8   : > { %v3271_v49 = vadd.f32 %v4109_v53, %v3270_v31 }
 0xdd9   : > { %3498 = vmatpush.msrb.mxu1 %v5759_v63 }
 0xdda   : > { %v3275_v21 = vsel %vm3274_vm7, %v4109_v53, %v3271_v49 }
 0xddb   : > { %v3280_v43 = vsel %vm3277_vm8, %v3279_v17, %v3275_v21  ;;  %3499 = vmatpush.msrb.mxu1 %v5769_v57  ;;  %v3802_v57 = vsel %vm3320_vm9, 1.0, %v4205_v55 }
 0xddc   : > { %v3281_v3 = vmul.f32 %v3280_v43, %v5743_v7  ;;  %v3369_v7 = vld [vmem:[%s5916_s17] sm:$0xff] }
 0xddd   : > { %3500 = vmatpush.msrb.mxu1 %v5775_v35  ;;  %3396 = vmatpush.msra.mxu2 %v3369_v7 }
 0xdde   : > { %3800 = vmatmul.msk.f32.gmra.mxu1 %vm777_vm0, %v3281_v3  ;;  %3804 = vmatmul.msk.f32.gmra.mxu0 %vm777_vm0, %v3281_v3 }
 0xddf   : > { %3524 = vmatpush.msrb.mxu0 %v3369_v7  ;;  %3548 = vmatpush.msrb.mxu2 %v3406_v54 }
 0xde6   : > { %3809 = vmatmul.msk.f32.vlgmr.msra.gmra.mxu1 %vm777_vm0, %v3457_v62 }
 0xdee   : > { %3810 = vmatmul.msk.f32.vlgmr.msrb.gmra.mxu1 %vm777_vm0, %v3457_v62  ;;  %vm3319_vm0 = vcmp.eq.s32.totalorder %v5648_v46, %v5653_v5 }
 0xdef   : > { %v3801_v19 = vsel %vm3319_vm0, 1.0, %v4205_v55 }
 0xe53   : > { %v3313_v38 = vpop.f32.mrf.mxu1  ;;  %v3361_v28 = vpop.f32.mrf.mxu0 }
 0xe54   : > { %v3362_v48 = vadd.f32 %v3897_v24, %v3361_v28  ;;  %v3325_v35 = vmul.f32 %v3801_v19, %v3313_v38 }
 0xe56   : > { %v3367_v63 = vmax.f32 %v3362_v48, 0.0  ;;  %v3327_v27 = vsel %vm2114_vm11, %v3325_v35, 0.0 }
 0xe58   : > { %3805 = vmatmul.msk.f32.vlgmr.msra.gmra.mxu2 %vm2114_vm11, %v3367_v63 }
 0xe5b   : > { %v3316_v25 = vpop.f32.mrf.mxu1  ;;  %v3364_v40 = vpop.f32.mrf.mxu0 }
 0xe5c   : > { %v3326_v30 = vmul.f32 %v3802_v57, %v3316_v25  ;;  %v3365_v9 = vadd.f32 %v3897_v24, %v3364_v40 }
 0xe5e   : > { %v3328_v46 = vsel %vm2114_vm11, %v3326_v30, 0.0  ;;  %v3368_v13 = vmax.f32 %v3365_v9, 0.0 }
 0xe5f   : > { %v3329_v34 = vadd.f32 %v3328_v46, %v3327_v27 }
 0xe60   : > { %3806 = vmatmul.msk.f32.gmra.mxu2 %vm2114_vm11, %v3368_v13 }
 0xe61   : > { %v3330_v5 = vrot.slane %v3329_v34, 4 }
 0xe63   : > { %v3331_v26 = vadd.f32 %v3330_v5, %v3329_v34  ;;  %v3482_v55 = vpop.f32.mrf.mxu1 }
 0xe64   : > { %3556 = vst.msk [vmem:[%s5831_s23 + $0x2] sm:$0x1] %vm3553_vm10, %v3482_v55 }
 0xe65   : > { %v3332_v39 = vrot.slane %v3331_v26, 2 }
 0xe67   : > { %v3333_v51 = vadd.f32 %v3332_v39, %v3331_v26 }
 0xe69   : > { %v3334_v37 = vrot.slane %v3333_v51, 1 }
 0xe6b   : > { %v3335_v44 = vadd.f32 %v3334_v37, %v3333_v51  ;;  %v3502_v58 = vpop.f32.mrf.mxu1 }
 0xe6c   : > { %v3503_v45 = vadd.f32 %v3502_v58, %v3340_v36 }
 0xe6d   : > { %3554 = vst.msk [vmem:[%s5831_s23] sm:$0x1] %vm3553_vm10, %v3335_v44 }
 0xe6e   : > { %v3505_v18 = vmax.f32 %v3503_v45, 0.0 }
 0xe70   : > { %3811 = vmatmul.msk.f32.vlgmr.msrb.gmra.mxu0 %vm2114_vm11, %v3505_v18 }
 0xedb   : > { %v3398_v33 = vpop.f32.mrf.mxu2 }
 0xedc   : > { %v3399_v1 = vadd.f32 %v3898_v20, %v3398_v33 }
 0xede   : > { %v3404_v42 = vmax.f32 %v3399_v1, 0.0 }
 0xee0   : > { %3807 = vmatmul.msk.f32.vlgmr.msrb.gmra.mxu3 %vm1996_vm1, %v3404_v42 }
 0xee3   : > { %v3401_v29 = vpop.f32.mrf.mxu2 }
 0xee4   : > { %v3402_v61 = vadd.f32 %v3898_v20, %v3401_v29 }
 0xee6   : > { %v3405_v41 = vmax.f32 %v3402_v61, 0.0 }
 0xee8   : > { %3808 = vmatmul.msk.f32.gmra.mxu3 %vm1996_vm1, %v3405_v41 }
 0xeed   : > { %v3526_v16 = vpop.f32.mrf.mxu0 }
 0xeee   : > { %v3527_v8 = vadd.f32 %v3526_v16, %v3371_v47 }
 0xef0   : > { %v3529_v4 = vmax.f32 %v3527_v8, 0.0 }
 0xef2   : > { %3812 = vmatmul.msk.f32.vlgmr.msrb.gmra.mxu2 %vm1996_vm1, %v3529_v4 }
 0xef3   : > { %4160 = shalt.err (!%p4157_p3)
}
 0xef4   : > { %s4206_s2 = smov 128   ;;  %s4207_s0 = smov 8   ;;  %v4208_v22 = vmov 16.0  }
 0xef5   : > { %3821 = dma.vmem_to_hbm [thread:$0]  (%p4362_p5), %s3576_s1, 256, %s3578_s27, %s3559_s7, %s4206_s2, %s4206_s2, %s4207_s0   ;;  %4110 = vrcp.f32 %v4208_v22 }
 0xef6   : > { %s6002_s9 = sld [smem:[#allocation23_spill]] }
 0xefb   : > { %v4111_v50 = vpop.eup %4110 }
 0xefc   : > { %v3899_v59 = vld [vmem:[%s6002_s9] ss:$0 sm:$0xff]  ;;  %v3450_v10 = vmul.f32 16.0, %v4111_v50  ;;  %vm3454_vm1 = vweird.f32 %v4111_v50 }
 0xefd   : > { %v3407_v23 = vld [vmem:[%s6002_s9] sm:$0x1] }
 0xefe   : > { %v3451_v15 = vsub.f32 1.0, %v3450_v10 }
 0xf00   : > { %v3452_v0 = vmul.f32 %v4111_v50, %v3451_v15 }
 0xf02   : > { %v3453_v17 = vadd.f32 %v4111_v50, %v3452_v0 }
 0xf04   : > { %v3455_v62 = vsel %vm3454_vm1, %v4111_v50, %v3453_v17 }
 0xf63   : > { %v3434_v56 = vpop.f32.mrf.mxu3 }
 0xf64   : > { %v3435_v60 = vadd.f32 %v3899_v59, %v3434_v56 }
 0xf66   : > { %v3440_v2 = vsel %vm2114_vm11, %v3435_v60, 0.0 }
 0xf6b   : > { %v3437_v6 = vpop.f32.mrf.mxu3 }
 0xf6c   : > { %v3438_v53 = vadd.f32 %v3899_v59, %v3437_v6 }
 0xf6e   : > { %v3441_v11 = vsel %vm2114_vm11, %v3438_v53, 0.0 }
 0xf6f   : > { %v3442_v14 = vadd.f32 %v3441_v11, %v3440_v2 }
 0xf71   : > { %v3443_v12 = vrot.slane %v3442_v14, 4 }
 0xf73   : > { %v3444_v31 = vadd.f32 %v3443_v12, %v3442_v14 }
 0xf75   : > { %v3445_v32 = vrot.slane %v3444_v31, 2  ;;  %v3550_v49 = vpop.f32.mrf.mxu2 }
 0xf76   : > { %v3551_v21 = vadd.f32 %v3550_v49, %v3407_v23 }
 0xf77   : > { %v3446_v43 = vadd.f32 %v3445_v32, %v3444_v31 }
 0xf78   : > { %3557 = vst.msk [vmem:[%s5831_s23 + $0x3] sm:$0x1] %vm3553_vm10, %v3551_v21 }
 0xf79   : > { %v3447_v3 = vrot.slane %v3446_v43, 1 }
 0xf7b   : > { %v3448_v52 = vadd.f32 %v3447_v3, %v3446_v43 }
 0xf7d   : > { %v3456_v7 = vmul.f32 %v3455_v62, %v3448_v52 }
 0xf7f   : > { %3555 = vst.msk [vmem:[%s5831_s23 + $0x1] sm:$0x1] %vm3553_vm10, %v3456_v7 }
 0xf80 PF: > { %s6003_s10 = sld [smem:[#allocation7_spill]] }
 0xf81   : > { %s6004_s29 = sld [smem:[#allocation5_spill]] }
 0xf86   : > { %p3827_p4 = scmp.ge.s32.totalorder %s6003_s10, 2 }
 0xf87   : > { %s3595_s27 = sand.u32 1, %s6004_s29  }
 0xf88   : > { %p3824_p5 = pnand %p3827_p4, %p4366_p6  ;;  %s3596_s24 = scalar_lea.sflag [#allocation3], %s3595_s27 }
 0xf8a   : > { %p3825_p7 = pneg %p3824_p5 }
 0xf8c   : > { %4178 = dma.done.wait (%p3825_p7), %s3596_s24, 256  }
 0xf8d   : > { %4180 = vsyncadd (%p3825_p7), %s3596_s24, 4294967040  ;;  %s6006_s30 = sld [smem:[#allocation8_spill]]  ;;  %s6009_s3 = smov %s4187_s28 }
 0xf8e   : > { %s6007_s5 = sld [smem:[#allocation6_spill]] }
 0xf8f   : > { %s6008_s29 = sld [smem:[#allocation9_spill]] }
 0xf93   : > { %p33_p8 = scmp.ge.s32.totalorder %s6006_s30, 4  }
 0xf94   : > { %s6010_s28 = smov %s6007_s5 }
 0xf95   :  { %35 = sbr.rel (!%p33_p8) target bundleno = 17 (0x11), region = 157 }
 0xf9a   :  { %3609 = vsyncpa [#allocation3], 1 }
 0xf9b   :  { %3611 = vsyncpa [#allocation3 + $0x1], 1 }

</bundles_post_ra>
